<compile_context>
chip_gen: v5e
topology: v5e:2x2
jax: 0.10.0
libtpu: 0.0.40
codegen_flags: <defaults>
</compile_context>

<pallas_src>
import functools
import math

import jax
import jax.numpy as jnp
from jax.experimental import pallas as pl
from jax.experimental.pallas import tpu as pltpu


def _round_up(x, m):
    return (x + m - 1) // m * m


# -----------------------------------------------------------------------------
# Pallas kernel: full forward pass (LSTM recurrence + MLP head) in one call.
# NOTE: relies on zero initial (h, c) state (as in the PyTorch module).
# -----------------------------------------------------------------------------
def _lstm_model_kernel(
    x2d_ref,        # (T*Bp, F)    time-major flattened input, row = t*Bp + b
    w_ih0_ref,      # (F, 4Hp)     layer-0 input weights (input-BN folded in)
    b0_ref,         # (1, 4Hp)     layer-0 bias (b_ih + b_hh + BN-shift term)
    w_hh0_ref,      # (H, 4Hp)     layer-0 hidden weights (compact K)
    w_ih1_ref,      # (H, 4Hp)     layer-1 input weights (compact K)
    w_hh1_ref,      # (H, 4Hp)     layer-1 hidden weights (compact K)
    b1_ref,         # (1, 4Hp)     layer-1 combined bias
    head_hbm_ref,   # (HEAD_ROWS, 128) packed MLP-head params, left in HBM (pl.ANY)
    out_ref,        # (Bp, 128)    only column 0 is meaningful
    gx_ref,         # scratch (T*Bp, 4Hp): precomputed layer-0 input gates
    head_ref,       # scratch (HEAD_ROWS, 128): VMEM copy of head params
    head_sem,       # DMA semaphore for the head-param copy
    *, T, Bp, H, Hp, off_fc1, off_fc2, off_fc3, P1, P2,
):
    # ---- Kick off the MLP-head parameter DMA; it is only needed after T steps. ----
    head_cp = pltpu.make_async_copy(head_hbm_ref, head_ref, head_sem)
    head_cp.start()

    # ---- One big MXU call: layer-0 input projection for every timestep. ----
    gx_ref[...] = (
        jnp.dot(x2d_ref[...], w_ih0_ref[...], preferred_element_type=jnp.float32)
        + b0_ref[...]
    )

    # ---- Hoist weights / bias broadcast out of the recurrence. ----
    w_hh0 = w_hh0_ref[...]                                   # (H, 4Hp)
    w_ih1 = w_ih1_ref[...]                                   # (H, 4Hp)
    w_hh1 = w_hh1_ref[...]                                   # (H, 4Hp)
    b1_b = jnp.broadcast_to(b1_ref[...], (Bp, 4 * Hp))       # built once

    def gate_update(gates, c_prev):
        # PyTorch gate order [i, f, g, o]; gate k starts at lane k*Hp (128-aligned),
        # only the first H lanes of each gate block are real.
        i_g = jax.nn.sigmoid(gates[:, 0 * Hp:0 * Hp + H])
        f_g = jax.nn.sigmoid(gates[:, 1 * Hp:1 * Hp + H])
        g_g = jnp.tanh(gates[:, 2 * Hp:2 * Hp + H])
        o_g = jax.nn.sigmoid(gates[:, 3 * Hp:3 * Hp + H])
        c_new = f_g * c_prev + i_g * g_g
        h_new = o_g * jnp.tanh(c_new)
        return h_new, c_new

    zeros = jnp.zeros((Bp, H), jnp.float32)
    h1, c1, h2, c2 = zeros, zeros, zeros, zeros

    # ---- Recurrence: fully unrolled static loop (T small & fixed). ----
    gx_next = gx_ref[pl.ds(0, Bp), :]
    for t in range(T):
        gx_t = gx_next
        # Layer-1 hidden matmul depends only on the PREVIOUS step's h2 -> off the
        # h1 critical path of this step (skipped at t==0 where h2 == 0).
        if t > 0:
            g_h2 = jnp.dot(h2, w_hh1, preferred_element_type=jnp.float32)
        else:
            g_h2 = jnp.zeros((Bp, 4 * Hp), jnp.float32)
        # Preload next step's precomputed input gates (avoids a false serialization
        # on the gx scratch between unrolled iterations).
        if t + 1 < T:
            gx_next = gx_ref[pl.ds((t + 1) * Bp, Bp), :]

        # Layer 0: a single K=H matmul on the serial path (h1 == 0 at t == 0).
        if t > 0:
            gates0 = gx_t + jnp.dot(h1, w_hh0, preferred_element_type=jnp.float32)
        else:
            gates0 = gx_t
        h1, c1 = gate_update(gates0, c1)

        # Layer 1 (inter-layer dropout = identity in eval mode).
        gates1 = g_h2 + jnp.dot(h1, w_ih1, preferred_element_type=jnp.float32) + b1_b
        h2, c2 = gate_update(gates1, c2)

    # ---- Head params must be resident now; DMA was hidden behind the recurrence. ----
    head_cp.wait()

    fc1_b = head_ref[pl.ds(0, 1), :]                         # (1, 128)  bn1 folded in
    fc2_b = head_ref[pl.ds(1, 1), :]                         # (1, 128)  bn2 folded in
    fc3_b = head_ref[pl.ds(2, 1), :]                         # (1, 128)
    fc1_w = head_ref[pl.ds(off_fc1, H), :]                   # (H, 128)
    fc2_w = head_ref[pl.ds(off_fc2, P1), :]                  # (P1, 128)
    fc3_w = head_ref[pl.ds(off_fc3, P2), :]                  # (P2, 128)

    # ---- MLP head on the last-timestep hidden state of the top LSTM layer. ----
    y = jnp.dot(h2, fc1_w, preferred_element_type=jnp.float32) + fc1_b
    y = jnp.where(y > 0, y, 0.1 * y)                         # LeakyReLU(0.1)
    y = jnp.dot(y, fc2_w, preferred_element_type=jnp.float32) + fc2_b
    y = jnp.where(y > 0, y, 0.1 * y)
    out_ref[...] = jnp.dot(y, fc3_w, preferred_element_type=jnp.float32) + fc3_b


# -----------------------------------------------------------------------------
# Wrapper-side parameter packing: BN folding, gate-axis padding, head packing.
# Contraction (K) dims of the recurrent weights stay compact (= H).
# -----------------------------------------------------------------------------
def pack_params(params):
    H = params["w_hh0"].shape[0]
    F = params["w_ih0"].shape[0]
    Hp = 128          # per-gate lane width (gate axis padded so each gate is a vreg slice)
    P1 = 128          # fc1 output lane width (real H//2, zero-padded)
    P2 = 128          # fc2 output lane width (real H//4, zero-padded)
    Pout = 128        # fc3 output lane width (real 1, zero-padded -> lane-dense store)

    def pad_gates(a):
        # (..., 4H) -> (..., 4Hp): zero-pad each [i|f|g|o] block to Hp lanes.
        lead = a.shape[:-1]
        a4 = a.reshape(lead + (4, H))
        a4 = jnp.pad(a4, [(0, 0)] * len(lead) + [(0, 0), (0, Hp - H)])
        return a4.reshape(lead + (4 * Hp,))

    # Fold eval-mode input BatchNorm into the layer-0 input projection:
    #   (x*s + t) @ W + b == x @ (diag(s) W) + (t @ W + b)
    w_ih0_f = params["w_ih0"] * params["ibn_scale"].reshape(F, 1)
    b0_f = params["b0"] + params["ibn_shift"] @ params["w_ih0"]

    # Fold bn1/bn2 (eval-mode affine) into fc1/fc2.
    fc1_w = params["fc1_w"] * params["bn1_scale"]
    fc1_b = params["fc1_b"] * params["bn1_scale"] + params["bn1_shift"]
    fc2_w = params["fc2_w"] * params["bn2_scale"]
    fc2_b = params["fc2_b"] * params["bn2_scale"] + params["bn2_shift"]

    # Packed MLP-head block: [biases ; fc1_w ; fc2_w ; fc3_w], 128 lanes wide,
    # weight blocks start at sublane(8)-aligned rows.
    off_fc1 = 8
    off_fc2 = off_fc1 + _round_up(H, 8)
    off_fc3 = off_fc2 + P1
    head_rows = off_fc3 + P2
    head = jnp.zeros((head_rows, Pout), jnp.float32)
    head = head.at[0, :fc1_b.shape[1]].set(fc1_b[0])
    head = head.at[1, :fc2_b.shape[1]].set(fc2_b[0])
    head = head.at[2, :params["fc3_b"].shape[1]].set(params["fc3_b"][0])
    head = head.at[off_fc1:off_fc1 + H, :fc1_w.shape[1]].set(fc1_w)
    head = head.at[off_fc2:off_fc2 + fc2_w.shape[0], :fc2_w.shape[1]].set(fc2_w)
    head = head.at[off_fc3:off_fc3 + params["fc3_w"].shape[0],
                   :params["fc3_w"].shape[1]].set(params["fc3_w"])

    packed = {
        "w_ih0": pad_gates(w_ih0_f),          # (F, 4Hp)
        "b0": pad_gates(b0_f),                # (1, 4Hp)
        "w_hh0": pad_gates(params["w_hh0"]),  # (H, 4Hp)  compact K
        "w_ih1": pad_gates(params["w_ih1"]),  # (H, 4Hp)  compact K
        "w_hh1": pad_gates(params["w_hh1"]),  # (H, 4Hp)  compact K
        "b1": pad_gates(params["b1"]),        # (1, 4Hp)
        "head": head,                         # (head_rows, 128)
        "meta": dict(H=H, Hp=Hp, P1=P1, P2=P2,
                     off_fc1=off_fc1, off_fc2=off_fc2, off_fc3=off_fc3),
    }
    return packed


# -----------------------------------------------------------------------------
# Forward wrapper
# -----------------------------------------------------------------------------
def optimized_lstm_forward(x, packed):
    """x: (B, T, F) float32 -> (B, 1) float32."""
    B, T, F = x.shape
    Bp = _round_up(max(B, 1), 8)
    meta = packed["meta"]
    H, Hp = meta["H"], meta["Hp"]
    Pout = packed["head"].shape[1]

    # Batch pad + time-major transpose + flatten (row index = t*Bp + b), so the
    # kernel's per-step read is a contiguous 8-sublane block of precomputed gates.
    x_tm = jnp.transpose(x, (1, 0, 2))                       # (T, B, F)
    x_tm = jnp.pad(x_tm, ((0, 0), (0, Bp - B), (0, 0)))      # (T, Bp, F)
    x2d = x_tm.reshape(T * Bp, F)

    inputs = [
        x2d,
        packed["w_ih0"], packed["b0"],
        packed["w_hh0"], packed["w_ih1"], packed["w_hh1"], packed["b1"],
        packed["head"],
    ]

    kernel = functools.partial(
        _lstm_model_kernel, T=T, Bp=Bp, H=H, Hp=Hp,
        off_fc1=meta["off_fc1"], off_fc2=meta["off_fc2"], off_fc3=meta["off_fc3"],
        P1=meta["P1"], P2=meta["P2"],
    )

    vmem_spec = pl.BlockSpec(memory_space=pltpu.MemorySpace.VMEM)
    out = pl.pallas_call(
        kernel,
        out_shape=jax.ShapeDtypeStruct((Bp, Pout), jnp.float32),
        in_specs=[vmem_spec] * 7 + [pl.BlockSpec(memory_space=pl.ANY)],
        out_specs=vmem_spec,
        scratch_shapes=[
            pltpu.VMEM((T * Bp, 4 * Hp), jnp.float32),       # precomputed input gates
            pltpu.VMEM(packed["head"].shape, jnp.float32),   # head params (DMA target)
            pltpu.SemaphoreType.DMA(()),
        ],
    )(*inputs)
    return out[:B, :1]


# -----------------------------------------------------------------------------
# Deterministic parameter construction (shapes follow the PyTorch module)
# -----------------------------------------------------------------------------
def init_params(key, input_size, hidden_size):
    H = hidden_size
    F = input_size
    eps = 1e-5
    keys = iter(jax.random.split(key, 32))

    def nrm(shape, s):
        return (jax.random.normal(next(keys), shape, jnp.float32) * s).astype(jnp.float32)

    def folded_bn(dim):
        gamma = jax.random.uniform(next(keys), (dim,), jnp.float32, 0.8, 1.2)
        beta = nrm((dim,), 0.1)
        mean = nrm((dim,), 0.1)
        var = jax.random.uniform(next(keys), (dim,), jnp.float32, 0.5, 1.5)
        scale = gamma / jnp.sqrt(var + eps)
        shift = beta - mean * scale
        return scale.reshape(1, dim), shift.reshape(1, dim)

    def lstm_layer(in_dim):
        s = 1.0 / math.sqrt(H)
        w_ih = nrm((4 * H, in_dim), s)   # PyTorch layout (4H, in)
        w_hh = nrm((4 * H, H), s)
        b_ih = nrm((4 * H,), s)
        b_hh = nrm((4 * H,), s)
        return w_ih.T, w_hh.T, (b_ih + b_hh).reshape(1, 4 * H)

    def linear(in_dim, out_dim):
        s = 1.0 / math.sqrt(in_dim)
        w = nrm((out_dim, in_dim), s)    # PyTorch layout (out, in)
        b = nrm((out_dim,), s)
        return w.T, b.reshape(1, out_dim)

    p = {}
    p["ibn_scale"], p["ibn_shift"] = folded_bn(F)
    p["w_ih0"], p["w_hh0"], p["b0"] = lstm_layer(F)
    p["w_ih1"], p["w_hh1"], p["b1"] = lstm_layer(H)
    p["fc1_w"], p["fc1_b"] = linear(H, H // 2)
    p["bn1_scale"], p["bn1_shift"] = folded_bn(H // 2)
    p["fc2_w"], p["fc2_b"] = linear(H // 2, H // 4)
    p["bn2_scale"], p["bn2_shift"] = folded_bn(H // 4)
    p["fc3_w"], p["fc3_b"] = linear(H // 4, 1)
    return p


# -----------------------------------------------------------------------------
# Pure-JAX reference (original unpadded math) for a sanity check
# -----------------------------------------------------------------------------
def reference_forward(x, params):
    B, T, F = x.shape
    H = params["w_hh0"].shape[0]
    x = x * params["ibn_scale"][None] + params["ibn_shift"][None]

    def cell(x_in, h, c, w_ih, w_hh, b):
        g = x_in @ w_ih + h @ w_hh + b
        i = jax.nn.sigmoid(g[:, 0:H])
        f = jax.nn.sigmoid(g[:, H:2 * H])
        gg = jnp.tanh(g[:, 2 * H:3 * H])
        o = jax.nn.sigmoid(g[:, 3 * H:4 * H])
        c = f * c + i * gg
        return o * jnp.tanh(c), c

    h1 = c1 = h2 = c2 = jnp.zeros((B, H), jnp.float32)
    for t in range(T):
        h1, c1 = cell(x[:, t, :], h1, c1, params["w_ih0"], params["w_hh0"], params["b0"])
        h2, c2 = cell(h1, h2, c2, params["w_ih1"], params["w_hh1"], params["b1"])

    y = h2 @ params["fc1_w"] + params["fc1_b"]
    y = y * params["bn1_scale"] + params["bn1_shift"]
    y = jnp.where(y > 0, y, 0.1 * y)
    y = y @ params["fc2_w"] + params["fc2_b"]
    y = y * params["bn2_scale"] + params["bn2_shift"]
    y = jnp.where(y > 0, y, 0.1 * y)
    return y @ params["fc3_w"] + params["fc3_b"]


if __name__ == "__main__":
    B, T, F, H = 4, 8, 16, 32   # batch, seq, input_size (features), hidden_size

    key = jax.random.PRNGKey(0)
    k_param, k_x = jax.random.split(key)
    params = init_params(k_param, input_size=F, hidden_size=H)
    x = jax.random.normal(k_x, (B, T, F), jnp.float32)

    packed = pack_params(params)
    out = optimized_lstm_forward(x, packed)
    out = jax.block_until_ready(out)

    assert out.shape == (B, 1), out.shape
    ref = reference_forward(x, params)
    assert jnp.all(jnp.isfinite(out))
    assert jnp.allclose(out, ref, rtol=5e-3, atol=5e-3), (out, ref)

    print("KERNEL_OK")
</pallas_src>

<mosaic_0001>
module attributes {stable_mosaic.version = 11 : i64} {
  func.func @_lstm_model_kernel(%arg0: memref<64x16xf32, #tpu.memory_space<vmem>>, %arg1: memref<16x512xf32, #tpu.memory_space<vmem>>, %arg2: memref<1x512xf32, #tpu.memory_space<vmem>>, %arg3: memref<32x512xf32, #tpu.memory_space<vmem>>, %arg4: memref<32x512xf32, #tpu.memory_space<vmem>>, %arg5: memref<32x512xf32, #tpu.memory_space<vmem>>, %arg6: memref<1x512xf32, #tpu.memory_space<vmem>>, %arg7: memref<296x128xf32, #tpu.memory_space<any>>, %arg8: memref<8x128xf32, #tpu.memory_space<vmem>>, %arg9: memref<64x512xf32, #tpu.memory_space<vmem>>, %arg10: memref<296x128xf32, #tpu.memory_space<vmem>>, %arg11: memref<!tpu.dma_semaphore, #tpu.memory_space<semaphore_mem>>) attributes {dimension_semantics = [], scalar_prefetch = 0 : i64, scratch_operands = 3 : i64, tpu.core_type = #tpu.core_type<tc>} {
    tpu.enqueue_dma source(%arg7 : memref<296x128xf32, #tpu.memory_space<any>>) target(%arg10 : memref<296x128xf32, #tpu.memory_space<vmem>>) target_semaphore(%arg11 : memref<!tpu.dma_semaphore, #tpu.memory_space<semaphore_mem>>)
    %c0 = arith.constant 0 : index
    %c0_0 = arith.constant 0 : index
    %0 = vector.load %arg0[%c0, %c0_0] : memref<64x16xf32, #tpu.memory_space<vmem>>, vector<64x16xf32>
    %c0_1 = arith.constant 0 : index
    %c0_2 = arith.constant 0 : index
    %1 = vector.load %arg1[%c0_1, %c0_2] : memref<16x512xf32, #tpu.memory_space<vmem>>, vector<16x512xf32>
    %cst = arith.constant dense<0.000000e+00> : vector<64x512xf32>
    %2 = tpu.matmul %0, %1, %cst {dimension_numbers = #tpu.dot_dimension_numbers<[1], [0], [0], [1], [0, 0, 1, 1], [], []>} : vector<64x16xf32>, vector<16x512xf32>, vector<64x512xf32> -> vector<64x512xf32>
    %c0_3 = arith.constant 0 : index
    %c0_4 = arith.constant 0 : index
    %3 = vector.load %arg2[%c0_3, %c0_4] : memref<1x512xf32, #tpu.memory_space<vmem>>, vector<1x512xf32>
    %4 = vector.broadcast %3 : vector<1x512xf32> to vector<64x512xf32>
    %5 = arith.addf %2, %4 : vector<64x512xf32>
    %c0_5 = arith.constant 0 : index
    %c0_6 = arith.constant 0 : index
    %6 = vector.load %arg9[%c0_5, %c0_6] : memref<64x512xf32, #tpu.memory_space<vmem>>, vector<64x512xf32>
    tpu.vector_store %arg9[%c0_5, %c0_6], %5 {strides = array<i32>} : memref<64x512xf32, #tpu.memory_space<vmem>>, vector<64x512xf32>,
    %c0_7 = arith.constant 0 : index
    %c0_8 = arith.constant 0 : index
    %7 = vector.load %arg3[%c0_7, %c0_8] : memref<32x512xf32, #tpu.memory_space<vmem>>, vector<32x512xf32>
    %c0_9 = arith.constant 0 : index
    %c0_10 = arith.constant 0 : index
    %8 = vector.load %arg4[%c0_9, %c0_10] : memref<32x512xf32, #tpu.memory_space<vmem>>, vector<32x512xf32>
    %c0_11 = arith.constant 0 : index
    %c0_12 = arith.constant 0 : index
    %9 = vector.load %arg5[%c0_11, %c0_12] : memref<32x512xf32, #tpu.memory_space<vmem>>, vector<32x512xf32>
    %c0_13 = arith.constant 0 : index
    %c0_14 = arith.constant 0 : index
    %10 = vector.load %arg6[%c0_13, %c0_14] : memref<1x512xf32, #tpu.memory_space<vmem>>, vector<1x512xf32>
    %11 = vector.shape_cast %10 : vector<1x512xf32> to vector<1x512xf32>
    %12 = vector.broadcast %11 : vector<1x512xf32> to vector<8x512xf32>
    %cst_15 = arith.constant 0.000000e+00 : f32
    %13 = vector.broadcast %cst_15 : f32 to vector<8x32xf32>
    %c0_16 = arith.constant 0 : index
    %c0_17 = arith.constant 0 : index
    %14 = vector.load %arg9[%c0_16, %c0_17] : memref<64x512xf32, #tpu.memory_space<vmem>>, vector<8x512xf32>
    %cst_18 = arith.constant 0.000000e+00 : f32
    %15 = vector.broadcast %cst_18 : f32 to vector<8x512xf32>
    %c8 = arith.constant 8 : index
    %c0_19 = arith.constant 0 : index
    %16 = vector.load %arg9[%c8, %c0_19] : memref<64x512xf32, #tpu.memory_space<vmem>>, vector<8x512xf32>
    %17 = vector.extract_strided_slice %14 {offsets = [0, 0], sizes = [8, 32], strides = [1, 1]} : vector<8x512xf32> to vector<8x32xf32>
    %18 = arith.negf %17 : vector<8x32xf32>
    %19 = math.exp %18 : vector<8x32xf32>
    %cst_20 = arith.constant 1.000000e+00 : f32
    %20 = vector.broadcast %cst_20 : f32 to vector<8x32xf32>
    %21 = arith.addf %20, %19 : vector<8x32xf32>
    %22 = arith.divf %20, %21 : vector<8x32xf32>
    %23 = vector.extract_strided_slice %14 {offsets = [0, 128], sizes = [8, 32], strides = [1, 1]} : vector<8x512xf32> to vector<8x32xf32>
    %24 = arith.negf %23 : vector<8x32xf32>
    %25 = math.exp %24 : vector<8x32xf32>
    %cst_21 = arith.constant 1.000000e+00 : f32
    %26 = vector.broadcast %cst_21 : f32 to vector<8x32xf32>
    %27 = arith.addf %26, %25 : vector<8x32xf32>
    %28 = arith.divf %26, %27 : vector<8x32xf32>
    %29 = vector.extract_strided_slice %14 {offsets = [0, 256], sizes = [8, 32], strides = [1, 1]} : vector<8x512xf32> to vector<8x32xf32>
    %30 = math.tanh %29 : vector<8x32xf32>
    %31 = vector.extract_strided_slice %14 {offsets = [0, 384], sizes = [8, 32], strides = [1, 1]} : vector<8x512xf32> to vector<8x32xf32>
    %32 = arith.negf %31 : vector<8x32xf32>
    %33 = math.exp %32 : vector<8x32xf32>
    %cst_22 = arith.constant 1.000000e+00 : f32
    %34 = vector.broadcast %cst_22 : f32 to vector<8x32xf32>
    %35 = arith.addf %34, %33 : vector<8x32xf32>
    %36 = arith.divf %34, %35 : vector<8x32xf32>
    %37 = arith.mulf %28, %13 : vector<8x32xf32>
    %38 = arith.mulf %22, %30 : vector<8x32xf32>
    %39 = arith.addf %37, %38 : vector<8x32xf32>
    %40 = math.tanh %39 : vector<8x32xf32>
    %41 = arith.mulf %36, %40 : vector<8x32xf32>
    %cst_23 = arith.constant dense<0.000000e+00> : vector<8x512xf32>
    %42 = tpu.matmul %41, %8, %cst_23 {dimension_numbers = #tpu.dot_dimension_numbers<[1], [0], [0], [1], [0, 0, 1, 1], [], []>} : vector<8x32xf32>, vector<32x512xf32>, vector<8x512xf32> -> vector<8x512xf32>
    %43 = arith.addf %15, %42 : vector<8x512xf32>
    %44 = arith.addf %43, %12 : vector<8x512xf32>
    %45 = vector.extract_strided_slice %44 {offsets = [0, 0], sizes = [8, 32], strides = [1, 1]} : vector<8x512xf32> to vector<8x32xf32>
    %46 = arith.negf %45 : vector<8x32xf32>
    %47 = math.exp %46 : vector<8x32xf32>
    %cst_24 = arith.constant 1.000000e+00 : f32
    %48 = vector.broadcast %cst_24 : f32 to vector<8x32xf32>
    %49 = arith.addf %48, %47 : vector<8x32xf32>
    %50 = arith.divf %48, %49 : vector<8x32xf32>
    %51 = vector.extract_strided_slice %44 {offsets = [0, 128], sizes = [8, 32], strides = [1, 1]} : vector<8x512xf32> to vector<8x32xf32>
    %52 = arith.negf %51 : vector<8x32xf32>
    %53 = math.exp %52 : vector<8x32xf32>
    %cst_25 = arith.constant 1.000000e+00 : f32
    %54 = vector.broadcast %cst_25 : f32 to vector<8x32xf32>
    %55 = arith.addf %54, %53 : vector<8x32xf32>
    %56 = arith.divf %54, %55 : vector<8x32xf32>
    %57 = vector.extract_strided_slice %44 {offsets = [0, 256], sizes = [8, 32], strides = [1, 1]} : vector<8x512xf32> to vector<8x32xf32>
    %58 = math.tanh %57 : vector<8x32xf32>
    %59 = vector.extract_strided_slice %44 {offsets = [0, 384], sizes = [8, 32], strides = [1, 1]} : vector<8x512xf32> to vector<8x32xf32>
    %60 = arith.negf %59 : vector<8x32xf32>
    %61 = math.exp %60 : vector<8x32xf32>
    %cst_26 = arith.constant 1.000000e+00 : f32
    %62 = vector.broadcast %cst_26 : f32 to vector<8x32xf32>
    %63 = arith.addf %62, %61 : vector<8x32xf32>
    %64 = arith.divf %62, %63 : vector<8x32xf32>
    %65 = arith.mulf %56, %13 : vector<8x32xf32>
    %66 = arith.mulf %50, %58 : vector<8x32xf32>
    %67 = arith.addf %65, %66 : vector<8x32xf32>
    %68 = math.tanh %67 : vector<8x32xf32>
    %69 = arith.mulf %64, %68 : vector<8x32xf32>
    %cst_27 = arith.constant dense<0.000000e+00> : vector<8x512xf32>
    %70 = tpu.matmul %69, %9, %cst_27 {dimension_numbers = #tpu.dot_dimension_numbers<[1], [0], [0], [1], [0, 0, 1, 1], [], []>} : vector<8x32xf32>, vector<32x512xf32>, vector<8x512xf32> -> vector<8x512xf32>
    %c16 = arith.constant 16 : index
    %c0_28 = arith.constant 0 : index
    %71 = vector.load %arg9[%c16, %c0_28] : memref<64x512xf32, #tpu.memory_space<vmem>>, vector<8x512xf32>
    %cst_29 = arith.constant dense<0.000000e+00> : vector<8x512xf32>
    %72 = tpu.matmul %41, %7, %cst_29 {dimension_numbers = #tpu.dot_dimension_numbers<[1], [0], [0], [1], [0, 0, 1, 1], [], []>} : vector<8x32xf32>, vector<32x512xf32>, vector<8x512xf32> -> vector<8x512xf32>
    %73 = arith.addf %16, %72 : vector<8x512xf32>
    %74 = vector.extract_strided_slice %73 {offsets = [0, 0], sizes = [8, 32], strides = [1, 1]} : vector<8x512xf32> to vector<8x32xf32>
    %75 = arith.negf %74 : vector<8x32xf32>
    %76 = math.exp %75 : vector<8x32xf32>
    %cst_30 = arith.constant 1.000000e+00 : f32
    %77 = vector.broadcast %cst_30 : f32 to vector<8x32xf32>
    %78 = arith.addf %77, %76 : vector<8x32xf32>
    %79 = arith.divf %77, %78 : vector<8x32xf32>
    %80 = vector.extract_strided_slice %73 {offsets = [0, 128], sizes = [8, 32], strides = [1, 1]} : vector<8x512xf32> to vector<8x32xf32>
    %81 = arith.negf %80 : vector<8x32xf32>
    %82 = math.exp %81 : vector<8x32xf32>
    %cst_31 = arith.constant 1.000000e+00 : f32
    %83 = vector.broadcast %cst_31 : f32 to vector<8x32xf32>
    %84 = arith.addf %83, %82 : vector<8x32xf32>
    %85 = arith.divf %83, %84 : vector<8x32xf32>
    %86 = vector.extract_strided_slice %73 {offsets = [0, 256], sizes = [8, 32], strides = [1, 1]} : vector<8x512xf32> to vector<8x32xf32>
    %87 = math.tanh %86 : vector<8x32xf32>
    %88 = vector.extract_strided_slice %73 {offsets = [0, 384], sizes = [8, 32], strides = [1, 1]} : vector<8x512xf32> to vector<8x32xf32>
    %89 = arith.negf %88 : vector<8x32xf32>
    %90 = math.exp %89 : vector<8x32xf32>
    %cst_32 = arith.constant 1.000000e+00 : f32
    %91 = vector.broadcast %cst_32 : f32 to vector<8x32xf32>
    %92 = arith.addf %91, %90 : vector<8x32xf32>
    %93 = arith.divf %91, %92 : vector<8x32xf32>
    %94 = arith.mulf %85, %39 : vector<8x32xf32>
    %95 = arith.mulf %79, %87 : vector<8x32xf32>
    %96 = arith.addf %94, %95 : vector<8x32xf32>
    %97 = math.tanh %96 : vector<8x32xf32>
    %98 = arith.mulf %93, %97 : vector<8x32xf32>
    %cst_33 = arith.constant dense<0.000000e+00> : vector<8x512xf32>
    %99 = tpu.matmul %98, %8, %cst_33 {dimension_numbers = #tpu.dot_dimension_numbers<[1], [0], [0], [1], [0, 0, 1, 1], [], []>} : vector<8x32xf32>, vector<32x512xf32>, vector<8x512xf32> -> vector<8x512xf32>
    %100 = arith.addf %70, %99 : vector<8x512xf32>
    %101 = arith.addf %100, %12 : vector<8x512xf32>
    %102 = vector.extract_strided_slice %101 {offsets = [0, 0], sizes = [8, 32], strides = [1, 1]} : vector<8x512xf32> to vector<8x32xf32>
    %103 = arith.negf %102 : vector<8x32xf32>
    %104 = math.exp %103 : vector<8x32xf32>
    %cst_34 = arith.constant 1.000000e+00 : f32
    %105 = vector.broadcast %cst_34 : f32 to vector<8x32xf32>
    %106 = arith.addf %105, %104 : vector<8x32xf32>
    %107 = arith.divf %105, %106 : vector<8x32xf32>
    %108 = vector.extract_strided_slice %101 {offsets = [0, 128], sizes = [8, 32], strides = [1, 1]} : vector<8x512xf32> to vector<8x32xf32>
    %109 = arith.negf %108 : vector<8x32xf32>
    %110 = math.exp %109 : vector<8x32xf32>
    %cst_35 = arith.constant 1.000000e+00 : f32
    %111 = vector.broadcast %cst_35 : f32 to vector<8x32xf32>
    %112 = arith.addf %111, %110 : vector<8x32xf32>
    %113 = arith.divf %111, %112 : vector<8x32xf32>
    %114 = vector.extract_strided_slice %101 {offsets = [0, 256], sizes = [8, 32], strides = [1, 1]} : vector<8x512xf32> to vector<8x32xf32>
    %115 = math.tanh %114 : vector<8x32xf32>
    %116 = vector.extract_strided_slice %101 {offsets = [0, 384], sizes = [8, 32], strides = [1, 1]} : vector<8x512xf32> to vector<8x32xf32>
    %117 = arith.negf %116 : vector<8x32xf32>
    %118 = math.exp %117 : vector<8x32xf32>
    %cst_36 = arith.constant 1.000000e+00 : f32
    %119 = vector.broadcast %cst_36 : f32 to vector<8x32xf32>
    %120 = arith.addf %119, %118 : vector<8x32xf32>
    %121 = arith.divf %119, %120 : vector<8x32xf32>
    %122 = arith.mulf %113, %67 : vector<8x32xf32>
    %123 = arith.mulf %107, %115 : vector<8x32xf32>
    %124 = arith.addf %122, %123 : vector<8x32xf32>
    %125 = math.tanh %124 : vector<8x32xf32>
    %126 = arith.mulf %121, %125 : vector<8x32xf32>
    %cst_37 = arith.constant dense<0.000000e+00> : vector<8x512xf32>
    %127 = tpu.matmul %126, %9, %cst_37 {dimension_numbers = #tpu.dot_dimension_numbers<[1], [0], [0], [1], [0, 0, 1, 1], [], []>} : vector<8x32xf32>, vector<32x512xf32>, vector<8x512xf32> -> vector<8x512xf32>
    %c24 = arith.constant 24 : index
    %c0_38 = arith.constant 0 : index
    %128 = vector.load %arg9[%c24, %c0_38] : memref<64x512xf32, #tpu.memory_space<vmem>>, vector<8x512xf32>
    %cst_39 = arith.constant dense<0.000000e+00> : vector<8x512xf32>
    %129 = tpu.matmul %98, %7, %cst_39 {dimension_numbers = #tpu.dot_dimension_numbers<[1], [0], [0], [1], [0, 0, 1, 1], [], []>} : vector<8x32xf32>, vector<32x512xf32>, vector<8x512xf32> -> vector<8x512xf32>
    %130 = arith.addf %71, %129 : vector<8x512xf32>
    %131 = vector.extract_strided_slice %130 {offsets = [0, 0], sizes = [8, 32], strides = [1, 1]} : vector<8x512xf32> to vector<8x32xf32>
    %132 = arith.negf %131 : vector<8x32xf32>
    %133 = math.exp %132 : vector<8x32xf32>
    %cst_40 = arith.constant 1.000000e+00 : f32
    %134 = vector.broadcast %cst_40 : f32 to vector<8x32xf32>
    %135 = arith.addf %134, %133 : vector<8x32xf32>
    %136 = arith.divf %134, %135 : vector<8x32xf32>
    %137 = vector.extract_strided_slice %130 {offsets = [0, 128], sizes = [8, 32], strides = [1, 1]} : vector<8x512xf32> to vector<8x32xf32>
    %138 = arith.negf %137 : vector<8x32xf32>
    %139 = math.exp %138 : vector<8x32xf32>
    %cst_41 = arith.constant 1.000000e+00 : f32
    %140 = vector.broadcast %cst_41 : f32 to vector<8x32xf32>
    %141 = arith.addf %140, %139 : vector<8x32xf32>
    %142 = arith.divf %140, %141 : vector<8x32xf32>
    %143 = vector.extract_strided_slice %130 {offsets = [0, 256], sizes = [8, 32], strides = [1, 1]} : vector<8x512xf32> to vector<8x32xf32>
    %144 = math.tanh %143 : vector<8x32xf32>
    %145 = vector.extract_strided_slice %130 {offsets = [0, 384], sizes = [8, 32], strides = [1, 1]} : vector<8x512xf32> to vector<8x32xf32>
    %146 = arith.negf %145 : vector<8x32xf32>
    %147 = math.exp %146 : vector<8x32xf32>
    %cst_42 = arith.constant 1.000000e+00 : f32
    %148 = vector.broadcast %cst_42 : f32 to vector<8x32xf32>
    %149 = arith.addf %148, %147 : vector<8x32xf32>
    %150 = arith.divf %148, %149 : vector<8x32xf32>
    %151 = arith.mulf %142, %96 : vector<8x32xf32>
    %152 = arith.mulf %136, %144 : vector<8x32xf32>
    %153 = arith.addf %151, %152 : vector<8x32xf32>
    %154 = math.tanh %153 : vector<8x32xf32>
    %155 = arith.mulf %150, %154 : vector<8x32xf32>
    %cst_43 = arith.constant dense<0.000000e+00> : vector<8x512xf32>
    %156 = tpu.matmul %155, %8, %cst_43 {dimension_numbers = #tpu.dot_dimension_numbers<[1], [0], [0], [1], [0, 0, 1, 1], [], []>} : vector<8x32xf32>, vector<32x512xf32>, vector<8x512xf32> -> vector<8x512xf32>
    %157 = arith.addf %127, %156 : vector<8x512xf32>
    %158 = arith.addf %157, %12 : vector<8x512xf32>
    %159 = vector.extract_strided_slice %158 {offsets = [0, 0], sizes = [8, 32], strides = [1, 1]} : vector<8x512xf32> to vector<8x32xf32>
    %160 = arith.negf %159 : vector<8x32xf32>
    %161 = math.exp %160 : vector<8x32xf32>
    %cst_44 = arith.constant 1.000000e+00 : f32
    %162 = vector.broadcast %cst_44 : f32 to vector<8x32xf32>
    %163 = arith.addf %162, %161 : vector<8x32xf32>
    %164 = arith.divf %162, %163 : vector<8x32xf32>
    %165 = vector.extract_strided_slice %158 {offsets = [0, 128], sizes = [8, 32], strides = [1, 1]} : vector<8x512xf32> to vector<8x32xf32>
    %166 = arith.negf %165 : vector<8x32xf32>
    %167 = math.exp %166 : vector<8x32xf32>
    %cst_45 = arith.constant 1.000000e+00 : f32
    %168 = vector.broadcast %cst_45 : f32 to vector<8x32xf32>
    %169 = arith.addf %168, %167 : vector<8x32xf32>
    %170 = arith.divf %168, %169 : vector<8x32xf32>
    %171 = vector.extract_strided_slice %158 {offsets = [0, 256], sizes = [8, 32], strides = [1, 1]} : vector<8x512xf32> to vector<8x32xf32>
    %172 = math.tanh %171 : vector<8x32xf32>
    %173 = vector.extract_strided_slice %158 {offsets = [0, 384], sizes = [8, 32], strides = [1, 1]} : vector<8x512xf32> to vector<8x32xf32>
    %174 = arith.negf %173 : vector<8x32xf32>
    %175 = math.exp %174 : vector<8x32xf32>
    %cst_46 = arith.constant 1.000000e+00 : f32
    %176 = vector.broadcast %cst_46 : f32 to vector<8x32xf32>
    %177 = arith.addf %176, %175 : vector<8x32xf32>
    %178 = arith.divf %176, %177 : vector<8x32xf32>
    %179 = arith.mulf %170, %124 : vector<8x32xf32>
    %180 = arith.mulf %164, %172 : vector<8x32xf32>
    %181 = arith.addf %179, %180 : vector<8x32xf32>
    %182 = math.tanh %181 : vector<8x32xf32>
    %183 = arith.mulf %178, %182 : vector<8x32xf32>
    %cst_47 = arith.constant dense<0.000000e+00> : vector<8x512xf32>
    %184 = tpu.matmul %183, %9, %cst_47 {dimension_numbers = #tpu.dot_dimension_numbers<[1], [0], [0], [1], [0, 0, 1, 1], [], []>} : vector<8x32xf32>, vector<32x512xf32>, vector<8x512xf32> -> vector<8x512xf32>
    %c32 = arith.constant 32 : index
    %c0_48 = arith.constant 0 : index
    %185 = vector.load %arg9[%c32, %c0_48] : memref<64x512xf32, #tpu.memory_space<vmem>>, vector<8x512xf32>
    %cst_49 = arith.constant dense<0.000000e+00> : vector<8x512xf32>
    %186 = tpu.matmul %155, %7, %cst_49 {dimension_numbers = #tpu.dot_dimension_numbers<[1], [0], [0], [1], [0, 0, 1, 1], [], []>} : vector<8x32xf32>, vector<32x512xf32>, vector<8x512xf32> -> vector<8x512xf32>
    %187 = arith.addf %128, %186 : vector<8x512xf32>
    %188 = vector.extract_strided_slice %187 {offsets = [0, 0], sizes = [8, 32], strides = [1, 1]} : vector<8x512xf32> to vector<8x32xf32>
    %189 = arith.negf %188 : vector<8x32xf32>
    %190 = math.exp %189 : vector<8x32xf32>
    %cst_50 = arith.constant 1.000000e+00 : f32
    %191 = vector.broadcast %cst_50 : f32 to vector<8x32xf32>
    %192 = arith.addf %191, %190 : vector<8x32xf32>
    %193 = arith.divf %191, %192 : vector<8x32xf32>
    %194 = vector.extract_strided_slice %187 {offsets = [0, 128], sizes = [8, 32], strides = [1, 1]} : vector<8x512xf32> to vector<8x32xf32>
    %195 = arith.negf %194 : vector<8x32xf32>
    %196 = math.exp %195 : vector<8x32xf32>
    %cst_51 = arith.constant 1.000000e+00 : f32
    %197 = vector.broadcast %cst_51 : f32 to vector<8x32xf32>
    %198 = arith.addf %197, %196 : vector<8x32xf32>
    %199 = arith.divf %197, %198 : vector<8x32xf32>
    %200 = vector.extract_strided_slice %187 {offsets = [0, 256], sizes = [8, 32], strides = [1, 1]} : vector<8x512xf32> to vector<8x32xf32>
    %201 = math.tanh %200 : vector<8x32xf32>
    %202 = vector.extract_strided_slice %187 {offsets = [0, 384], sizes = [8, 32], strides = [1, 1]} : vector<8x512xf32> to vector<8x32xf32>
    %203 = arith.negf %202 : vector<8x32xf32>
    %204 = math.exp %203 : vector<8x32xf32>
    %cst_52 = arith.constant 1.000000e+00 : f32
    %205 = vector.broadcast %cst_52 : f32 to vector<8x32xf32>
    %206 = arith.addf %205, %204 : vector<8x32xf32>
    %207 = arith.divf %205, %206 : vector<8x32xf32>
    %208 = arith.mulf %199, %153 : vector<8x32xf32>
    %209 = arith.mulf %193, %201 : vector<8x32xf32>
    %210 = arith.addf %208, %209 : vector<8x32xf32>
    %211 = math.tanh %210 : vector<8x32xf32>
    %212 = arith.mulf %207, %211 : vector<8x32xf32>
    %cst_53 = arith.constant dense<0.000000e+00> : vector<8x512xf32>
    %213 = tpu.matmul %212, %8, %cst_53 {dimension_numbers = #tpu.dot_dimension_numbers<[1], [0], [0], [1], [0, 0, 1, 1], [], []>} : vector<8x32xf32>, vector<32x512xf32>, vector<8x512xf32> -> vector<8x512xf32>
    %214 = arith.addf %184, %213 : vector<8x512xf32>
    %215 = arith.addf %214, %12 : vector<8x512xf32>
    %216 = vector.extract_strided_slice %215 {offsets = [0, 0], sizes = [8, 32], strides = [1, 1]} : vector<8x512xf32> to vector<8x32xf32>
    %217 = arith.negf %216 : vector<8x32xf32>
    %218 = math.exp %217 : vector<8x32xf32>
    %cst_54 = arith.constant 1.000000e+00 : f32
    %219 = vector.broadcast %cst_54 : f32 to vector<8x32xf32>
    %220 = arith.addf %219, %218 : vector<8x32xf32>
    %221 = arith.divf %219, %220 : vector<8x32xf32>
    %222 = vector.extract_strided_slice %215 {offsets = [0, 128], sizes = [8, 32], strides = [1, 1]} : vector<8x512xf32> to vector<8x32xf32>
    %223 = arith.negf %222 : vector<8x32xf32>
    %224 = math.exp %223 : vector<8x32xf32>
    %cst_55 = arith.constant 1.000000e+00 : f32
    %225 = vector.broadcast %cst_55 : f32 to vector<8x32xf32>
    %226 = arith.addf %225, %224 : vector<8x32xf32>
    %227 = arith.divf %225, %226 : vector<8x32xf32>
    %228 = vector.extract_strided_slice %215 {offsets = [0, 256], sizes = [8, 32], strides = [1, 1]} : vector<8x512xf32> to vector<8x32xf32>
    %229 = math.tanh %228 : vector<8x32xf32>
    %230 = vector.extract_strided_slice %215 {offsets = [0, 384], sizes = [8, 32], strides = [1, 1]} : vector<8x512xf32> to vector<8x32xf32>
    %231 = arith.negf %230 : vector<8x32xf32>
    %232 = math.exp %231 : vector<8x32xf32>
    %cst_56 = arith.constant 1.000000e+00 : f32
    %233 = vector.broadcast %cst_56 : f32 to vector<8x32xf32>
    %234 = arith.addf %233, %232 : vector<8x32xf32>
    %235 = arith.divf %233, %234 : vector<8x32xf32>
    %236 = arith.mulf %227, %181 : vector<8x32xf32>
    %237 = arith.mulf %221, %229 : vector<8x32xf32>
    %238 = arith.addf %236, %237 : vector<8x32xf32>
    %239 = math.tanh %238 : vector<8x32xf32>
    %240 = arith.mulf %235, %239 : vector<8x32xf32>
    %cst_57 = arith.constant dense<0.000000e+00> : vector<8x512xf32>
    %241 = tpu.matmul %240, %9, %cst_57 {dimension_numbers = #tpu.dot_dimension_numbers<[1], [0], [0], [1], [0, 0, 1, 1], [], []>} : vector<8x32xf32>, vector<32x512xf32>, vector<8x512xf32> -> vector<8x512xf32>
    %c40 = arith.constant 40 : index
    %c0_58 = arith.constant 0 : index
    %242 = vector.load %arg9[%c40, %c0_58] : memref<64x512xf32, #tpu.memory_space<vmem>>, vector<8x512xf32>
    %cst_59 = arith.constant dense<0.000000e+00> : vector<8x512xf32>
    %243 = tpu.matmul %212, %7, %cst_59 {dimension_numbers = #tpu.dot_dimension_numbers<[1], [0], [0], [1], [0, 0, 1, 1], [], []>} : vector<8x32xf32>, vector<32x512xf32>, vector<8x512xf32> -> vector<8x512xf32>
    %244 = arith.addf %185, %243 : vector<8x512xf32>
    %245 = vector.extract_strided_slice %244 {offsets = [0, 0], sizes = [8, 32], strides = [1, 1]} : vector<8x512xf32> to vector<8x32xf32>
    %246 = arith.negf %245 : vector<8x32xf32>
    %247 = math.exp %246 : vector<8x32xf32>
    %cst_60 = arith.constant 1.000000e+00 : f32
    %248 = vector.broadcast %cst_60 : f32 to vector<8x32xf32>
    %249 = arith.addf %248, %247 : vector<8x32xf32>
    %250 = arith.divf %248, %249 : vector<8x32xf32>
    %251 = vector.extract_strided_slice %244 {offsets = [0, 128], sizes = [8, 32], strides = [1, 1]} : vector<8x512xf32> to vector<8x32xf32>
    %252 = arith.negf %251 : vector<8x32xf32>
    %253 = math.exp %252 : vector<8x32xf32>
    %cst_61 = arith.constant 1.000000e+00 : f32
    %254 = vector.broadcast %cst_61 : f32 to vector<8x32xf32>
    %255 = arith.addf %254, %253 : vector<8x32xf32>
    %256 = arith.divf %254, %255 : vector<8x32xf32>
    %257 = vector.extract_strided_slice %244 {offsets = [0, 256], sizes = [8, 32], strides = [1, 1]} : vector<8x512xf32> to vector<8x32xf32>
    %258 = math.tanh %257 : vector<8x32xf32>
    %259 = vector.extract_strided_slice %244 {offsets = [0, 384], sizes = [8, 32], strides = [1, 1]} : vector<8x512xf32> to vector<8x32xf32>
    %260 = arith.negf %259 : vector<8x32xf32>
    %261 = math.exp %260 : vector<8x32xf32>
    %cst_62 = arith.constant 1.000000e+00 : f32
    %262 = vector.broadcast %cst_62 : f32 to vector<8x32xf32>
    %263 = arith.addf %262, %261 : vector<8x32xf32>
    %264 = arith.divf %262, %263 : vector<8x32xf32>
    %265 = arith.mulf %256, %210 : vector<8x32xf32>
    %266 = arith.mulf %250, %258 : vector<8x32xf32>
    %267 = arith.addf %265, %266 : vector<8x32xf32>
    %268 = math.tanh %267 : vector<8x32xf32>
    %269 = arith.mulf %264, %268 : vector<8x32xf32>
    %cst_63 = arith.constant dense<0.000000e+00> : vector<8x512xf32>
    %270 = tpu.matmul %269, %8, %cst_63 {dimension_numbers = #tpu.dot_dimension_numbers<[1], [0], [0], [1], [0, 0, 1, 1], [], []>} : vector<8x32xf32>, vector<32x512xf32>, vector<8x512xf32> -> vector<8x512xf32>
    %271 = arith.addf %241, %270 : vector<8x512xf32>
    %272 = arith.addf %271, %12 : vector<8x512xf32>
    %273 = vector.extract_strided_slice %272 {offsets = [0, 0], sizes = [8, 32], strides = [1, 1]} : vector<8x512xf32> to vector<8x32xf32>
    %274 = arith.negf %273 : vector<8x32xf32>
    %275 = math.exp %274 : vector<8x32xf32>
    %cst_64 = arith.constant 1.000000e+00 : f32
    %276 = vector.broadcast %cst_64 : f32 to vector<8x32xf32>
    %277 = arith.addf %276, %275 : vector<8x32xf32>
    %278 = arith.divf %276, %277 : vector<8x32xf32>
    %279 = vector.extract_strided_slice %272 {offsets = [0, 128], sizes = [8, 32], strides = [1, 1]} : vector<8x512xf32> to vector<8x32xf32>
    %280 = arith.negf %279 : vector<8x32xf32>
    %281 = math.exp %280 : vector<8x32xf32>
    %cst_65 = arith.constant 1.000000e+00 : f32
    %282 = vector.broadcast %cst_65 : f32 to vector<8x32xf32>
    %283 = arith.addf %282, %281 : vector<8x32xf32>
    %284 = arith.divf %282, %283 : vector<8x32xf32>
    %285 = vector.extract_strided_slice %272 {offsets = [0, 256], sizes = [8, 32], strides = [1, 1]} : vector<8x512xf32> to vector<8x32xf32>
    %286 = math.tanh %285 : vector<8x32xf32>
    %287 = vector.extract_strided_slice %272 {offsets = [0, 384], sizes = [8, 32], strides = [1, 1]} : vector<8x512xf32> to vector<8x32xf32>
    %288 = arith.negf %287 : vector<8x32xf32>
    %289 = math.exp %288 : vector<8x32xf32>
    %cst_66 = arith.constant 1.000000e+00 : f32
    %290 = vector.broadcast %cst_66 : f32 to vector<8x32xf32>
    %291 = arith.addf %290, %289 : vector<8x32xf32>
    %292 = arith.divf %290, %291 : vector<8x32xf32>
    %293 = arith.mulf %284, %238 : vector<8x32xf32>
    %294 = arith.mulf %278, %286 : vector<8x32xf32>
    %295 = arith.addf %293, %294 : vector<8x32xf32>
    %296 = math.tanh %295 : vector<8x32xf32>
    %297 = arith.mulf %292, %296 : vector<8x32xf32>
    %cst_67 = arith.constant dense<0.000000e+00> : vector<8x512xf32>
    %298 = tpu.matmul %297, %9, %cst_67 {dimension_numbers = #tpu.dot_dimension_numbers<[1], [0], [0], [1], [0, 0, 1, 1], [], []>} : vector<8x32xf32>, vector<32x512xf32>, vector<8x512xf32> -> vector<8x512xf32>
    %c48 = arith.constant 48 : index
    %c0_68 = arith.constant 0 : index
    %299 = vector.load %arg9[%c48, %c0_68] : memref<64x512xf32, #tpu.memory_space<vmem>>, vector<8x512xf32>
    %cst_69 = arith.constant dense<0.000000e+00> : vector<8x512xf32>
    %300 = tpu.matmul %269, %7, %cst_69 {dimension_numbers = #tpu.dot_dimension_numbers<[1], [0], [0], [1], [0, 0, 1, 1], [], []>} : vector<8x32xf32>, vector<32x512xf32>, vector<8x512xf32> -> vector<8x512xf32>
    %301 = arith.addf %242, %300 : vector<8x512xf32>
    %302 = vector.extract_strided_slice %301 {offsets = [0, 0], sizes = [8, 32], strides = [1, 1]} : vector<8x512xf32> to vector<8x32xf32>
    %303 = arith.negf %302 : vector<8x32xf32>
    %304 = math.exp %303 : vector<8x32xf32>
    %cst_70 = arith.constant 1.000000e+00 : f32
    %305 = vector.broadcast %cst_70 : f32 to vector<8x32xf32>
    %306 = arith.addf %305, %304 : vector<8x32xf32>
    %307 = arith.divf %305, %306 : vector<8x32xf32>
    %308 = vector.extract_strided_slice %301 {offsets = [0, 128], sizes = [8, 32], strides = [1, 1]} : vector<8x512xf32> to vector<8x32xf32>
    %309 = arith.negf %308 : vector<8x32xf32>
    %310 = math.exp %309 : vector<8x32xf32>
    %cst_71 = arith.constant 1.000000e+00 : f32
    %311 = vector.broadcast %cst_71 : f32 to vector<8x32xf32>
    %312 = arith.addf %311, %310 : vector<8x32xf32>
    %313 = arith.divf %311, %312 : vector<8x32xf32>
    %314 = vector.extract_strided_slice %301 {offsets = [0, 256], sizes = [8, 32], strides = [1, 1]} : vector<8x512xf32> to vector<8x32xf32>
    %315 = math.tanh %314 : vector<8x32xf32>
    %316 = vector.extract_strided_slice %301 {offsets = [0, 384], sizes = [8, 32], strides = [1, 1]} : vector<8x512xf32> to vector<8x32xf32>
    %317 = arith.negf %316 : vector<8x32xf32>
    %318 = math.exp %317 : vector<8x32xf32>
    %cst_72 = arith.constant 1.000000e+00 : f32
    %319 = vector.broadcast %cst_72 : f32 to vector<8x32xf32>
    %320 = arith.addf %319, %318 : vector<8x32xf32>
    %321 = arith.divf %319, %320 : vector<8x32xf32>
    %322 = arith.mulf %313, %267 : vector<8x32xf32>
    %323 = arith.mulf %307, %315 : vector<8x32xf32>
    %324 = arith.addf %322, %323 : vector<8x32xf32>
    %325 = math.tanh %324 : vector<8x32xf32>
    %326 = arith.mulf %321, %325 : vector<8x32xf32>
    %cst_73 = arith.constant dense<0.000000e+00> : vector<8x512xf32>
    %327 = tpu.matmul %326, %8, %cst_73 {dimension_numbers = #tpu.dot_dimension_numbers<[1], [0], [0], [1], [0, 0, 1, 1], [], []>} : vector<8x32xf32>, vector<32x512xf32>, vector<8x512xf32> -> vector<8x512xf32>
    %328 = arith.addf %298, %327 : vector<8x512xf32>
    %329 = arith.addf %328, %12 : vector<8x512xf32>
    %330 = vector.extract_strided_slice %329 {offsets = [0, 0], sizes = [8, 32], strides = [1, 1]} : vector<8x512xf32> to vector<8x32xf32>
    %331 = arith.negf %330 : vector<8x32xf32>
    %332 = math.exp %331 : vector<8x32xf32>
    %cst_74 = arith.constant 1.000000e+00 : f32
    %333 = vector.broadcast %cst_74 : f32 to vector<8x32xf32>
    %334 = arith.addf %333, %332 : vector<8x32xf32>
    %335 = arith.divf %333, %334 : vector<8x32xf32>
    %336 = vector.extract_strided_slice %329 {offsets = [0, 128], sizes = [8, 32], strides = [1, 1]} : vector<8x512xf32> to vector<8x32xf32>
    %337 = arith.negf %336 : vector<8x32xf32>
    %338 = math.exp %337 : vector<8x32xf32>
    %cst_75 = arith.constant 1.000000e+00 : f32
    %339 = vector.broadcast %cst_75 : f32 to vector<8x32xf32>
    %340 = arith.addf %339, %338 : vector<8x32xf32>
    %341 = arith.divf %339, %340 : vector<8x32xf32>
    %342 = vector.extract_strided_slice %329 {offsets = [0, 256], sizes = [8, 32], strides = [1, 1]} : vector<8x512xf32> to vector<8x32xf32>
    %343 = math.tanh %342 : vector<8x32xf32>
    %344 = vector.extract_strided_slice %329 {offsets = [0, 384], sizes = [8, 32], strides = [1, 1]} : vector<8x512xf32> to vector<8x32xf32>
    %345 = arith.negf %344 : vector<8x32xf32>
    %346 = math.exp %345 : vector<8x32xf32>
    %cst_76 = arith.constant 1.000000e+00 : f32
    %347 = vector.broadcast %cst_76 : f32 to vector<8x32xf32>
    %348 = arith.addf %347, %346 : vector<8x32xf32>
    %349 = arith.divf %347, %348 : vector<8x32xf32>
    %350 = arith.mulf %341, %295 : vector<8x32xf32>
    %351 = arith.mulf %335, %343 : vector<8x32xf32>
    %352 = arith.addf %350, %351 : vector<8x32xf32>
    %353 = math.tanh %352 : vector<8x32xf32>
    %354 = arith.mulf %349, %353 : vector<8x32xf32>
    %cst_77 = arith.constant dense<0.000000e+00> : vector<8x512xf32>
    %355 = tpu.matmul %354, %9, %cst_77 {dimension_numbers = #tpu.dot_dimension_numbers<[1], [0], [0], [1], [0, 0, 1, 1], [], []>} : vector<8x32xf32>, vector<32x512xf32>, vector<8x512xf32> -> vector<8x512xf32>
    %c56 = arith.constant 56 : index
    %c0_78 = arith.constant 0 : index
    %356 = vector.load %arg9[%c56, %c0_78] : memref<64x512xf32, #tpu.memory_space<vmem>>, vector<8x512xf32>
    %cst_79 = arith.constant dense<0.000000e+00> : vector<8x512xf32>
    %357 = tpu.matmul %326, %7, %cst_79 {dimension_numbers = #tpu.dot_dimension_numbers<[1], [0], [0], [1], [0, 0, 1, 1], [], []>} : vector<8x32xf32>, vector<32x512xf32>, vector<8x512xf32> -> vector<8x512xf32>
    %358 = arith.addf %299, %357 : vector<8x512xf32>
    %359 = vector.extract_strided_slice %358 {offsets = [0, 0], sizes = [8, 32], strides = [1, 1]} : vector<8x512xf32> to vector<8x32xf32>
    %360 = arith.negf %359 : vector<8x32xf32>
    %361 = math.exp %360 : vector<8x32xf32>
    %cst_80 = arith.constant 1.000000e+00 : f32
    %362 = vector.broadcast %cst_80 : f32 to vector<8x32xf32>
    %363 = arith.addf %362, %361 : vector<8x32xf32>
    %364 = arith.divf %362, %363 : vector<8x32xf32>
    %365 = vector.extract_strided_slice %358 {offsets = [0, 128], sizes = [8, 32], strides = [1, 1]} : vector<8x512xf32> to vector<8x32xf32>
    %366 = arith.negf %365 : vector<8x32xf32>
    %367 = math.exp %366 : vector<8x32xf32>
    %cst_81 = arith.constant 1.000000e+00 : f32
    %368 = vector.broadcast %cst_81 : f32 to vector<8x32xf32>
    %369 = arith.addf %368, %367 : vector<8x32xf32>
    %370 = arith.divf %368, %369 : vector<8x32xf32>
    %371 = vector.extract_strided_slice %358 {offsets = [0, 256], sizes = [8, 32], strides = [1, 1]} : vector<8x512xf32> to vector<8x32xf32>
    %372 = math.tanh %371 : vector<8x32xf32>
    %373 = vector.extract_strided_slice %358 {offsets = [0, 384], sizes = [8, 32], strides = [1, 1]} : vector<8x512xf32> to vector<8x32xf32>
    %374 = arith.negf %373 : vector<8x32xf32>
    %375 = math.exp %374 : vector<8x32xf32>
    %cst_82 = arith.constant 1.000000e+00 : f32
    %376 = vector.broadcast %cst_82 : f32 to vector<8x32xf32>
    %377 = arith.addf %376, %375 : vector<8x32xf32>
    %378 = arith.divf %376, %377 : vector<8x32xf32>
    %379 = arith.mulf %370, %324 : vector<8x32xf32>
    %380 = arith.mulf %364, %372 : vector<8x32xf32>
    %381 = arith.addf %379, %380 : vector<8x32xf32>
    %382 = math.tanh %381 : vector<8x32xf32>
    %383 = arith.mulf %378, %382 : vector<8x32xf32>
    %cst_83 = arith.constant dense<0.000000e+00> : vector<8x512xf32>
    %384 = tpu.matmul %383, %8, %cst_83 {dimension_numbers = #tpu.dot_dimension_numbers<[1], [0], [0], [1], [0, 0, 1, 1], [], []>} : vector<8x32xf32>, vector<32x512xf32>, vector<8x512xf32> -> vector<8x512xf32>
    %385 = arith.addf %355, %384 : vector<8x512xf32>
    %386 = arith.addf %385, %12 : vector<8x512xf32>
    %387 = vector.extract_strided_slice %386 {offsets = [0, 0], sizes = [8, 32], strides = [1, 1]} : vector<8x512xf32> to vector<8x32xf32>
    %388 = arith.negf %387 : vector<8x32xf32>
    %389 = math.exp %388 : vector<8x32xf32>
    %cst_84 = arith.constant 1.000000e+00 : f32
    %390 = vector.broadcast %cst_84 : f32 to vector<8x32xf32>
    %391 = arith.addf %390, %389 : vector<8x32xf32>
    %392 = arith.divf %390, %391 : vector<8x32xf32>
    %393 = vector.extract_strided_slice %386 {offsets = [0, 128], sizes = [8, 32], strides = [1, 1]} : vector<8x512xf32> to vector<8x32xf32>
    %394 = arith.negf %393 : vector<8x32xf32>
    %395 = math.exp %394 : vector<8x32xf32>
    %cst_85 = arith.constant 1.000000e+00 : f32
    %396 = vector.broadcast %cst_85 : f32 to vector<8x32xf32>
    %397 = arith.addf %396, %395 : vector<8x32xf32>
    %398 = arith.divf %396, %397 : vector<8x32xf32>
    %399 = vector.extract_strided_slice %386 {offsets = [0, 256], sizes = [8, 32], strides = [1, 1]} : vector<8x512xf32> to vector<8x32xf32>
    %400 = math.tanh %399 : vector<8x32xf32>
    %401 = vector.extract_strided_slice %386 {offsets = [0, 384], sizes = [8, 32], strides = [1, 1]} : vector<8x512xf32> to vector<8x32xf32>
    %402 = arith.negf %401 : vector<8x32xf32>
    %403 = math.exp %402 : vector<8x32xf32>
    %cst_86 = arith.constant 1.000000e+00 : f32
    %404 = vector.broadcast %cst_86 : f32 to vector<8x32xf32>
    %405 = arith.addf %404, %403 : vector<8x32xf32>
    %406 = arith.divf %404, %405 : vector<8x32xf32>
    %407 = arith.mulf %398, %352 : vector<8x32xf32>
    %408 = arith.mulf %392, %400 : vector<8x32xf32>
    %409 = arith.addf %407, %408 : vector<8x32xf32>
    %410 = math.tanh %409 : vector<8x32xf32>
    %411 = arith.mulf %406, %410 : vector<8x32xf32>
    %cst_87 = arith.constant dense<0.000000e+00> : vector<8x512xf32>
    %412 = tpu.matmul %411, %9, %cst_87 {dimension_numbers = #tpu.dot_dimension_numbers<[1], [0], [0], [1], [0, 0, 1, 1], [], []>} : vector<8x32xf32>, vector<32x512xf32>, vector<8x512xf32> -> vector<8x512xf32>
    %cst_88 = arith.constant dense<0.000000e+00> : vector<8x512xf32>
    %413 = tpu.matmul %383, %7, %cst_88 {dimension_numbers = #tpu.dot_dimension_numbers<[1], [0], [0], [1], [0, 0, 1, 1], [], []>} : vector<8x32xf32>, vector<32x512xf32>, vector<8x512xf32> -> vector<8x512xf32>
    %414 = arith.addf %356, %413 : vector<8x512xf32>
    %415 = vector.extract_strided_slice %414 {offsets = [0, 0], sizes = [8, 32], strides = [1, 1]} : vector<8x512xf32> to vector<8x32xf32>
    %416 = arith.negf %415 : vector<8x32xf32>
    %417 = math.exp %416 : vector<8x32xf32>
    %cst_89 = arith.constant 1.000000e+00 : f32
    %418 = vector.broadcast %cst_89 : f32 to vector<8x32xf32>
    %419 = arith.addf %418, %417 : vector<8x32xf32>
    %420 = arith.divf %418, %419 : vector<8x32xf32>
    %421 = vector.extract_strided_slice %414 {offsets = [0, 128], sizes = [8, 32], strides = [1, 1]} : vector<8x512xf32> to vector<8x32xf32>
    %422 = arith.negf %421 : vector<8x32xf32>
    %423 = math.exp %422 : vector<8x32xf32>
    %cst_90 = arith.constant 1.000000e+00 : f32
    %424 = vector.broadcast %cst_90 : f32 to vector<8x32xf32>
    %425 = arith.addf %424, %423 : vector<8x32xf32>
    %426 = arith.divf %424, %425 : vector<8x32xf32>
    %427 = vector.extract_strided_slice %414 {offsets = [0, 256], sizes = [8, 32], strides = [1, 1]} : vector<8x512xf32> to vector<8x32xf32>
    %428 = math.tanh %427 : vector<8x32xf32>
    %429 = vector.extract_strided_slice %414 {offsets = [0, 384], sizes = [8, 32], strides = [1, 1]} : vector<8x512xf32> to vector<8x32xf32>
    %430 = arith.negf %429 : vector<8x32xf32>
    %431 = math.exp %430 : vector<8x32xf32>
    %cst_91 = arith.constant 1.000000e+00 : f32
    %432 = vector.broadcast %cst_91 : f32 to vector<8x32xf32>
    %433 = arith.addf %432, %431 : vector<8x32xf32>
    %434 = arith.divf %432, %433 : vector<8x32xf32>
    %435 = arith.mulf %426, %381 : vector<8x32xf32>
    %436 = arith.mulf %420, %428 : vector<8x32xf32>
    %437 = arith.addf %435, %436 : vector<8x32xf32>
    %438 = math.tanh %437 : vector<8x32xf32>
    %439 = arith.mulf %434, %438 : vector<8x32xf32>
    %cst_92 = arith.constant dense<0.000000e+00> : vector<8x512xf32>
    %440 = tpu.matmul %439, %8, %cst_92 {dimension_numbers = #tpu.dot_dimension_numbers<[1], [0], [0], [1], [0, 0, 1, 1], [], []>} : vector<8x32xf32>, vector<32x512xf32>, vector<8x512xf32> -> vector<8x512xf32>
    %441 = arith.addf %412, %440 : vector<8x512xf32>
    %442 = arith.addf %441, %12 : vector<8x512xf32>
    %443 = vector.extract_strided_slice %442 {offsets = [0, 0], sizes = [8, 32], strides = [1, 1]} : vector<8x512xf32> to vector<8x32xf32>
    %444 = arith.negf %443 : vector<8x32xf32>
    %445 = math.exp %444 : vector<8x32xf32>
    %cst_93 = arith.constant 1.000000e+00 : f32
    %446 = vector.broadcast %cst_93 : f32 to vector<8x32xf32>
    %447 = arith.addf %446, %445 : vector<8x32xf32>
    %448 = arith.divf %446, %447 : vector<8x32xf32>
    %449 = vector.extract_strided_slice %442 {offsets = [0, 128], sizes = [8, 32], strides = [1, 1]} : vector<8x512xf32> to vector<8x32xf32>
    %450 = arith.negf %449 : vector<8x32xf32>
    %451 = math.exp %450 : vector<8x32xf32>
    %cst_94 = arith.constant 1.000000e+00 : f32
    %452 = vector.broadcast %cst_94 : f32 to vector<8x32xf32>
    %453 = arith.addf %452, %451 : vector<8x32xf32>
    %454 = arith.divf %452, %453 : vector<8x32xf32>
    %455 = vector.extract_strided_slice %442 {offsets = [0, 256], sizes = [8, 32], strides = [1, 1]} : vector<8x512xf32> to vector<8x32xf32>
    %456 = math.tanh %455 : vector<8x32xf32>
    %457 = vector.extract_strided_slice %442 {offsets = [0, 384], sizes = [8, 32], strides = [1, 1]} : vector<8x512xf32> to vector<8x32xf32>
    %458 = arith.negf %457 : vector<8x32xf32>
    %459 = math.exp %458 : vector<8x32xf32>
    %cst_95 = arith.constant 1.000000e+00 : f32
    %460 = vector.broadcast %cst_95 : f32 to vector<8x32xf32>
    %461 = arith.addf %460, %459 : vector<8x32xf32>
    %462 = arith.divf %460, %461 : vector<8x32xf32>
    %463 = arith.mulf %454, %409 : vector<8x32xf32>
    %464 = arith.mulf %448, %456 : vector<8x32xf32>
    %465 = arith.addf %463, %464 : vector<8x32xf32>
    %466 = math.tanh %465 : vector<8x32xf32>
    %467 = arith.mulf %462, %466 : vector<8x32xf32>
    tpu.wait_dma2 semaphore(%arg11 : memref<!tpu.dma_semaphore, #tpu.memory_space<semaphore_mem>>) src(%arg7 : memref<296x128xf32, #tpu.memory_space<any>>) dst(%arg10 : memref<296x128xf32, #tpu.memory_space<vmem>>)
    %c0_96 = arith.constant 0 : index
    %c0_97 = arith.constant 0 : index
    %468 = vector.load %arg10[%c0_96, %c0_97] : memref<296x128xf32, #tpu.memory_space<vmem>>, vector<1x128xf32>
    %c1 = arith.constant 1 : index
    %c0_98 = arith.constant 0 : index
    %469 = vector.load %arg10[%c1, %c0_98] : memref<296x128xf32, #tpu.memory_space<vmem>>, vector<1x128xf32>
    %c2 = arith.constant 2 : index
    %c0_99 = arith.constant 0 : index
    %470 = vector.load %arg10[%c2, %c0_99] : memref<296x128xf32, #tpu.memory_space<vmem>>, vector<1x128xf32>
    %c8_100 = arith.constant 8 : index
    %c0_101 = arith.constant 0 : index
    %471 = vector.load %arg10[%c8_100, %c0_101] : memref<296x128xf32, #tpu.memory_space<vmem>>, vector<32x128xf32>
    %c40_102 = arith.constant 40 : index
    %c0_103 = arith.constant 0 : index
    %472 = vector.load %arg10[%c40_102, %c0_103] : memref<296x128xf32, #tpu.memory_space<vmem>>, vector<128x128xf32>
    %c168 = arith.constant 168 : index
    %c0_104 = arith.constant 0 : index
    %473 = vector.load %arg10[%c168, %c0_104] : memref<296x128xf32, #tpu.memory_space<vmem>>, vector<128x128xf32>
    %cst_105 = arith.constant dense<0.000000e+00> : vector<8x128xf32>
    %474 = tpu.matmul %467, %471, %cst_105 {dimension_numbers = #tpu.dot_dimension_numbers<[1], [0], [0], [1], [0, 0, 1, 1], [], []>} : vector<8x32xf32>, vector<32x128xf32>, vector<8x128xf32> -> vector<8x128xf32>
    %475 = vector.broadcast %468 : vector<1x128xf32> to vector<8x128xf32>
    %476 = arith.addf %474, %475 : vector<8x128xf32>
    %cst_106 = arith.constant 0.000000e+00 : f32
    %477 = vector.broadcast %cst_106 : f32 to vector<8x128xf32>
    %478 = arith.cmpf ogt, %476, %477 : vector<8x128xf32>
    %cst_107 = arith.constant 1.000000e-01 : f32
    %479 = vector.broadcast %cst_107 : f32 to vector<8x128xf32>
    %480 = arith.mulf %479, %476 : vector<8x128xf32>
    %481 = arith.select %478, %476, %480 : vector<8x128xi1>, vector<8x128xf32>
    %cst_108 = arith.constant dense<0.000000e+00> : vector<8x128xf32>
    %482 = tpu.matmul %481, %472, %cst_108 {dimension_numbers = #tpu.dot_dimension_numbers<[1], [0], [0], [1], [0, 0, 1, 1], [], []>} : vector<8x128xf32>, vector<128x128xf32>, vector<8x128xf32> -> vector<8x128xf32>
    %483 = vector.broadcast %469 : vector<1x128xf32> to vector<8x128xf32>
    %484 = arith.addf %482, %483 : vector<8x128xf32>
    %cst_109 = arith.constant 0.000000e+00 : f32
    %485 = vector.broadcast %cst_109 : f32 to vector<8x128xf32>
    %486 = arith.cmpf ogt, %484, %485 : vector<8x128xf32>
    %cst_110 = arith.constant 1.000000e-01 : f32
    %487 = vector.broadcast %cst_110 : f32 to vector<8x128xf32>
    %488 = arith.mulf %487, %484 : vector<8x128xf32>
    %489 = arith.select %486, %484, %488 : vector<8x128xi1>, vector<8x128xf32>
    %cst_111 = arith.constant dense<0.000000e+00> : vector<8x128xf32>
    %490 = tpu.matmul %489, %473, %cst_111 {dimension_numbers = #tpu.dot_dimension_numbers<[1], [0], [0], [1], [0, 0, 1, 1], [], []>} : vector<8x128xf32>, vector<128x128xf32>, vector<8x128xf32> -> vector<8x128xf32>
    %491 = vector.broadcast %470 : vector<1x128xf32> to vector<8x128xf32>
    %492 = arith.addf %490, %491 : vector<8x128xf32>
    %c0_112 = arith.constant 0 : index
    %c0_113 = arith.constant 0 : index
    %493 = vector.load %arg8[%c0_112, %c0_113] : memref<8x128xf32, #tpu.memory_space<vmem>>, vector<8x128xf32>
    tpu.vector_store %arg8[%c0_112, %c0_113], %492 {strides = array<i32>} : memref<8x128xf32, #tpu.memory_space<vmem>>, vector<8x128xf32>,
    return
  }
}

</mosaic_0001>

<bundles_post_ra>
// kernel: tpu_custom_call.1
= control target key start
LH: loop header
LB: loop body
LE: loop exit
PB: predicated region body
PF: predicated region fallthrough
CT: control target
= control target key end

     0   :  { %13 = vsyncpa [#allocation6], 0  ;;  %s5738_s0 = inlined_call_operand.vmem [shape: f32[64,16], index: 0, kind: input, shape index: {}]   ;;  %s5739_s1 = inlined_call_operand.vmem [shape: f32[16,512], index: 1, kind: input, shape index: {}]   ;;  %s5740_s2 = inlined_call_operand.vmem [shape: f32[1,512], index: 2, kind: input, shape index: {}]   ;;  %s5741_s3 = inlined_call_operand.hbm [shape: f32[32,512], index: 3, kind: input, shape index: {}]   ;;  %s5742_s4 = inlined_call_operand.hbm [shape: f32[32,512], index: 4, kind: input, shape index: {}]   ;;  %s5743_s5 = inlined_call_operand.hbm [shape: f32[32,512], index: 5, kind: input, shape index: {}]   ;;  %s5744_s6 = inlined_call_operand.vmem [shape: f32[1,512], index: 6, kind: input, shape index: {}]   ;;  %s5745_s7 = inlined_call_operand.hbm [shape: f32[296,128], index: 7, kind: input, shape index: {}]   ;;  %s5746_s8 = inlined_call_operand.hbm [shape: f32[8,128], index: 8, kind: output, shape index: {}]  }
   0x1   :  { %14 = vsyncpa [#allocation9], 0 }
   0x2   :  { %15 = vsyncpa [#allocation7], 0  ;;  %s39_s29 = sshll.u32 %s5742_s4, 4  ;;  %s4098_s30 = smov [#allocation8]   ;;  %s40_s29 = int_to_ptr.hbm [resolvable:$true] %s39_s29 }
   0x3   :  { %s41_s9 = sshll.u32 %s4098_s30, 4  ;;  %s26_s12 = sshll.u32 %s5741_s3, 4  ;;  %s42_s9 = int_to_ptr.vmem [resolvable:$true] %s41_s9  ;;  %s27_s12 = int_to_ptr.hbm [resolvable:$true] %s26_s12 }
   0x4   :  { %s4099_s13 = smov 512   ;;  %s4100_s14 = smov 32  }
   0x5   :  { %47 = dma.hbm_to_vmem [thread:$0]  %s40_s29, 2048, %s42_s9, [#allocation9], %s4099_s13, %s4099_s13, %s4100_s14  }
   0x6   :  { %s4101_s15 = smov [#allocation5]   ;;  %s52_s19 = sshll.u32 %s5743_s5, 4  ;;  %s53_s19 = int_to_ptr.hbm [resolvable:$true] %s52_s19 }
   0x7   :  { %s28_s16 = sshll.u32 %s4101_s15, 4  ;;  %s4102_s4 = smov [#allocation10]   ;;  %s29_s16 = int_to_ptr.vmem [resolvable:$true] %s28_s16 }
   0x8   :  { %34 = dma.hbm_to_vmem [thread:$0]  %s27_s12, 2048, %s29_s16, [#allocation6], %s4099_s13, %s4099_s13, %s4100_s14  }
   0x9   :  { %s54_s20 = sshll.u32 %s4102_s4, 4  ;;  %s55_s20 = int_to_ptr.vmem [resolvable:$true] %s54_s20 }
   0xa   :  { %60 = dma.hbm_to_vmem [thread:$0]  %s53_s19, 2048, %s55_s20, [#allocation9], %s4099_s13, %s4099_s13, %s4100_s14  }
   0xb   :  { %4090 = dma.done.wait [#allocation6], 2048  }
   0xc   :  { %4091 = vsyncadd [#allocation6], 4294965248 }
   0xd   :  { %4092 = dma.done.wait [#allocation9], 4096  }
   0xe   :  { %4093 = vsyncadd [#allocation9], 4294963200  ;;  %v100_v0 = vld [vmem:[%s5739_s1 + $0x20] sm:$0xff]  ;;  %vm114_vm0 = vcmask 130048   ;;  %v102_v3 = vld [vmem:[%s5739_s1 + $0x30] sm:$0xff]  ;;  %vm464_vm13 = vcmask 261120  }
   0xf   :  { %v96_v1 = vld [vmem:[%s5739_s1] sm:$0xff]  ;;  %153 = vmatpush.msra.mxu0 %v100_v0  ;;  %v101_v4 = vld [vmem:[%s5739_s1 + $0x28] sm:$0xff]  ;;  %3606 = vmatpush.msra.mxu2 %v102_v3  ;;  %v95_v6 = vld [vmem:[%s5738_s0 + $0x38] sm:$0xff]  ;;  %s82_s28 = sshll.u32 %s5745_s7, 4  ;;  %s4103_s29 = smov [#allocation3]   ;;  %s83_s28 = int_to_ptr.hbm [resolvable:$true] %s82_s28 }
  0x10   :  { %v88_v2 = vld [vmem:[%s5738_s0] sm:$0xff]  ;;  %v97_v5 = vld [vmem:[%s5739_s1 + $0x8] sm:$0xff]  ;;  %3604 = vmatpush.msra.mxu3 %v101_v4  ;;  %194 = vmatpush.msra.mxu1 %v101_v4  ;;  %v98_v7 = vld [vmem:[%s5739_s1 + $0x10] sm:$0xff]  ;;  %s84_s30 = sshll.u32 %s4103_s29, 4  ;;  %s85_s30 = int_to_ptr.vmem [resolvable:$true] %s84_s30 }
  0x11   :  { %154 = vmatpush.msra.mxu0 %v96_v1  ;;  %v103_v8 = vld [vmem:[%s5739_s1 + $0x38] sm:$0xff]  ;;  %v89_v10 = vld [vmem:[%s5738_s0 + $0x8] sm:$0xff]  ;;  %3607 = vmatpush.msra.mxu2 %v98_v7  ;;  %v90_v11 = vld [vmem:[%s5738_s0 + $0x10] sm:$0xff]  ;;  %87 = dma.hbm_to_vmem [thread:$0]  %s83_s28, 4736, %s85_s30, [#allocation4] }
  0x12   :  { %3434 = vmatmul.msk.f32.vlgmr.msra.gmra.mxu0 %vm114_vm0, %v88_v2  ;;  %3605 = vmatpush.msra.mxu3 %v97_v5  ;;  %v99_v9 = vld [vmem:[%s5739_s1 + $0x18] sm:$0xff]  ;;  %v92_v13 = vld [vmem:[%s5738_s0 + $0x20] sm:$0xff]  ;;  %v93_v14 = vld [vmem:[%s5738_s0 + $0x28] sm:$0xff] }
  0x13   :  { %235 = vmatpush.msrb.mxu0 %v102_v3  ;;  %3449 = vmatmul.msk.f32.vlgmr.msra.gmra.mxu3 %vm114_vm0, %v95_v6  ;;  %v91_v12 = vld [vmem:[%s5738_s0 + $0x18] sm:$0xff]  ;;  %v94_v15 = vld [vmem:[%s5738_s0 + $0x30] sm:$0xff]  ;;  %v4252_v21 = vld [vmem:[%s5740_s2] sm:$0xf] }
  0x14   :  { %195 = vmatpush.msra.mxu1 %v97_v5  ;;  %276 = vmatpush.msrb.mxu3 %v103_v8  ;;  %v4239_v16 = vld [vmem:[#allocation8 + $0x68] sm:$0xff]  ;;  %v4258_v23 = vperm.slane %v4252_v21, 1  ;;  %v4260_v24 = vld [vmem:[#allocation8 + $0x70] sm:$0xff]  ;;  %v4267_v27 = vperm.slane %v4252_v21, 0  ;;  %v4282_v36 = vperm.slane %v4252_v21, 3  ;;  %v4295_v46 = vld [vmem:[#allocation8 + $0x60] sm:$0xff] }
  0x15   :  { %3442 = vmatmul.msk.f32.vlgmr.msra.gmra.mxu1 %vm114_vm0, %v88_v2  ;;  %236 = vmatpush.msrb.mxu0 %v98_v7  ;;  %v4242_v18 = vld [vmem:[#allocation8 + $0x48] sm:$0xff]  ;;  %v4277_v34 = vld [vmem:[#allocation8 + $0x50] sm:$0xff]  ;;  %v4302_v50 = vld [vmem:[#allocation8 + $0x40] sm:$0xff] }
  0x16   :  { %3451 = vmatmul.msk.f32.vlgmr.msra.gmra.mxu2 %vm114_vm0, %v89_v10  ;;  %277 = vmatpush.msrb.mxu3 %v99_v9  ;;  %v4247_v20 = vld [vmem:[#allocation5 + $0x68] sm:$0xff]  ;;  %5830 = vst [vmem:[#allocation21_spill] sm:$0xff] %v4258_v23  ;;  %v4309_v53 = vld [vmem:[#allocation8 + $0x30] sm:$0xff]  ;;  %v4311_v54 = vld [vmem:[#allocation8 + $0x20] sm:$0xff] }
  0x17   :  { %647 = vmatpush.msrb.mxu1 %v4247_v20  ;;  %v4262_v25 = vld [vmem:[#allocation8 + $0x28] sm:$0xff]  ;;  %520 = vmatpush.msrb.mxu2 %v4260_v24  ;;  %5831 = vst [vmem:[#allocation22_spill] sm:$0xff] %v4267_v27  ;;  %v4324_v59 = vld [vmem:[#allocation8] sm:$0xff]  ;;  %v4330_v61 = vld [vmem:[#allocation8 + $0x10] sm:$0xff] }
  0x18   :  { %500 = vmatpush.msra.mxu3 %v4239_v16  ;;  %v4275_v33 = vld [vmem:[#allocation5 + $0x48] sm:$0xff]  ;;  %5834 = vst [vmem:[#allocation25_spill] sm:$0xff] %v4282_v36  ;;  %480 = vmatpush.msra.mxu0 %v4295_v46  ;;  %v4335_v0 = vld [vmem:[#allocation8 + $0x78] sm:$0xff]  ;;  %v4337_v1 = vld [vmem:[#allocation5 + $0x60] sm:$0xff] }
  0x19   :  { %648 = vmatpush.msrb.mxu1 %v4275_v33  ;;  %521 = vmatpush.msrb.mxu2 %v4277_v34  ;;  %v4307_v52 = vld [vmem:[#allocation5 + $0x28] sm:$0xff]  ;;  %v4347_v4 = vld [vmem:[#allocation8 + $0x58] sm:$0xff]  ;;  %v4349_v5 = vld [vmem:[#allocation5 + $0x40] sm:$0xff] }
  0x1a   :  { %3435 = vmatmul.msk.f32.gmra.mxu0 %vm114_vm0, %v89_v10  ;;  %501 = vmatpush.msra.mxu3 %v4242_v18  ;;  %v4319_v57 = vld [vmem:[#allocation8 + $0x8] sm:$0xff]  ;;  %v4354_v8 = vld [vmem:[#allocation8 + $0x38] sm:$0xff]  ;;  %v4356_v9 = vld [vmem:[#allocation5 + $0x20] sm:$0xff] }
  0x1b   :  { %3458 = vmatmul.msk.f32.vlgmr.msrb.gmra.mxu3 %vm114_vm0, %v88_v2  ;;  %481 = vmatpush.msra.mxu0 %v4302_v50  ;;  %v4322_v58 = vld [vmem:[#allocation5 + $0x8] sm:$0xff] }
  0x1c   :  { %502 = vmatpush.msra.mxu3 %v4262_v25  ;;  %649 = vmatpush.msrb.mxu1 %v4307_v52 }
  0x1d   :  { %3443 = vmatmul.msk.f32.gmra.mxu1 %vm114_vm0, %v89_v10  ;;  %522 = vmatpush.msrb.mxu2 %v4309_v53 }
  0x1e   :  { %3452 = vmatmul.msk.f32.gmra.mxu2 %vm114_vm0, %v90_v11  ;;  %482 = vmatpush.msra.mxu0 %v4311_v54 }
  0x1f   :  { %503 = vmatpush.msra.mxu3 %v4319_v57  ;;  %650 = vmatpush.msrb.mxu1 %v4322_v58 }
  0x20   :  { %483 = vmatpush.msra.mxu0 %v4324_v59  ;;  %523 = vmatpush.msrb.mxu2 %v4330_v61 }
  0x21   :  { %797 = vmatpush.msra.mxu1 %v4239_v16  ;;  %540 = vmatpush.msrb.mxu3 %v4335_v0 }
  0x22   :  { %3436 = vmatmul.msk.f32.gmra.mxu0 %vm114_vm0, %v90_v11 }
  0x23   :  { %3459 = vmatmul.msk.f32.gmra.mxu3 %vm114_vm0, %v89_v10  ;;  %798 = vmatpush.msra.mxu1 %v4242_v18  ;;  %v4361_v10 = vld [vmem:[#allocation5 + $0x30] sm:$0xff] }
  0x24   :  { %541 = vmatpush.msrb.mxu3 %v4347_v4 }
  0x25   :  { %3444 = vmatmul.msk.f32.gmra.mxu1 %vm114_vm0, %v90_v11 }
  0x26   :  { %3453 = vmatmul.msk.f32.gmra.mxu2 %vm114_vm0, %v91_v12  ;;  %799 = vmatpush.msra.mxu1 %v4262_v25 }
  0x27   :  { %542 = vmatpush.msrb.mxu3 %v4354_v8 }
  0x28   :  { %800 = vmatpush.msra.mxu1 %v4319_v57 }
  0x2a   :  { %3437 = vmatmul.msk.f32.gmra.mxu0 %vm114_vm0, %v91_v12 }
  0x2b   :  { %3460 = vmatmul.msk.f32.gmra.mxu3 %vm114_vm0, %v90_v11 }
  0x2d   :  { %3445 = vmatmul.msk.f32.gmra.mxu1 %vm114_vm0, %v91_v12 }
  0x2e   :  { %3454 = vmatmul.msk.f32.gmra.mxu2 %vm114_vm0, %v92_v13 }
  0x32   :  { %3438 = vmatmul.msk.f32.gmra.mxu0 %vm114_vm0, %v92_v13 }
  0x33   :  { %3461 = vmatmul.msk.f32.gmra.mxu3 %vm114_vm0, %v91_v12  ;;  %v4365_v12 = vld [vmem:[#allocation8 + $0x18] sm:$0xff] }
  0x34   :  { %543 = vmatpush.msrb.mxu3 %v4365_v12 }
  0x35   :  { %3446 = vmatmul.msk.f32.gmra.mxu1 %vm114_vm0, %v92_v13 }
  0x36   :  { %3455 = vmatmul.msk.f32.gmra.mxu2 %vm114_vm0, %v93_v14 }
  0x3a   :  { %3439 = vmatmul.msk.f32.gmra.mxu0 %vm114_vm0, %v93_v14 }
  0x3b   :  { %3462 = vmatmul.msk.f32.gmra.mxu3 %vm114_vm0, %v92_v13  ;;  %v4367_v13 = vld [vmem:[#allocation5] sm:$0xff] }
  0x3d   :  { %3447 = vmatmul.msk.f32.gmra.mxu1 %vm114_vm0, %v93_v14 }
  0x3e   :  { %3456 = vmatmul.msk.f32.gmra.mxu2 %vm114_vm0, %v94_v15 }
  0x42   :  { %3440 = vmatmul.msk.f32.gmra.mxu0 %vm114_vm0, %v94_v15 }
  0x43   :  { %3463 = vmatmul.msk.f32.gmra.mxu3 %vm114_vm0, %v93_v14  ;;  %v4371_v14 = vperm.slane %v4252_v21, 2 }
  0x45   :  { %3448 = vmatmul.msk.f32.gmra.mxu1 %vm114_vm0, %v94_v15  ;;  %5839 = vst [vmem:[#allocation30_spill] sm:$0xff] %v4371_v14 }
  0x46   :  { %3457 = vmatmul.msk.f32.gmra.mxu2 %vm114_vm0, %v95_v6 }
  0x4a   :  { %3441 = vmatmul.msk.f32.gmra.mxu0 %vm114_vm0, %v95_v6 }
  0x4b   :  { %3464 = vmatmul.msk.f32.gmra.mxu3 %vm114_vm0, %v94_v15  ;;  %v4375_v15 = vld [vmem:[#allocation5 + $0x10] sm:$0xff] }
  0x52   :  { %3450 = vmatmul.msk.f32.vlgmr.msrb.gmra.mxu0 %vm114_vm0, %v88_v2  ;;  %v4339_v2 = vld [vmem:[#allocation5 + $0x70] sm:$0xff] }
  0x53   :  { %3465 = vmatmul.msk.f32.gmra.mxu3 %vm114_vm0, %v95_v6  ;;  %627 = vmatpush.msrb.mxu0 %v4337_v1  ;;  %v4351_v6 = vld [vmem:[#allocation5 + $0x50] sm:$0xff] }
  0x54   :  { %667 = vmatpush.msra.mxu2 %v4339_v2 }
  0x55   :  { %628 = vmatpush.msrb.mxu0 %v4349_v5 }
  0x56   :  { %668 = vmatpush.msra.mxu2 %v4351_v6 }
  0x57   :  { %629 = vmatpush.msrb.mxu0 %v4356_v9 }
  0x58   :  { %669 = vmatpush.msra.mxu2 %v4361_v10 }
  0x59   :  { %630 = vmatpush.msrb.mxu0 %v4367_v13 }
  0x5a   :  { %670 = vmatpush.msra.mxu2 %v4375_v15 }
  0x8f   :  { %v156_v17 = vpop.f32.mrf.mxu0 }
  0x90   :  { %v157_v30 = vadd.f32 %v156_v17, %v4267_v27 }
  0x92   :  { %v197_v26 = vpop.f32.mrf.mxu1  ;;  %v3466_v35 = vmul.f32 -1.442695, %v157_v30 }
  0x93   :  { %v198_v28 = vadd.f32 %v197_v26, %v4258_v23 }
  0x95   :  { %v3467_v32 = vmul.f32 -1.442695, %v198_v28 }
  0x96   :  { %v4270_v29 = vpop.f32.mrf.mxu3 }
  0x97   :  { %v4245_v19 = vpop.f32.mrf.mxu0  ;;  %5832 = vst [vmem:[#allocation23_spill] sm:$0xff] %v4270_v29  ;;  %3615 = vpow2.f32 %v3467_v32 }
  0x98   :  { %3617 = vpow2.f32 %v3466_v35 }
  0x9d   :  { %v3616_v39 = vpop.eup %3615 }
  0x9e   :  { %v279_v38 = vpop.f32.mrf.mxu3  ;;  %v3618_v41 = vpop.eup %3617  ;;  %v4287_v42 = vadd.f32 1.0, %v3616_v39 }
  0x9f   :  { %v4254_v22 = vpop.f32.mrf.mxu0  ;;  %v280_v40 = vadd.f32 %v279_v38, %v4282_v36  ;;  %v4291_v45 = vadd.f32 1.0, %v3618_v41 }
  0xa0   :  { %5829 = vst [vmem:[#allocation20_spill] sm:$0xff] %v4254_v22  ;;  %3619 = vrcp.f32 %v4287_v42  ;;  %vm429_vm1 = vweird.f32 %v4287_v42  ;;  %v435_v21 = vand.u32 2147483648, %v4287_v42  ;;  %v433_v32 = vand.u32 2147483647, %v4287_v42 }
  0xa1   :  { %v3468_v43 = vmul.f32 -1.442695, %v280_v40  ;;  %v416_v40 = vand.u32 2147483648, %v4291_v45  ;;  %vm410_vm5 = vweird.f32 %v4291_v45 }
  0xa2   :  { %v436_v41 = vor.u32 1.1754944e-38, %v435_v21  ;;  %vm434_vm6 = vcmp.eq.f32.partialorder %v433_v32, 8.507059e+37 }
  0xa3   :  { %3621 = vpow2.f32 %v3468_v43  ;;  %v414_v43 = vand.u32 2147483647, %v4291_v45 }
  0xa4   :  { %3623 = vrcp.f32 %v4291_v45 }
  0xa5   :  { %vm415_vm8 = vcmp.eq.f32.partialorder %v414_v43, 8.507059e+37  ;;  %v4407_v43 = vld [vmem:[#allocation5 + $0x78] sm:$0xff] }
  0xa6   :  { %v4297_v47 = vpop.eup %3619 }
  0xa7   :  { %v4273_v31 = vpop.f32.mrf.mxu0  ;;  %v425_v55 = vmul.f32 %v4297_v47, %v4287_v42  ;;  %vm430_vm2 = vweird.f32 %v4297_v47 }
  0xa8   :  { %5833 = vst [vmem:[#allocation24_spill] sm:$0xff] %v4273_v31  ;;  %vm431_vm3 = vmor %vm429_vm1, %vm430_vm2 }
  0xa9   :  { %v3622_v49 = vpop.eup %3621  ;;  %v426_v62 = vsub.f32 1.0, %v425_v55 }
  0xaa   :  { %v4305_v51 = vpop.eup %3623  ;;  %v4315_v56 = vadd.f32 1.0, %v3622_v49 }
  0xab   :  { %v406_v60 = vmul.f32 %v4305_v51, %v4291_v45  ;;  %v427_v11 = vmul.f32 %v4297_v47, %v426_v62  ;;  %vm411_vm4 = vweird.f32 %v4305_v51 }
  0xac   :  { %3625 = vrcp.f32 %v4315_v56  ;;  %vm412_vm7 = vmor %vm410_vm5, %vm411_vm4  ;;  %vm449_vm9 = vweird.f32 %v4315_v56  ;;  %v455_v45 = vand.u32 2147483648, %v4315_v56 }
  0xad   :  { %v407_v7 = vsub.f32 1.0, %v406_v60  ;;  %v428_v30 = vadd.f32 %v4297_v47, %v427_v11  ;;  %v417_v60 = vor.u32 1.1754944e-38, %v416_v40 }
  0xaf   :  { %v4284_v37 = vpop.f32.mrf.mxu0  ;;  %v408_v26 = vmul.f32 %v4305_v51, %v407_v7  ;;  %v432_v42 = vsel %vm431_vm3, %v4297_v47, %v428_v30 }
  0xb0   :  { %5835 = vst [vmem:[#allocation26_spill] sm:$0xff] %v4284_v37  ;;  %v437_v62 = vsel %vm434_vm6, %v436_v41, %v432_v42 }
  0xb1   :  { %v409_v39 = vadd.f32 %v4305_v51, %v408_v26  ;;  %v459_v21 = vmul.f32 0.0, %v437_v62 }
  0xb2   :  { %v3626_v17 = vpop.eup %3625 }
  0xb3   :  { %v445_v35 = vmul.f32 %v3626_v17, %v4315_v56  ;;  %v413_v55 = vsel %vm412_vm7, %v4305_v51, %v409_v39  ;;  %vm450_vm10 = vweird.f32 %v3626_v17  ;;  %v453_v51 = vand.u32 2147483647, %v4315_v56  ;;  %v4415_v56 = vld [vmem:[#allocation5 + $0x58] sm:$0xff] }
  0xb4   :  { %v418_v26 = vsel %vm415_vm8, %v417_v60, %v413_v55  ;;  %vm451_vm11 = vmor %vm449_vm9, %vm450_vm10 }
  0xb5   :  { %v446_v49 = vsub.f32 1.0, %v445_v35  ;;  %v456_v35 = vor.u32 1.1754944e-38, %v455_v45  ;;  %vm454_vm12 = vcmp.eq.f32.partialorder %v453_v51, 8.507059e+37 }
  0xb7   :  { %v4289_v44 = vpop.f32.mrf.mxu0  ;;  %v447_v11 = vmul.f32 %v3626_v17, %v446_v49  ;;  %v4426_v49 = vld [vmem:[#allocation5 + $0x18] sm:$0xff] }
  0xb8   :  { %5836 = vst [vmem:[#allocation27_spill] sm:$0xff] %v4289_v44 }
  0xb9   :  { %v448_v30 = vadd.f32 %v3626_v17, %v447_v11  ;;  %v282_v11 = vpop.f32.mrf.mxu3 }
  0xbf   :  { %v4299_v48 = vpop.f32.mrf.mxu0 }
  0xc0   :  { %5837 = vst [vmem:[#allocation28_spill] sm:$0xff] %v4299_v48 }
  0xc7   :  { %v177_v63 = vpop.f32.mrf.mxu0 }
  0xc8   :  { %v4343_v3 = vadd.f32 %v177_v63, %v4267_v27  ;;  %v4397_v63 = vpop.f32.mrf.mxu2 }
  0xca   :  { %5838 = vst [vmem:[#allocation29_spill] sm:$0xff] %v4343_v3 }
  0xcf   :  { %v238_v28 = vpop.f32.mrf.mxu0 }
  0xd0   :  { %v239_v38 = vadd.f32 %v238_v28, %v4371_v14  ;;  %v4405_v32 = vpop.f32.mrf.mxu2 }
  0xd1   :  { %5840 = vst [vmem:[#allocation31_spill] sm:$0xff] %v4405_v32 }
  0xd2   :  { %3627 = vtanh.f32 %v239_v38  ;;  %v452_v38 = vsel %vm451_vm11, %v3626_v17, %v448_v30  ;;  %v4419_v17 = vld [vmem:[#allocation5 + $0x38] sm:$0xff] }
  0xd3   :  { %v457_v40 = vsel %vm454_vm12, %v456_v35, %v452_v38 }
  0xd8   :  { %v3628_v7 = vpop.eup %3627  ;;  %v4411_v42 = vpop.f32.mrf.mxu2 }
  0xd9   :  { %v460_v28 = vmul.f32 %v3628_v7, %v418_v26  ;;  %5841 = vst [vmem:[#allocation32_spill] sm:$0xff] %v4411_v42  ;;  %v200_v26 = vpop.f32.mrf.mxu1 }
  0xdb   :  { %v4401_v47 = vadd.f32 %v460_v28, %v459_v21  ;;  %v4448_v21 = vpop.f32.mrf.mxu3 }
  0xdc   :  { %5845 = vst [vmem:[#allocation36_spill] sm:$0xff] %v4448_v21  ;;  %v242_v21 = vadd.f32 %v4397_v63, %v4371_v14  ;;  %v4531_v63 = vld [vmem:[#allocation10 + $0x48] sm:$0xff] }
  0xdd   :  { %3629 = vtanh.f32 %v4401_v47  ;;  %5864 = vst [vmem:[#allocation55_spill] sm:$0xff] %v4531_v63 }
  0xe0   :  { %v4432_v55 = vpop.f32.mrf.mxu2 }
  0xe1   :  { %5842 = vst [vmem:[#allocation33_spill] sm:$0xff] %v4432_v55  ;;  %v4450_v28 = vpop.f32.mrf.mxu1 }
  0xe2   :  { %5846 = vst [vmem:[#allocation37_spill] sm:$0xff] %v4450_v28 }
  0xe3   :  { %v3630_v39 = vpop.eup %3629  ;;  %v4452_v45 = vpop.f32.mrf.mxu3 }
  0xe4   :  { %v463_v41 = vmul.f32 %v3630_v39, %v457_v40  ;;  %5847 = vst [vmem:[#allocation38_spill] sm:$0xff] %v4452_v45 }
  0xe6   :  { %3469 = vmatmul.msk.f32.vlgmr.msra.gmra.mxu0 %vm464_vm13, %v463_v41  ;;  %3470 = vmatmul.msk.f32.vlgmr.msra.gmra.mxu3 %vm464_vm13, %v463_v41 }
  0xe7   :  { %3471 = vmatmul.msk.f32.vlgmr.msrb.gmra.mxu2 %vm464_vm13, %v463_v41  ;;  %3477 = vmatmul.msk.f32.vlgmr.msrb.gmra.mxu1 %vm464_vm13, %v463_v41 }
  0xe8   :  { %687 = vmatpush.msra.mxu3 %v4407_v43  ;;  %777 = vmatpush.msra.mxu0 %v4295_v46  ;;  %v4442_v60 = vpop.f32.mrf.mxu2 }
  0xe9   :  { %817 = vmatpush.msrb.mxu2 %v4260_v24  ;;  %5843 = vst [vmem:[#allocation34_spill] sm:$0xff] %v4442_v60  ;;  %v4454_v30 = vpop.f32.mrf.mxu1 }
  0xea   :  { %688 = vmatpush.msra.mxu3 %v4415_v56  ;;  %778 = vmatpush.msra.mxu0 %v4302_v50  ;;  %5848 = vst [vmem:[#allocation39_spill] sm:$0xff] %v4454_v30 }
  0xeb   :  { %818 = vmatpush.msrb.mxu2 %v4277_v34  ;;  %v4456_v51 = vpop.f32.mrf.mxu3 }
  0xec   :  { %689 = vmatpush.msra.mxu3 %v4419_v17  ;;  %779 = vmatpush.msra.mxu0 %v4311_v54  ;;  %5849 = vst [vmem:[#allocation40_spill] sm:$0xff] %v4456_v51 }
  0xed   :  { %819 = vmatpush.msrb.mxu2 %v4309_v53 }
  0xee   :  { %3472 = vmatmul.msk.f32.vlgmr.msrb.gmra.mxu3 %vm464_vm13, %v463_v41  ;;  %3476 = vmatmul.msk.f32.vlgmr.msrb.gmra.mxu0 %vm464_vm13, %v463_v41 }
  0xef   :  { %3478 = vmatmul.msk.f32.vlgmr.msra.gmra.mxu2 %vm464_vm13, %v463_v41  ;;  %690 = vmatpush.msra.mxu3 %v4426_v49 }
  0xf0   :  { %780 = vmatpush.msra.mxu0 %v4324_v59  ;;  %820 = vmatpush.msrb.mxu2 %v4330_v61  ;;  %v256_v62 = vpop.f32.mrf.mxu2 }
  0xf1   :  { %837 = vmatpush.msrb.mxu3 %v4335_v0  ;;  %v4446_v7 = vadd.f32 %v256_v62, %v4371_v14  ;;  %v4458_v35 = vpop.f32.mrf.mxu1  ;;  %v383_v62 = vld [vmem:[%s5744_s6] sm:$0xf] }
  0xf2   :  { %5850 = vst [vmem:[#allocation41_spill] sm:$0xff] %v4458_v35  ;;  %v4473_v29 = vperm.slane %v383_v62, 0  ;;  %v4477_v55 = vperm.slane %v383_v62, 1 }
  0xf3   :  { %838 = vmatpush.msrb.mxu3 %v4347_v4  ;;  %5844 = vst [vmem:[#allocation35_spill] sm:$0xff] %v4446_v7  ;;  %v4460_v38 = vpop.f32.mrf.mxu3  ;;  %v201_v7 = vadd.f32 %v200_v26, %v4258_v23 }
  0xf4   :  { %5851 = vst [vmem:[#allocation42_spill] sm:$0xff] %v4460_v38 }
  0xf5   :  { %839 = vmatpush.msrb.mxu3 %v4354_v8  ;;  %5856 = vst [vmem:[#allocation47_spill] sm:$0xff] %v4473_v29 }
  0xf6   :  { %3479 = vmatmul.msk.f32.vlgmr.msra.gmra.mxu3 %vm464_vm13, %v463_v41  ;;  %5857 = vst [vmem:[#allocation48_spill] sm:$0xff] %v4477_v55 }
  0xf7   :  { %840 = vmatpush.msrb.mxu3 %v4365_v12 }
  0xf9   :  { %v4462_v39 = vpop.f32.mrf.mxu1 }
  0xfa   :  { %5852 = vst [vmem:[#allocation43_spill] sm:$0xff] %v4462_v39 }
  0xfb   :  { %v4464_v40 = vpop.f32.mrf.mxu3 }
  0xfc   :  { %5853 = vst [vmem:[#allocation44_spill] sm:$0xff] %v4464_v40 }
 0x101   :  { %v4466_v41 = vpop.f32.mrf.mxu1 }
 0x102   :  { %5854 = vst [vmem:[#allocation45_spill] sm:$0xff] %v4466_v41  ;;  %v4479_v41 = vpop.f32.mrf.mxu2 }
 0x103   :  { %v4471_v3 = vpop.f32.mrf.mxu3  ;;  %5858 = vst [vmem:[#allocation49_spill] sm:$0xff] %v4479_v41 }
 0x104   :  { %5855 = vst [vmem:[#allocation46_spill] sm:$0xff] %v4471_v3  ;;  %v160_v3 = vadd.f32 %v4245_v19, %v4267_v27  ;;  %v4542_v27 = vld [vmem:[#allocation10 + $0x20] sm:$0xff] }
 0x105   :  { %5867 = vst [vmem:[#allocation58_spill] sm:$0xff] %v4542_v27 }
 0x163   :  { %v485_v48 = vpop.f32.mrf.mxu0 }
 0x164   :  { %v486_v60 = vadd.f32 %v485_v48, %v4473_v29  ;;  %v652_v38 = vpop.f32.mrf.mxu1 }
 0x165   :  { %v696_v44 = vadd.f32 %v652_v38, %v201_v7 }
 0x166   :  { %v3473_v39 = vmul.f32 -1.442695, %v486_v60  ;;  %v4484_v60 = vperm.slane %v383_v62, 3 }
 0x167   :  { %v3481_v40 = vmul.f32 -1.442695, %v696_v44 }
 0x168   :  { %3631 = vpow2.f32 %v3473_v39  ;;  %5859 = vst [vmem:[#allocation50_spill] sm:$0xff] %v4484_v60 }
 0x169   :  { %3633 = vpow2.f32 %v3481_v40  ;;  %v505_v51 = vpop.f32.mrf.mxu3 }
 0x16a   :  { %v506_v35 = vadd.f32 %v505_v51, %v4477_v55  ;;  %v525_v51 = vpop.f32.mrf.mxu2  ;;  %v4544_v55 = vld [vmem:[#allocation10 + $0x28] sm:$0xff] }
 0x16b   :  { %v632_v26 = vpop.f32.mrf.mxu0  ;;  %5868 = vst [vmem:[#allocation59_spill] sm:$0xff] %v4544_v55 }
 0x16c   :  { %v3474_v37 = vmul.f32 -1.442695, %v506_v35  ;;  %v695_v42 = vadd.f32 %v632_v26, %v160_v3 }
 0x16e   :  { %v3632_v48 = vpop.eup %3631  ;;  %3635 = vpow2.f32 %v3474_v37  ;;  %v3480_v7 = vmul.f32 -1.442695, %v695_v42 }
 0x16f   :  { %v3634_v38 = vpop.eup %3633  ;;  %v4486_v44 = vadd.f32 1.0, %v3632_v48  ;;  %v283_v48 = vadd.f32 %v282_v11, %v4282_v36  ;;  %v4512_v11 = vld [vmem:[#allocation10 + $0x68] sm:$0xff] }
 0x170   :  { %v4488_v39 = vadd.f32 1.0, %v3634_v38  ;;  %3637 = vpow2.f32 %v3480_v7  ;;  %880 = vmatpush.msrb.mxu1 %v4512_v11 }
 0x171   :  { %v545_v40 = vpop.f32.mrf.mxu3  ;;  %vm557_vm10 = vweird.f32 %v4486_v44 }
 0x172   :  { %3639 = vrcp.f32 %v4488_v39  ;;  %v546_v19 = vadd.f32 %v545_v40, %v4484_v60  ;;  %v733_v28 = vand.u32 2147483648, %v4488_v39  ;;  %881 = vmatpush.msrb.mxu1 %v4531_v63  ;;  %vm727_vm14 = vweird.f32 %v4488_v39 }
 0x173   :  { %3641 = vrcp.f32 %v4486_v44 }
 0x174   :  { %v3636_v41 = vpop.eup %3635  ;;  %v3475_v3 = vmul.f32 -1.442695, %v546_v19  ;;  %882 = vmatpush.msrb.mxu1 %v4544_v55 }
 0x175   :  { %v4493_v37 = vadd.f32 1.0, %v3636_v41 }
 0x176   :  { %v3638_v42 = vpop.eup %3637 }
 0x177   :  { %3643 = vrcp.f32 %v4493_v37  ;;  %v4498_v26 = vadd.f32 1.0, %v3638_v42  ;;  %v672_v42 = vpop.f32.mrf.mxu2  ;;  %vm576_vm2 = vweird.f32 %v4493_v37 }
 0x178   :  { %v4496_v35 = vpop.eup %3639  ;;  %3645 = vpow2.f32 %v3475_v3  ;;  %v4510_v3 = vld [vmem:[#allocation10 + $0x60] sm:$0xff]  ;;  %v697_v22 = vadd.f32 %v672_v42, %v242_v21 }
 0x179   :  { %v723_v7 = vmul.f32 %v4496_v35, %v4488_v39  ;;  %v692_v38 = vpop.f32.mrf.mxu3  ;;  %v4503_v40 = vpop.eup %3641  ;;  %3647 = vrcp.f32 %v4498_v26  ;;  %860 = vmatpush.msrb.mxu0 %v4510_v3  ;;  %v4556_v21 = vld [vmem:[#allocation10] sm:$0xff]  ;;  %vm728_vm15 = vweird.f32 %v4496_v35  ;;  %v712_v55 = vand.u32 2147483647, %v4498_v26 }
 0x17a   :  { %v698_v19 = vadd.f32 %v692_v38, %v283_v48  ;;  %v553_v30 = vmul.f32 %v4503_v40, %v4486_v44  ;;  %v4522_v48 = vld [vmem:[#allocation10 + $0x70] sm:$0xff]  ;;  %v4524_v38 = vld [vmem:[#allocation10 + $0x78] sm:$0xff]  ;;  %vm4588_vm1 = vmor %vm727_vm14, %vm728_vm15  ;;  %vm708_vm4 = vweird.f32 %v4498_v26  ;;  %vm558_vm6 = vweird.f32 %v4503_v40 }
 0x17b   :  { %v724_v41 = vsub.f32 1.0, %v723_v7  ;;  %v4518_v7 = vperm.slane %v383_v62, 2  ;;  %5861 = vst [vmem:[#allocation52_spill] sm:$0xff] %v4522_v48  ;;  %900 = vmatpush.msra.mxu2 %v4522_v48  ;;  %920 = vmatpush.msra.mxu3 %v4524_v38  ;;  %v4533_v62 = vld [vmem:[#allocation10 + $0x50] sm:$0xff]  ;;  %vm713_vm8 = vcmp.eq.f32.partialorder %v712_v55, 8.507059e+37  ;;  %vm559_vm11 = vmor %vm557_vm10, %vm558_vm6 }
 0x17c   :  { %v3482_v31 = vmul.f32 -1.442695, %v698_v19  ;;  %5862 = vst [vmem:[#allocation53_spill] sm:$0xff] %v4524_v38  ;;  %v4526_v19 = vld [vmem:[#allocation10 + $0x40] sm:$0xff]  ;;  %v554_v29 = vsub.f32 1.0, %v553_v30 }
 0x17d   :  { %v4506_v45 = vpop.eup %3643  ;;  %5860 = vst [vmem:[#allocation51_spill] sm:$0xff] %v4518_v7  ;;  %v725_v60 = vmul.f32 %v4496_v35, %v724_v41  ;;  %861 = vmatpush.msrb.mxu0 %v4526_v19  ;;  %v4540_v41 = vld [vmem:[#allocation10 + $0x58] sm:$0xff]  ;;  %901 = vmatpush.msra.mxu2 %v4533_v62  ;;  %v526_v42 = vadd.f32 %v525_v51, %v4518_v7  ;;  %v731_v30 = vand.u32 2147483647, %v4488_v39  ;;  %v734_v7 = vor.u32 1.1754944e-38, %v733_v28 }
 0x17e   :  { %v3646_v32 = vpop.eup %3645  ;;  %v572_v36 = vmul.f32 %v4506_v45, %v4493_v37  ;;  %5863 = vst [vmem:[#allocation54_spill] sm:$0xff] %v4526_v19  ;;  %3649 = vpow2.f32 %v3482_v31  ;;  %921 = vmatpush.msra.mxu3 %v4540_v41  ;;  %v4552_v31 = vld [vmem:[#allocation10 + $0x30] sm:$0xff]  ;;  %v4572_v51 = vld [vmem:[#allocation10 + $0x18] sm:$0xff]  ;;  %vm577_vm3 = vweird.f32 %v4506_v45 }
 0x17f   :  { %5865 = vst [vmem:[#allocation56_spill] sm:$0xff] %v4533_v62  ;;  %v4535_v14 = vpop.eup %3647  ;;  %v4548_v48 = vadd.f32 1.0, %v3646_v32  ;;  %862 = vmatpush.msrb.mxu0 %v4542_v27  ;;  %v4563_v32 = vld [vmem:[#allocation10 + $0x8] sm:$0xff]  ;;  %v4565_v62 = vld [vmem:[#allocation10 + $0x10] sm:$0xff]  ;;  %v726_v19 = vadd.f32 %v4496_v35, %v725_v60  ;;  %902 = vmatpush.msra.mxu2 %v4552_v31  ;;  %v714_v27 = vand.u32 2147483648, %v4498_v26  ;;  %3651 = vtanh.f32 %v697_v22  ;;  %vm4616_vm9 = vmor %vm576_vm2, %vm577_vm3 }
 0x180   :  { %v573_v23 = vsub.f32 1.0, %v572_v36  ;;  %5866 = vst [vmem:[#allocation57_spill] sm:$0xff] %v4540_v41  ;;  %v704_v38 = vmul.f32 %v4535_v14, %v4498_v26  ;;  %v4554_v36 = vld [vmem:[#allocation10 + $0x38] sm:$0xff]  ;;  %883 = vmatpush.msrb.mxu1 %v4563_v32  ;;  %vm709_vm0 = vweird.f32 %v4535_v14  ;;  %vm4595_vm5 = vcmp.eq.f32.partialorder %v731_v30, 8.507059e+37 }
 0x181   :  { %5869 = vst [vmem:[#allocation60_spill] sm:$0xff] %v4563_v32  ;;  %922 = vmatpush.msra.mxu3 %v4554_v36  ;;  %863 = vmatpush.msrb.mxu0 %v4556_v21  ;;  %3653 = vrcp.f32 %v4548_v48  ;;  %v730_v39 = vsel %vm4588_vm1, %v4496_v35, %v726_v19  ;;  %v580_v32 = vand.u32 2147483647, %v4493_v37  ;;  %vm710_vm7 = vmor %vm708_vm4, %vm709_vm0  ;;  %v715_v26 = vor.u32 1.1754944e-38, %v714_v27 }
 0x182   :  { %5870 = vst [vmem:[#allocation61_spill] sm:$0xff] %v4565_v62  ;;  %v574_v41 = vmul.f32 %v4506_v45, %v573_v23  ;;  %v705_v63 = vsub.f32 1.0, %v704_v38  ;;  %v555_v23 = vmul.f32 %v4503_v40, %v554_v29  ;;  %903 = vmatpush.msra.mxu2 %v4565_v62  ;;  %v582_v62 = vand.u32 2147483648, %v4493_v37 }
 0x183   :  { %5871 = vst [vmem:[#allocation62_spill] sm:$0xff] %v4572_v51  ;;  %923 = vmatpush.msra.mxu3 %v4572_v51  ;;  %v563_v35 = vand.u32 2147483648, %v4486_v44  ;;  %v735_v27 = vsel %vm4595_vm5, %v734_v7, %v730_v39  ;;  %vm581_vm12 = vcmp.eq.f32.partialorder %v580_v32, 8.507059e+37  ;;  %vm596_vm4 = vweird.f32 %v4548_v48 }
 0x184   :  { %v706_v60 = vmul.f32 %v4535_v14, %v705_v63  ;;  %v3650_v28 = vpop.eup %3649  ;;  %v575_v38 = vadd.f32 %v4506_v45, %v574_v41  ;;  %v556_v30 = vadd.f32 %v4503_v40, %v555_v23  ;;  %v583_v37 = vor.u32 1.1754944e-38, %v582_v62 }
 0x185   :  { %v741_v51 = vadd.f32 1.0, %v3650_v28  ;;  %v757_v7 = vmul.f32 %v735_v27, %v4401_v47  ;;  %v564_v29 = vor.u32 1.1754944e-38, %v563_v35 }
 0x186   :  { %v707_v63 = vadd.f32 %v4535_v14, %v706_v60  ;;  %v3652_v60 = vpop.eup %3651  ;;  %v579_v55 = vsel %vm4616_vm9, %v4506_v45, %v575_v38 }
 0x187   :  { %3655 = vrcp.f32 %v741_v51  ;;  %v4622_v23 = vpop.eup %3653  ;;  %v584_v39 = vsel %vm581_vm12, %v583_v37, %v579_v55  ;;  %v751_v32 = vand.u32 2147483647, %v741_v51  ;;  %vm747_vm0 = vweird.f32 %v741_v51 }
 0x188   :  { %v711_v41 = vsel %vm710_vm7, %v4535_v14, %v707_v63  ;;  %v561_v14 = vand.u32 2147483647, %v4486_v44  ;;  %3657 = vtanh.f32 %v526_v42  ;;  %v560_v63 = vsel %vm559_vm11, %v4503_v40, %v556_v30 }
 0x189   :  { %v716_v28 = vsel %vm713_vm8, %v715_v26, %v711_v41  ;;  %v592_v44 = vmul.f32 %v4622_v23, %v4548_v48  ;;  %v606_v38 = vmul.f32 0.0, %v584_v39  ;;  %v753_v40 = vand.u32 2147483648, %v741_v51 }
 0x18a   :  { %v758_v22 = vmul.f32 %v3652_v60, %v716_v28  ;;  %vm562_vm14 = vcmp.eq.f32.partialorder %v561_v14, 8.507059e+37  ;;  %vm752_vm2 = vcmp.eq.f32.partialorder %v751_v32, 8.507059e+37  ;;  %vm597_vm3 = vweird.f32 %v4622_v23  ;;  %v5895_v32 = vld [vmem:[#allocation50_spill] sm:$0xff] }
 0x18b   :  { %v565_v45 = vsel %vm562_vm14, %v564_v29, %v560_v63  ;;  %v593_v19 = vsub.f32 1.0, %v592_v44  ;;  %v754_v14 = vor.u32 1.1754944e-38, %v753_v40  ;;  %v602_v29 = vand.u32 2147483648, %v4548_v48  ;;  %vm598_vm5 = vmor %vm596_vm4, %vm597_vm3 }
 0x18c   :  { %v4635_v41 = vadd.f32 %v758_v22, %v757_v7 }
 0x18d   :  { %v3656_v26 = vpop.eup %3655  ;;  %v594_v35 = vmul.f32 %v4622_v23, %v593_v19 }
 0x18e   :  { %v743_v62 = vmul.f32 %v3656_v26, %v741_v51  ;;  %v3658_v60 = vpop.eup %3657  ;;  %3659 = vtanh.f32 %v4635_v41  ;;  %vm748_vm15 = vweird.f32 %v3656_v26  ;;  %v600_v51 = vand.u32 2147483647, %v4548_v48 }
 0x18f   :  { %v607_v28 = vmul.f32 %v3658_v60, %v565_v45  ;;  %vm749_vm1 = vmor %vm747_vm0, %vm748_vm15  ;;  %v595_v7 = vadd.f32 %v4622_v23, %v594_v35  ;;  %v5893_v45 = vld [vmem:[#allocation21_spill] sm:$0xff] }
 0x190   :  { %v744_v42 = vsub.f32 1.0, %v743_v62  ;;  %vm601_vm6 = vcmp.eq.f32.partialorder %v600_v51, 8.507059e+37  ;;  %v5894_v62 = vld [vmem:[#allocation37_spill] sm:$0xff] }
 0x191   :  { %v4638_v30 = vadd.f32 %v607_v28, %v606_v38  ;;  %v599_v39 = vsel %vm598_vm5, %v4622_v23, %v595_v7  ;;  %v204_v38 = vadd.f32 %v5894_v62, %v5893_v45  ;;  %v5900_v62 = vld [vmem:[#allocation31_spill] sm:$0xff] }
 0x192   :  { %v745_v47 = vmul.f32 %v3656_v26, %v744_v42 }
 0x193   :  { %3661 = vtanh.f32 %v4638_v30 }
 0x194   :  { %v746_v27 = vadd.f32 %v3656_v26, %v745_v47  ;;  %v3660_v22 = vpop.eup %3659 }
 0x196   :  { %v750_v55 = vsel %vm749_vm1, %v3656_v26, %v746_v27  ;;  %v603_v26 = vor.u32 1.1754944e-38, %v602_v29 }
 0x197   :  { %v755_v37 = vsel %vm752_vm2, %v754_v14, %v750_v55 }
 0x198   :  { %v761_v63 = vmul.f32 %v3660_v22, %v755_v37  ;;  %v604_v48 = vsel %vm601_vm6, %v603_v26, %v599_v39  ;;  %v5896_v39 = vld [vmem:[#allocation25_spill] sm:$0xff] }
 0x199   :  { %v3662_v44 = vpop.eup %3661 }
 0x19a   :  { %3483 = vmatmul.msk.f32.vlgmr.msra.gmra.mxu0 %vm464_vm13, %v761_v63  ;;  %3484 = vmatmul.msk.f32.vlgmr.msra.gmra.mxu1 %vm464_vm13, %v761_v63  ;;  %v610_v23 = vmul.f32 %v3662_v44, %v604_v48  ;;  %v5897_v44 = vld [vmem:[#allocation36_spill] sm:$0xff] }
 0x19b   :  { %3485 = vmatmul.msk.f32.vlgmr.msrb.gmra.mxu2 %vm464_vm13, %v761_v63  ;;  %3486 = vmatmul.msk.f32.vlgmr.msrb.gmra.mxu3 %vm464_vm13, %v761_v63  ;;  %v286_v26 = vadd.f32 %v5897_v44, %v5896_v39 }
 0x19c   :  { %1011 = vmatpush.msra.mxu0 %v4337_v1  ;;  %1031 = vmatpush.msra.mxu1 %v4247_v20  ;;  %v5880_v20 = vld [vmem:[#allocation54_spill] sm:$0xff] }
 0x19d   :  { %1051 = vmatpush.msrb.mxu2 %v4339_v2  ;;  %1071 = vmatpush.msrb.mxu3 %v4407_v43  ;;  %v5889_v2 = vld [vmem:[#allocation47_spill] sm:$0xff] }
 0x19e   :  { %1012 = vmatpush.msra.mxu0 %v4349_v5  ;;  %1032 = vmatpush.msra.mxu1 %v4275_v33  ;;  %v5883_v33 = vld [vmem:[#allocation57_spill] sm:$0xff]  ;;  %v5890_v5 = vld [vmem:[#allocation48_spill] sm:$0xff] }
 0x19f   :  { %1052 = vmatpush.msrb.mxu2 %v4351_v6  ;;  %1072 = vmatpush.msrb.mxu3 %v4415_v56 }
 0x1a0   :  { %1013 = vmatpush.msra.mxu0 %v4356_v9  ;;  %1033 = vmatpush.msra.mxu1 %v4307_v52  ;;  %v5887_v52 = vld [vmem:[#allocation61_spill] sm:$0xff] }
 0x1a1   :  { %1053 = vmatpush.msrb.mxu2 %v4361_v10  ;;  %1073 = vmatpush.msrb.mxu3 %v4419_v17 }
 0x1a2   :  { %3487 = vmatmul.msk.f32.vlgmr.msrb.gmra.mxu0 %vm464_vm13, %v610_v23  ;;  %3488 = vmatmul.msk.f32.vlgmr.msrb.gmra.mxu1 %vm464_vm13, %v610_v23 }
 0x1a3   :  { %3489 = vmatmul.msk.f32.vlgmr.msra.gmra.mxu2 %vm464_vm13, %v610_v23  ;;  %3490 = vmatmul.msk.f32.vlgmr.msra.gmra.mxu3 %vm464_vm13, %v610_v23 }
 0x1a4   :  { %1014 = vmatpush.msra.mxu0 %v4367_v13  ;;  %1034 = vmatpush.msra.mxu1 %v4322_v58  ;;  %v5892_v13 = vld [vmem:[#allocation20_spill] sm:$0xff] }
 0x1a5   :  { %1054 = vmatpush.msrb.mxu2 %v4375_v15  ;;  %1074 = vmatpush.msrb.mxu3 %v4426_v49 }
 0x1a6   :  { %1161 = vmatpush.msrb.mxu0 %v4295_v46  ;;  %1181 = vmatpush.msrb.mxu1 %v4239_v16  ;;  %v5878_v16 = vld [vmem:[#allocation52_spill] sm:$0xff]  ;;  %v5885_v46 = vld [vmem:[#allocation59_spill] sm:$0xff] }
 0x1a7   :  { %1201 = vmatpush.msra.mxu2 %v4260_v24  ;;  %1221 = vmatpush.msra.mxu3 %v4335_v0  ;;  %v5881_v24 = vld [vmem:[#allocation55_spill] sm:$0xff] }
 0x1a8   :  { %1162 = vmatpush.msrb.mxu0 %v4302_v50  ;;  %1182 = vmatpush.msrb.mxu1 %v4242_v18  ;;  %v5879_v18 = vld [vmem:[#allocation53_spill] sm:$0xff]  ;;  %v5886_v50 = vld [vmem:[#allocation60_spill] sm:$0xff] }
 0x1a9   :  { %1202 = vmatpush.msra.mxu2 %v4277_v34  ;;  %1222 = vmatpush.msra.mxu3 %v4347_v4  ;;  %v5884_v34 = vld [vmem:[#allocation58_spill] sm:$0xff] }
 0x1aa   :  { %3494 = vmatmul.msk.f32.vlgmr.msra.gmra.mxu0 %vm464_vm13, %v761_v63  ;;  %3495 = vmatmul.msk.f32.vlgmr.msra.gmra.mxu1 %vm464_vm13, %v761_v63 }
 0x1ab   :  { %3496 = vmatmul.msk.f32.vlgmr.msrb.gmra.mxu2 %vm464_vm13, %v761_v63  ;;  %3497 = vmatmul.msk.f32.vlgmr.msrb.gmra.mxu3 %vm464_vm13, %v761_v63 }
 0x1ac   :  { %1163 = vmatpush.msrb.mxu0 %v4311_v54  ;;  %1183 = vmatpush.msrb.mxu1 %v4262_v25  ;;  %v5882_v25 = vld [vmem:[#allocation56_spill] sm:$0xff] }
 0x1ad   :  { %1203 = vmatpush.msra.mxu2 %v4309_v53  ;;  %1223 = vmatpush.msra.mxu3 %v4354_v8  ;;  %v5888_v53 = vld [vmem:[#allocation62_spill] sm:$0xff] }
 0x1ae   :  { %1164 = vmatpush.msrb.mxu0 %v4324_v59  ;;  %1184 = vmatpush.msrb.mxu1 %v4319_v57 }
 0x1af   :  { %1204 = vmatpush.msra.mxu2 %v4330_v61  ;;  %1224 = vmatpush.msra.mxu3 %v4365_v12  ;;  %v5891_v12 = vld [vmem:[#allocation22_spill] sm:$0xff] }
 0x1b0   :  { %1244 = vmatpush.msra.mxu0 %v4510_v3  ;;  %1264 = vmatpush.msra.mxu1 %v4512_v11  ;;  %v163_v15 = vadd.f32 %v5892_v13, %v5891_v12 }
 0x1b1   :  { %1284 = vmatpush.msrb.mxu2 %v5878_v16  ;;  %1304 = vmatpush.msrb.mxu3 %v5879_v18 }
 0x1b2   :  { %1245 = vmatpush.msra.mxu0 %v5880_v20  ;;  %1265 = vmatpush.msra.mxu1 %v5881_v24 }
 0x1b3   :  { %1285 = vmatpush.msrb.mxu2 %v5882_v25  ;;  %1305 = vmatpush.msrb.mxu3 %v5883_v33 }
 0x1b4   :  { %1246 = vmatpush.msra.mxu0 %v5884_v34  ;;  %1266 = vmatpush.msra.mxu1 %v5885_v46 }
 0x1b5   :  { %1286 = vmatpush.msrb.mxu2 %v4552_v31  ;;  %1306 = vmatpush.msrb.mxu3 %v4554_v36 }
 0x1b6   :  { %1247 = vmatpush.msra.mxu0 %v4556_v21  ;;  %1267 = vmatpush.msra.mxu1 %v5886_v50 }
 0x1b7   :  { %1287 = vmatpush.msrb.mxu2 %v5887_v52  ;;  %1307 = vmatpush.msrb.mxu3 %v5888_v53 }
 0x217   :  { %v782_v54 = vpop.f32.mrf.mxu0  ;;  %v802_v57 = vpop.f32.mrf.mxu1 }
 0x21e   :  { %v842_v58 = vpop.f32.mrf.mxu3  ;;  %v822_v8 = vpop.f32.mrf.mxu2 }
 0x21f   :  { %v865_v59 = vpop.f32.mrf.mxu0  ;;  %v885_v61 = vpop.f32.mrf.mxu1 }
 0x220   :  { %v866_v0 = vadd.f32 %v865_v59, %v782_v54  ;;  %v886_v1 = vadd.f32 %v885_v61, %v802_v57 }
 0x222   :  { %v928_v4 = vadd.f32 %v866_v0, %v5889_v2  ;;  %v929_v6 = vadd.f32 %v886_v1, %v5890_v5 }
 0x224   :  { %v3491_v9 = vmul.f32 -1.442695, %v928_v4  ;;  %v3492_v10 = vmul.f32 -1.442695, %v929_v6 }
 0x226   :  { %3663 = vpow2.f32 %v3491_v9  ;;  %v925_v60 = vpop.f32.mrf.mxu3  ;;  %v905_v63 = vpop.f32.mrf.mxu2  ;;  %v5898_v9 = vld [vmem:[#allocation51_spill] sm:$0xff] }
 0x227   :  { %3665 = vpow2.f32 %v3492_v10  ;;  %v926_v19 = vadd.f32 %v925_v60, %v842_v58  ;;  %v1016_v42 = vpop.f32.mrf.mxu0  ;;  %v1036_v28 = vpop.f32.mrf.mxu1  ;;  %v906_v54 = vadd.f32 %v905_v63, %v822_v8 }
 0x228   :  { %v1079_v40 = vadd.f32 %v1016_v42, %v163_v15  ;;  %v1080_v47 = vadd.f32 %v1036_v28, %v204_v38  ;;  %v5899_v15 = vld [vmem:[#allocation30_spill] sm:$0xff] }
 0x229   :  { %v931_v35 = vadd.f32 %v926_v19, %v5895_v32  ;;  %v930_v8 = vadd.f32 %v906_v54, %v5898_v9  ;;  %v245_v38 = vadd.f32 %v5900_v62, %v5899_v15 }
 0x22a   :  { %v3498_v27 = vmul.f32 -1.442695, %v1079_v40  ;;  %v3499_v14 = vmul.f32 -1.442695, %v1080_v47 }
 0x22b   :  { %v3493_v29 = vmul.f32 -1.442695, %v931_v35 }
 0x22c   :  { %v3664_v55 = vpop.eup %3663  ;;  %3667 = vpow2.f32 %v3498_v27 }
 0x22d   :  { %v3666_v22 = vpop.eup %3665  ;;  %v4715_v37 = vadd.f32 1.0, %v3664_v55  ;;  %3669 = vpow2.f32 %v3499_v14 }
 0x22e   :  { %v4717_v7 = vadd.f32 1.0, %v3666_v22  ;;  %v1076_v51 = vpop.f32.mrf.mxu3  ;;  %v1056_v10 = vpop.f32.mrf.mxu2 }
 0x22f   :  { %3671 = vrcp.f32 %v4715_v37  ;;  %v1082_v48 = vadd.f32 %v1076_v51, %v286_v26  ;;  %v1081_v42 = vadd.f32 %v1056_v10, %v245_v38  ;;  %vm941_vm7 = vweird.f32 %v4715_v37 }
 0x230   :  { %3673 = vrcp.f32 %v4717_v7  ;;  %v945_v47 = vand.u32 2147483647, %v4715_v37  ;;  %v947_v35 = vand.u32 2147483648, %v4715_v37  ;;  %vm960_vm8 = vweird.f32 %v4717_v7 }
 0x231   :  { %3675 = vpow2.f32 %v3493_v29  ;;  %v3500_v0 = vmul.f32 -1.442695, %v1082_v48  ;;  %v966_v22 = vand.u32 2147483648, %v4717_v7 }
 0x232   :  { %v3668_v23 = vpop.eup %3667  ;;  %vm946_vm6 = vcmp.eq.f32.partialorder %v945_v47, 8.507059e+37 }
 0x233   :  { %v4723_v57 = vadd.f32 1.0, %v3668_v23  ;;  %v3670_v58 = vpop.eup %3669 }
 0x234   :  { %v4728_v61 = vadd.f32 1.0, %v3670_v58 }
 0x235   :  { %v4725_v59 = vpop.eup %3671  ;;  %3677 = vrcp.f32 %v4723_v57  ;;  %vm1092_vm9 = vweird.f32 %v4723_v57  ;;  %v1096_v26 = vand.u32 2147483647, %v4723_v57  ;;  %v1098_v48 = vand.u32 2147483648, %v4723_v57 }
 0x236   :  { %v4730_v1 = vpop.eup %3673  ;;  %v937_v4 = vmul.f32 %v4725_v59, %v4715_v37  ;;  %3679 = vrcp.f32 %v4728_v61  ;;  %vm942_vm10 = vweird.f32 %v4725_v59  ;;  %v1115_v38 = vand.u32 2147483647, %v4728_v61 }
 0x237   :  { %v956_v6 = vmul.f32 %v4730_v1, %v4717_v7  ;;  %v3676_v13 = vpop.eup %3675  ;;  %3681 = vpow2.f32 %v3500_v0  ;;  %vm961_vm11 = vweird.f32 %v4730_v1  ;;  %vm4762_vm14 = vmor %vm941_vm7, %vm942_vm10  ;;  %vm1111_vm2 = vweird.f32 %v4728_v61 }
 0x238   :  { %v938_v60 = vsub.f32 1.0, %v937_v4  ;;  %3683 = vtanh.f32 %v930_v8  ;;  %v4740_v40 = vadd.f32 1.0, %v3676_v13  ;;  %vm4774_vm1 = vmor %vm960_vm8, %vm961_vm11  ;;  %vm1097_vm3 = vcmp.eq.f32.partialorder %v1096_v26, 8.507059e+37 }
 0x239   :  { %v957_v19 = vsub.f32 1.0, %v956_v6  ;;  %3685 = vtanh.f32 %v1081_v42  ;;  %v1117_v6 = vand.u32 2147483648, %v4728_v61  ;;  %v1099_v42 = vor.u32 1.1754944e-38, %v1098_v48 }
 0x23a   :  { %v939_v63 = vmul.f32 %v4725_v59, %v938_v60  ;;  %3687 = vrcp.f32 %v4740_v40  ;;  %v948_v60 = vor.u32 1.1754944e-38, %v947_v35  ;;  %vm1116_vm5 = vcmp.eq.f32.partialorder %v1115_v38, 8.507059e+37 }
 0x23b   :  { %v3678_v28 = vpop.eup %3677  ;;  %v958_v55 = vmul.f32 %v4730_v1, %v957_v19  ;;  %v964_v19 = vand.u32 2147483647, %v4717_v7  ;;  %v1118_v7 = vor.u32 1.1754944e-38, %v1117_v6 }
 0x23c   :  { %v1088_v27 = vmul.f32 %v3678_v28, %v4723_v57  ;;  %v3680_v14 = vpop.eup %3679  ;;  %vm1093_vm12 = vweird.f32 %v3678_v28  ;;  %v940_v0 = vadd.f32 %v4725_v59, %v939_v63 }
 0x23d   :  { %v1107_v51 = vmul.f32 %v3680_v14, %v4728_v61  ;;  %v3682_v44 = vpop.eup %3681  ;;  %v959_v4 = vadd.f32 %v4730_v1, %v958_v55  ;;  %vm1112_vm15 = vweird.f32 %v3680_v14  ;;  %vm1094_vm0 = vmor %vm1092_vm9, %vm1093_vm12  ;;  %vm965_vm7 = vcmp.eq.f32.partialorder %v964_v19, 8.507059e+37 }
 0x23e   :  { %v1089_v29 = vsub.f32 1.0, %v1088_v27  ;;  %v3684_v58 = vpop.eup %3683  ;;  %v1125_v8 = vadd.f32 1.0, %v3682_v44  ;;  %v944_v57 = vsel %vm4762_vm14, %v4725_v59, %v940_v0  ;;  %vm1113_vm4 = vmor %vm1111_vm2, %vm1112_vm15  ;;  %v967_v44 = vor.u32 1.1754944e-38, %v966_v22 }
 0x23f   :  { %v1108_v23 = vsub.f32 1.0, %v1107_v51  ;;  %v3686_v27 = vpop.eup %3685  ;;  %v949_v26 = vsel %vm946_vm6, %v948_v60, %v944_v57  ;;  %vm980_vm14 = vweird.f32 %v4740_v40 }
 0x240   :  { %v1090_v54 = vmul.f32 %v3678_v28, %v1089_v29  ;;  %3689 = vrcp.f32 %v1125_v8  ;;  %v4779_v63 = vpop.eup %3687  ;;  %v963_v29 = vsel %vm4774_vm1, %v4730_v1, %v959_v4  ;;  %v991_v22 = vmul.f32 %v3684_v58, %v949_v26 }
 0x241   :  { %v1109_v13 = vmul.f32 %v3680_v14, %v1108_v23  ;;  %v968_v23 = vsel %vm965_vm7, %v967_v44, %v963_v29  ;;  %v976_v59 = vmul.f32 %v4779_v63, %v4740_v40  ;;  %v1137_v10 = vand.u32 2147483648, %v1125_v8  ;;  %v4821_v29 = vld [vmem:[#allocation5 + $0x60] sm:$0xff]  ;;  %v4827_v44 = vld [vmem:[#allocation5 + $0x70] sm:$0xff] }
 0x242   :  { %v1091_v62 = vadd.f32 %v3678_v28, %v1090_v54  ;;  %v990_v6 = vmul.f32 %v968_v23, %v4638_v30  ;;  %vm1131_vm9 = vweird.f32 %v1125_v8  ;;  %vm981_vm12 = vweird.f32 %v4779_v63  ;;  %v4841_v23 = vld [vmem:[#allocation5 + $0x20] sm:$0xff] }
 0x243   :  { %v1110_v35 = vadd.f32 %v3680_v14, %v1109_v13  ;;  %v1138_v19 = vor.u32 1.1754944e-38, %v1137_v10  ;;  %vm4814_vm15 = vmor %vm980_vm14, %vm981_vm12  ;;  %v4886_v10 = vld [vmem:[#allocation8 + $0x58] sm:$0xff] }
 0x244   :  { %v1095_v55 = vsel %vm1094_vm0, %v3678_v28, %v1091_v62  ;;  %v1135_v62 = vand.u32 2147483647, %v1125_v8  ;;  %v4795_v38 = vadd.f32 %v991_v22, %v990_v6  ;;  %v4871_v6 = vld [vmem:[#allocation8 + $0x70] sm:$0xff]  ;;  %v4874_v22 = vld [vmem:[#allocation8 + $0x78] sm:$0xff] }
 0x245   :  { %v1100_v51 = vsel %vm1097_vm3, %v1099_v42, %v1095_v55  ;;  %v1114_v48 = vsel %vm1113_vm4, %v3680_v14, %v1110_v35  ;;  %v977_v14 = vsub.f32 1.0, %v976_v59  ;;  %v986_v55 = vand.u32 2147483648, %v4740_v40  ;;  %v4847_v59 = vld [vmem:[#allocation5 + $0x30] sm:$0xff] }
 0x246   :  { %v1142_v61 = vmul.f32 %v3686_v27, %v1100_v51  ;;  %v1119_v28 = vsel %vm1116_vm5, %v1118_v7, %v1114_v48  ;;  %v3690_v0 = vpop.eup %3689  ;;  %vm1136_vm11 = vcmp.eq.f32.partialorder %v1135_v62, 8.507059e+37  ;;  %v4824_v7 = vld [vmem:[#allocation5 + $0x68] sm:$0xff]  ;;  %v4831_v48 = vld [vmem:[#allocation5 + $0x40] sm:$0xff] }
 0x247   :  { %v1141_v54 = vmul.f32 %v1119_v28, %v4635_v41  ;;  %v1127_v4 = vmul.f32 %v3690_v0, %v1125_v8  ;;  %vm1132_vm8 = vweird.f32 %v3690_v0  ;;  %v978_v60 = vmul.f32 %v4779_v63, %v977_v14  ;;  %v4837_v28 = vld [vmem:[#allocation5 + $0x50] sm:$0xff]  ;;  %v4877_v14 = vld [vmem:[#allocation8 + $0x40] sm:$0xff]  ;;  %v4900_v62 = vld [vmem:[#allocation8 + $0x28] sm:$0xff] }
 0x248   :  { %vm1133_vm10 = vmor %vm1131_vm9, %vm1132_vm8  ;;  %v984_v8 = vand.u32 2147483647, %v4740_v40  ;;  %v987_v51 = vor.u32 1.1754944e-38, %v986_v55 }
 0x249   :  { %v4791_v1 = vadd.f32 %v1142_v61, %v1141_v54  ;;  %v1128_v47 = vsub.f32 1.0, %v1127_v4  ;;  %v979_v37 = vadd.f32 %v4779_v63, %v978_v60  ;;  %v4858_v54 = vld [vmem:[#allocation5 + $0x8] sm:$0xff]  ;;  %v4903_v60 = vld [vmem:[#allocation8 + $0x30] sm:$0xff] }
 0x24a   :  { %vm985_vm0 = vcmp.eq.f32.partialorder %v984_v8, 8.507059e+37  ;;  %v4868_v4 = vld [vmem:[#allocation8 + $0x68] sm:$0xff] }
 0x24b   :  { %3691 = vtanh.f32 %v4791_v1  ;;  %v1129_v13 = vmul.f32 %v3690_v0, %v1128_v47  ;;  %v983_v57 = vsel %vm4814_vm15, %v4779_v63, %v979_v37  ;;  %v4834_v63 = vld [vmem:[#allocation5 + $0x48] sm:$0xff]  ;;  %v4883_v47 = vld [vmem:[#allocation8 + $0x50] sm:$0xff] }
 0x24c   :  { %3693 = vtanh.f32 %v4795_v38  ;;  %v988_v61 = vsel %vm985_vm0, %v987_v51, %v983_v57 }
 0x24d   :  { %v1130_v41 = vadd.f32 %v3690_v0, %v1129_v13  ;;  %v4897_v13 = vld [vmem:[#allocation8 + $0x20] sm:$0xff] }
 0x24f   :  { %v1134_v27 = vsel %vm1133_vm10, %v3690_v0, %v1130_v41  ;;  %v4861_v0 = vld [vmem:[#allocation5 + $0x10] sm:$0xff]  ;;  %v4906_v41 = vld [vmem:[#allocation8 + $0x38] sm:$0xff] }
 0x250   :  { %v1139_v30 = vsel %vm1136_vm11, %v1138_v19, %v1134_v27  ;;  %v4909_v19 = vld [vmem:[#allocation8] sm:$0xff]  ;;  %v4915_v27 = vld [vmem:[#allocation8 + $0x10] sm:$0xff] }
 0x251   :  { %v3692_v42 = vpop.eup %3691  ;;  %5907 = vst [vmem:[#allocation52_spill] sm:$0xff] %v4915_v27 }
 0x252   :  { %v4799_v58 = vmul.f32 %v3692_v42, %v1139_v30  ;;  %v3694_v40 = vpop.eup %3693  ;;  %v4912_v42 = vld [vmem:[#allocation8 + $0x8] sm:$0xff]  ;;  %v4918_v30 = vld [vmem:[#allocation8 + $0x18] sm:$0xff] }
 0x253   :  { %v994_v26 = vmul.f32 %v3694_v40, %v988_v61  ;;  %5908 = vst [vmem:[#allocation53_spill] sm:$0xff] %v4918_v30 }
 0x254   :  { %3501 = vmatmul.msk.f32.vlgmr.msrb.gmra.mxu0 %vm464_vm13, %v4799_v58  ;;  %3502 = vmatmul.msk.f32.vlgmr.msrb.gmra.mxu1 %vm464_vm13, %v4799_v58 }
 0x255   :  { %3503 = vmatmul.msk.f32.vlgmr.msra.gmra.mxu2 %vm464_vm13, %v4799_v58  ;;  %3504 = vmatmul.msk.f32.vlgmr.msra.gmra.mxu3 %vm464_vm13, %v4799_v58 }
 0x256   :  { %1395 = vmatpush.msrb.mxu0 %v4821_v29  ;;  %1415 = vmatpush.msrb.mxu1 %v4824_v7 }
 0x257   :  { %1435 = vmatpush.msra.mxu2 %v4827_v44  ;;  %1455 = vmatpush.msra.mxu3 %v4407_v43  ;;  %v4844_v43 = vld [vmem:[#allocation5 + $0x28] sm:$0xff] }
 0x258   :  { %1396 = vmatpush.msrb.mxu0 %v4831_v48  ;;  %1416 = vmatpush.msrb.mxu1 %v4834_v63 }
 0x259   :  { %1436 = vmatpush.msra.mxu2 %v4837_v28  ;;  %1456 = vmatpush.msra.mxu3 %v4415_v56  ;;  %v4855_v56 = vld [vmem:[#allocation5] sm:$0xff] }
 0x25a   :  { %1397 = vmatpush.msrb.mxu0 %v4841_v23  ;;  %1417 = vmatpush.msrb.mxu1 %v4844_v43 }
 0x25b   :  { %1437 = vmatpush.msra.mxu2 %v4847_v59  ;;  %1457 = vmatpush.msra.mxu3 %v4419_v17  ;;  %v4865_v17 = vld [vmem:[#allocation8 + $0x60] sm:$0xff] }
 0x25c   :  { %3505 = vmatmul.msk.f32.vlgmr.msra.gmra.mxu0 %vm464_vm13, %v994_v26  ;;  %3506 = vmatmul.msk.f32.vlgmr.msra.gmra.mxu1 %vm464_vm13, %v994_v26 }
 0x25d   :  { %3507 = vmatmul.msk.f32.vlgmr.msrb.gmra.mxu2 %vm464_vm13, %v994_v26  ;;  %3508 = vmatmul.msk.f32.vlgmr.msrb.gmra.mxu3 %vm464_vm13, %v994_v26 }
 0x25e   :  { %1398 = vmatpush.msrb.mxu0 %v4855_v56  ;;  %1418 = vmatpush.msrb.mxu1 %v4858_v54 }
 0x25f   :  { %1438 = vmatpush.msra.mxu2 %v4861_v0  ;;  %1458 = vmatpush.msra.mxu3 %v4426_v49  ;;  %v4880_v49 = vld [vmem:[#allocation8 + $0x48] sm:$0xff] }
 0x260   :  { %1545 = vmatpush.msra.mxu0 %v4865_v17  ;;  %1565 = vmatpush.msra.mxu1 %v4868_v4 }
 0x261   :  { %1585 = vmatpush.msrb.mxu2 %v4871_v6  ;;  %1605 = vmatpush.msrb.mxu3 %v4874_v22 }
 0x262   :  { %1546 = vmatpush.msra.mxu0 %v4877_v14  ;;  %1566 = vmatpush.msra.mxu1 %v4880_v49 }
 0x263   :  { %1586 = vmatpush.msrb.mxu2 %v4883_v47  ;;  %1606 = vmatpush.msrb.mxu3 %v4886_v10 }
 0x264   :  { %3512 = vmatmul.msk.f32.vlgmr.msrb.gmra.mxu0 %vm464_vm13, %v4799_v58  ;;  %3513 = vmatmul.msk.f32.vlgmr.msrb.gmra.mxu1 %vm464_vm13, %v4799_v58 }
 0x265   :  { %3514 = vmatmul.msk.f32.vlgmr.msra.gmra.mxu2 %vm464_vm13, %v4799_v58  ;;  %3515 = vmatmul.msk.f32.vlgmr.msra.gmra.mxu3 %vm464_vm13, %v4799_v58 }
 0x266   :  { %1547 = vmatpush.msra.mxu0 %v4897_v13  ;;  %1567 = vmatpush.msra.mxu1 %v4900_v62 }
 0x267   :  { %1587 = vmatpush.msrb.mxu2 %v4903_v60  ;;  %1607 = vmatpush.msrb.mxu3 %v4906_v41 }
 0x268   :  { %1548 = vmatpush.msra.mxu0 %v4909_v19  ;;  %1568 = vmatpush.msra.mxu1 %v4912_v42 }
 0x269   :  { %1588 = vmatpush.msrb.mxu2 %v4915_v27  ;;  %1608 = vmatpush.msrb.mxu3 %v4918_v30 }
 0x26a   :  { %1628 = vmatpush.msrb.mxu0 %v4510_v3  ;;  %1648 = vmatpush.msrb.mxu1 %v4512_v11 }
 0x26b   :  { %1668 = vmatpush.msra.mxu2 %v5878_v16  ;;  %1688 = vmatpush.msra.mxu3 %v5879_v18 }
 0x26c   :  { %1629 = vmatpush.msrb.mxu0 %v5880_v20  ;;  %1649 = vmatpush.msrb.mxu1 %v5881_v24 }
 0x26d   :  { %1669 = vmatpush.msra.mxu2 %v5882_v25  ;;  %1689 = vmatpush.msra.mxu3 %v5883_v33 }
 0x26e   :  { %1630 = vmatpush.msrb.mxu0 %v5884_v34  ;;  %1650 = vmatpush.msrb.mxu1 %v5885_v46  ;;  %v5909_v46 = vld [vmem:[#allocation24_spill] sm:$0xff] }
 0x26f   :  { %1670 = vmatpush.msra.mxu2 %v4552_v31  ;;  %1690 = vmatpush.msra.mxu3 %v4554_v36 }
 0x270   :  { %1631 = vmatpush.msrb.mxu0 %v4556_v21  ;;  %1651 = vmatpush.msrb.mxu1 %v5886_v50  ;;  %v166_v50 = vadd.f32 %v5909_v46, %v5891_v12 }
 0x271   :  { %1671 = vmatpush.msra.mxu2 %v5887_v52  ;;  %1691 = vmatpush.msra.mxu3 %v5888_v53  ;;  %v5910_v52 = vld [vmem:[#allocation39_spill] sm:$0xff] }
 0x272   :  { %v207_v53 = vadd.f32 %v5910_v52, %v5893_v45 }
 0x2d1   :  { %v1166_v3 = vpop.f32.mrf.mxu0  ;;  %v1186_v11 = vpop.f32.mrf.mxu1 }
 0x2d8   :  { %v1226_v16 = vpop.f32.mrf.mxu3  ;;  %v1206_v36 = vpop.f32.mrf.mxu2 }
 0x2d9   :  { %v1249_v18 = vpop.f32.mrf.mxu0  ;;  %v1269_v20 = vpop.f32.mrf.mxu1 }
 0x2da   :  { %v1250_v24 = vadd.f32 %v1249_v18, %v1166_v3  ;;  %v1270_v25 = vadd.f32 %v1269_v20, %v1186_v11 }
 0x2dc   :  { %v1312_v33 = vadd.f32 %v1250_v24, %v5889_v2  ;;  %v1313_v31 = vadd.f32 %v1270_v25, %v5890_v5 }
 0x2de   :  { %v3509_v34 = vmul.f32 -1.442695, %v1312_v33  ;;  %v3510_v21 = vmul.f32 -1.442695, %v1313_v31 }
 0x2e0   :  { %3695 = vpow2.f32 %v3509_v34  ;;  %v1309_v58 = vpop.f32.mrf.mxu3  ;;  %v1289_v18 = vpop.f32.mrf.mxu2 }
 0x2e1   :  { %3697 = vpow2.f32 %v3510_v21  ;;  %v1310_v37 = vadd.f32 %v1309_v58, %v1226_v16  ;;  %v1400_v55 = vpop.f32.mrf.mxu0  ;;  %v1420_v8 = vpop.f32.mrf.mxu1  ;;  %v5911_v16 = vld [vmem:[#allocation38_spill] sm:$0xff]  ;;  %v1290_v21 = vadd.f32 %v1289_v18, %v1206_v36 }
 0x2e2   :  { %v1463_v35 = vadd.f32 %v1400_v55, %v166_v50  ;;  %v1464_v57 = vadd.f32 %v1420_v8, %v207_v53  ;;  %v289_v33 = vadd.f32 %v5911_v16, %v5896_v39 }
 0x2e3   :  { %v1315_v40 = vadd.f32 %v1310_v37, %v5895_v32  ;;  %v1314_v36 = vadd.f32 %v1290_v21, %v5898_v9 }
 0x2e4   :  { %v3516_v51 = vmul.f32 -1.442695, %v1463_v35  ;;  %v3517_v61 = vmul.f32 -1.442695, %v1464_v57 }
 0x2e5   :  { %v3511_v24 = vmul.f32 -1.442695, %v1315_v40  ;;  %v5912_v40 = vld [vmem:[#allocation32_spill] sm:$0xff] }
 0x2e6   :  { %v3696_v26 = vpop.eup %3695  ;;  %3699 = vpow2.f32 %v3516_v51  ;;  %v248_v51 = vadd.f32 %v5912_v40, %v5899_v15 }
 0x2e7   :  { %v3698_v3 = vpop.eup %3697  ;;  %v4944_v11 = vadd.f32 1.0, %v3696_v26  ;;  %3701 = vpow2.f32 %v3517_v61 }
 0x2e8   :  { %v4946_v20 = vadd.f32 1.0, %v3698_v3  ;;  %v1460_v25 = vpop.f32.mrf.mxu3  ;;  %v1440_v35 = vpop.f32.mrf.mxu2 }
 0x2e9   :  { %3703 = vrcp.f32 %v4944_v11  ;;  %v1466_v31 = vadd.f32 %v1460_v25, %v289_v33  ;;  %v1465_v3 = vadd.f32 %v1440_v35, %v248_v51  ;;  %vm1325_vm1 = vweird.f32 %v4944_v11 }
 0x2ea   :  { %3705 = vrcp.f32 %v4946_v20  ;;  %v1329_v25 = vand.u32 2147483647, %v4944_v11  ;;  %v1331_v16 = vand.u32 2147483648, %v4944_v11  ;;  %vm1344_vm2 = vweird.f32 %v4946_v20 }
 0x2eb   :  { %3707 = vpow2.f32 %v3511_v24  ;;  %v3518_v58 = vmul.f32 -1.442695, %v1466_v31  ;;  %v1350_v21 = vand.u32 2147483648, %v4946_v20  ;;  %v1348_v32 = vand.u32 2147483647, %v4946_v20 }
 0x2ec   :  { %v3700_v34 = vpop.eup %3699  ;;  %vm1330_vm0 = vcmp.eq.f32.partialorder %v1329_v25, 8.507059e+37 }
 0x2ed   :  { %v4952_v46 = vadd.f32 1.0, %v3700_v34  ;;  %v3702_v50 = vpop.eup %3701  ;;  %v1351_v45 = vor.u32 1.1754944e-38, %v1350_v21 }
 0x2ee   :  { %v4957_v53 = vadd.f32 1.0, %v3702_v50 }
 0x2ef   :  { %v4954_v52 = vpop.eup %3703  ;;  %3709 = vrcp.f32 %v4952_v46  ;;  %vm1476_vm3 = vweird.f32 %v4952_v46  ;;  %v1482_v35 = vand.u32 2147483648, %v4952_v46 }
 0x2f0   :  { %v4959_v37 = vpop.eup %3705  ;;  %v1321_v55 = vmul.f32 %v4954_v52, %v4944_v11  ;;  %3711 = vrcp.f32 %v4957_v53  ;;  %vm1326_vm4 = vweird.f32 %v4954_v52  ;;  %vm1495_vm11 = vweird.f32 %v4957_v53 }
 0x2f1   :  { %v1340_v8 = vmul.f32 %v4959_v37, %v4946_v20  ;;  %v3708_v57 = vpop.eup %3707  ;;  %3713 = vpow2.f32 %v3518_v58  ;;  %vm1345_vm5 = vweird.f32 %v4959_v37  ;;  %vm4991_vm7 = vmor %vm1325_vm1, %vm1326_vm4  ;;  %vm1349_vm1 = vcmp.eq.f32.partialorder %v1348_v32, 8.507059e+37 }
 0x2f2   :  { %v1322_v61 = vsub.f32 1.0, %v1321_v55  ;;  %3715 = vtanh.f32 %v1314_v36  ;;  %v4969_v24 = vadd.f32 1.0, %v3708_v57  ;;  %v1480_v36 = vand.u32 2147483647, %v4952_v46  ;;  %vm5003_vm10 = vmor %vm1344_vm2, %vm1345_vm5 }
 0x2f3   :  { %v1341_v26 = vsub.f32 1.0, %v1340_v8  ;;  %3717 = vtanh.f32 %v1465_v3  ;;  %v1501_v3 = vand.u32 2147483648, %v4957_v53 }
 0x2f4   :  { %v1323_v50 = vmul.f32 %v4954_v52, %v1322_v61  ;;  %3719 = vrcp.f32 %v4969_v24  ;;  %vm1481_vm12 = vcmp.eq.f32.partialorder %v1480_v36, 8.507059e+37 }
 0x2f5   :  { %v3710_v18 = vpop.eup %3709  ;;  %v1342_v34 = vmul.f32 %v4959_v37, %v1341_v26  ;;  %v1502_v20 = vor.u32 1.1754944e-38, %v1501_v3 }
 0x2f6   :  { %v1472_v33 = vmul.f32 %v3710_v18, %v4952_v46  ;;  %v3712_v31 = vpop.eup %3711  ;;  %vm1477_vm6 = vweird.f32 %v3710_v18  ;;  %v1324_v61 = vadd.f32 %v4954_v52, %v1323_v50 }
 0x2f7   :  { %v1491_v55 = vmul.f32 %v3712_v31, %v4957_v53  ;;  %v3714_v8 = vpop.eup %3713  ;;  %v1343_v26 = vadd.f32 %v4959_v37, %v1342_v34  ;;  %vm1496_vm8 = vweird.f32 %v3712_v31  ;;  %vm1478_vm9 = vmor %vm1476_vm3, %vm1477_vm6  ;;  %v1483_v34 = vor.u32 1.1754944e-38, %v1482_v35 }
 0x2f8   :  { %v1473_v58 = vsub.f32 1.0, %v1472_v33  ;;  %v3716_v51 = vpop.eup %3715  ;;  %v1509_v33 = vadd.f32 1.0, %v3714_v8  ;;  %v1328_v46 = vsel %vm4991_vm7, %v4954_v52, %v1324_v61  ;;  %vm1497_vm14 = vmor %vm1495_vm11, %vm1496_vm8  ;;  %vm1364_vm7 = vweird.f32 %v4969_v24 }
 0x2f9   :  { %v1492_v57 = vsub.f32 1.0, %v1491_v55  ;;  %v1332_v55 = vor.u32 1.1754944e-38, %v1331_v16  ;;  %v3718_v50 = vpop.eup %3717  ;;  %v1347_v35 = vsel %vm5003_vm10, %v4959_v37, %v1343_v26 }
 0x2fa   :  { %v1474_v40 = vmul.f32 %v3710_v18, %v1473_v58  ;;  %v1499_v58 = vand.u32 2147483647, %v4957_v53  ;;  %3721 = vrcp.f32 %v1509_v33  ;;  %v1521_v32 = vand.u32 2147483648, %v1509_v33 }
 0x2fb   :  { %v1493_v9 = vmul.f32 %v3712_v31, %v1492_v57  ;;  %v5008_v57 = vpop.eup %3719  ;;  %v1333_v53 = vsel %vm1330_vm0, %v1332_v55, %v1328_v46  ;;  %vm1515_vm3 = vweird.f32 %v1509_v33 }
 0x2fc   :  { %v1475_v39 = vadd.f32 %v3710_v18, %v1474_v40  ;;  %vm1500_vm15 = vcmp.eq.f32.partialorder %v1499_v58, 8.507059e+37  ;;  %v1360_v15 = vmul.f32 %v5008_v57, %v4969_v24  ;;  %v1375_v21 = vmul.f32 %v3716_v51, %v1333_v53  ;;  %v5086_v53 = vld [vmem:[#allocation10 + $0x60] sm:$0xff] }
 0x2fd   :  { %v1494_v16 = vadd.f32 %v3712_v31, %v1493_v9  ;;  %v1522_v55 = vor.u32 1.1754944e-38, %v1521_v32  ;;  %vm1365_vm6 = vweird.f32 %v5008_v57  ;;  %5917 = vst [vmem:[#allocation54_spill] sm:$0xff] %v5086_v53  ;;  %v5116_v32 = vld [vmem:[#allocation10 + $0x30] sm:$0xff] }
 0x2fe   :  { %v1479_v8 = vsel %vm1478_vm9, %v3710_v18, %v1475_v39  ;;  %v1352_v18 = vsel %vm1349_vm1, %v1351_v45, %v1347_v35  ;;  %v1519_v45 = vand.u32 2147483647, %v1509_v33  ;;  %vm1366_vm8 = vmor %vm1364_vm7, %vm1365_vm6  ;;  %5927 = vst [vmem:[#allocation37_spill] sm:$0xff] %v5116_v32 }
 0x2ff   :  { %v1484_v40 = vsel %vm1481_vm12, %v1483_v34, %v1479_v8  ;;  %v1498_v12 = vsel %vm1497_vm14, %v3712_v31, %v1494_v16  ;;  %v1374_v26 = vmul.f32 %v1352_v18, %v4795_v38  ;;  %v1361_v31 = vsub.f32 1.0, %v1360_v15  ;;  %v5089_v18 = vld [vmem:[#allocation10 + $0x68] sm:$0xff]  ;;  %v5092_v15 = vld [vmem:[#allocation10 + $0x70] sm:$0xff] }
 0x300   :  { %v1526_v39 = vmul.f32 %v3718_v50, %v1484_v40  ;;  %v1503_v9 = vsel %vm1500_vm15, %v1502_v20, %v1498_v12  ;;  %v3722_v36 = vpop.eup %3721  ;;  %vm1520_vm5 = vcmp.eq.f32.partialorder %v1519_v45, 8.507059e+37  ;;  %v1370_v8 = vand.u32 2147483648, %v4969_v24  ;;  %v5041_v20 = vld [vmem:[#allocation5 + $0x78] sm:$0xff]  ;;  %5918 = vst [vmem:[#allocation55_spill] sm:$0xff] %v5089_v18  ;;  %v5122_v45 = vld [vmem:[#allocation10] sm:$0xff] }
 0x301   :  { %v1525_v52 = vmul.f32 %v1503_v9, %v4791_v1  ;;  %v1511_v61 = vmul.f32 %v3722_v36, %v1509_v33  ;;  %vm1516_vm2 = vweird.f32 %v3722_v36  ;;  %v5024_v3 = vadd.f32 %v1375_v21, %v1374_v26  ;;  %v5063_v9 = vld [vmem:[#allocation5 + $0x18] sm:$0xff]  ;;  %5919 = vst [vmem:[#allocation56_spill] sm:$0xff] %v5092_v15  ;;  %v5104_v26 = vld [vmem:[#allocation10 + $0x50] sm:$0xff] }
 0x302   :  { %v1362_v58 = vmul.f32 %v5008_v57, %v1361_v31  ;;  %vm1517_vm4 = vmor %vm1515_vm3, %vm1516_vm2  ;;  %v1368_v33 = vand.u32 2147483647, %v4969_v24  ;;  %v1371_v35 = vor.u32 1.1754944e-38, %v1370_v8  ;;  %5923 = vst [vmem:[#allocation60_spill] sm:$0xff] %v5104_v26  ;;  %v5107_v21 = vld [vmem:[#allocation10 + $0x58] sm:$0xff]  ;;  %v5110_v31 = vld [vmem:[#allocation10 + $0x20] sm:$0xff] }
 0x303   :  { %v5020_v37 = vadd.f32 %v1526_v39, %v1525_v52  ;;  %v1512_v25 = vsub.f32 1.0, %v1511_v61  ;;  %v5053_v39 = vld [vmem:[#allocation5 + $0x38] sm:$0xff]  ;;  %v5101_v61 = vld [vmem:[#allocation10 + $0x48] sm:$0xff]  ;;  %5924 = vst [vmem:[#allocation61_spill] sm:$0xff] %v5107_v21 }
 0x304   :  { %v1363_v11 = vadd.f32 %v5008_v57, %v1362_v58  ;;  %vm1369_vm9 = vcmp.eq.f32.partialorder %v1368_v33, 8.507059e+37  ;;  %v5095_v52 = vld [vmem:[#allocation10 + $0x78] sm:$0xff]  ;;  %5922 = vst [vmem:[#allocation59_spill] sm:$0xff] %v5101_v61  ;;  %v5125_v58 = vld [vmem:[#allocation10 + $0x8] sm:$0xff] }
 0x305   :  { %3723 = vtanh.f32 %v5020_v37  ;;  %v1513_v12 = vmul.f32 %v3722_v36, %v1512_v25  ;;  %5920 = vst [vmem:[#allocation57_spill] sm:$0xff] %v5095_v52  ;;  %v5113_v25 = vld [vmem:[#allocation10 + $0x28] sm:$0xff] }
 0x306   :  { %3725 = vtanh.f32 %v5024_v3  ;;  %v1367_v16 = vsel %vm1366_vm8, %v5008_v57, %v1363_v11  ;;  %v5047_v57 = vld [vmem:[#allocation5 + $0x58] sm:$0xff]  ;;  %5925 = vst [vmem:[#allocation62_spill] sm:$0xff] %v5110_v31 }
 0x307   :  { %v1514_v1 = vadd.f32 %v3722_v36, %v1513_v12  ;;  %v1372_v24 = vsel %vm1369_vm9, %v1371_v35, %v1367_v16  ;;  %5926 = vst [vmem:[#allocation20_spill] sm:$0xff] %v5113_v25  ;;  %v5119_v12 = vld [vmem:[#allocation10 + $0x38] sm:$0xff] }
 0x308   :  { %5928 = vst [vmem:[#allocation36_spill] sm:$0xff] %v5119_v12 }
 0x309   :  { %v1518_v50 = vsel %vm1517_vm4, %v3722_v36, %v1514_v1  ;;  %v5098_v36 = vld [vmem:[#allocation10 + $0x40] sm:$0xff]  ;;  %5929 = vst [vmem:[#allocation31_spill] sm:$0xff] %v5122_v45  ;;  %v5128_v1 = vld [vmem:[#allocation10 + $0x10] sm:$0xff] }
 0x30a   :  { %v1523_v38 = vsel %vm1520_vm5, %v1522_v55, %v1518_v50  ;;  %5921 = vst [vmem:[#allocation58_spill] sm:$0xff] %v5098_v36  ;;  %v5131_v55 = vld [vmem:[#allocation10 + $0x18] sm:$0xff] }
 0x30b   :  { %v3724_v34 = vpop.eup %3723  ;;  %5930 = vst [vmem:[#allocation24_spill] sm:$0xff] %v5125_v58 }
 0x30c   :  { %v1529_v51 = vmul.f32 %v3724_v34, %v1523_v38  ;;  %v3726_v46 = vpop.eup %3725  ;;  %5931 = vst [vmem:[#allocation39_spill] sm:$0xff] %v5128_v1 }
 0x30d   :  { %v1378_v40 = vmul.f32 %v3726_v46, %v1372_v24  ;;  %5932 = vst [vmem:[#allocation38_spill] sm:$0xff] %v5131_v55 }
 0x30e   :  { %3519 = vmatmul.msk.f32.vlgmr.msra.gmra.mxu0 %vm464_vm13, %v1529_v51  ;;  %3520 = vmatmul.msk.f32.vlgmr.msra.gmra.mxu1 %vm464_vm13, %v1529_v51 }
 0x30f   :  { %3521 = vmatmul.msk.f32.vlgmr.msrb.gmra.mxu2 %vm464_vm13, %v1529_v51  ;;  %3522 = vmatmul.msk.f32.vlgmr.msrb.gmra.mxu3 %vm464_vm13, %v1529_v51 }
 0x310   :  { %1779 = vmatpush.msra.mxu0 %v4821_v29  ;;  %1799 = vmatpush.msra.mxu1 %v4824_v7 }
 0x311   :  { %1819 = vmatpush.msrb.mxu2 %v4827_v44  ;;  %1839 = vmatpush.msrb.mxu3 %v5041_v20 }
 0x312   :  { %1780 = vmatpush.msra.mxu0 %v4831_v48  ;;  %1800 = vmatpush.msra.mxu1 %v4834_v63 }
 0x313   :  { %1820 = vmatpush.msrb.mxu2 %v4837_v28  ;;  %1840 = vmatpush.msrb.mxu3 %v5047_v57 }
 0x314   :  { %1781 = vmatpush.msra.mxu0 %v4841_v23  ;;  %1801 = vmatpush.msra.mxu1 %v4844_v43 }
 0x315   :  { %1821 = vmatpush.msrb.mxu2 %v4847_v59  ;;  %1841 = vmatpush.msrb.mxu3 %v5053_v39 }
 0x316   :  { %3523 = vmatmul.msk.f32.vlgmr.msrb.gmra.mxu0 %vm464_vm13, %v1378_v40  ;;  %3524 = vmatmul.msk.f32.vlgmr.msrb.gmra.mxu1 %vm464_vm13, %v1378_v40 }
 0x317   :  { %3525 = vmatmul.msk.f32.vlgmr.msra.gmra.mxu2 %vm464_vm13, %v1378_v40  ;;  %3526 = vmatmul.msk.f32.vlgmr.msra.gmra.mxu3 %vm464_vm13, %v1378_v40 }
 0x318   :  { %1782 = vmatpush.msra.mxu0 %v4855_v56  ;;  %1802 = vmatpush.msra.mxu1 %v4858_v54 }
 0x319   :  { %1822 = vmatpush.msrb.mxu2 %v4861_v0  ;;  %1842 = vmatpush.msrb.mxu3 %v5063_v9 }
 0x31a   :  { %1929 = vmatpush.msrb.mxu0 %v4865_v17  ;;  %1949 = vmatpush.msrb.mxu1 %v4868_v4 }
 0x31b   :  { %1969 = vmatpush.msra.mxu2 %v4871_v6  ;;  %1989 = vmatpush.msra.mxu3 %v4874_v22 }
 0x31c   :  { %1930 = vmatpush.msrb.mxu0 %v4877_v14  ;;  %1950 = vmatpush.msrb.mxu1 %v4880_v49 }
 0x31d   :  { %1970 = vmatpush.msra.mxu2 %v4883_v47  ;;  %1990 = vmatpush.msra.mxu3 %v4886_v10 }
 0x31e   :  { %3530 = vmatmul.msk.f32.vlgmr.msra.gmra.mxu0 %vm464_vm13, %v1529_v51  ;;  %3531 = vmatmul.msk.f32.vlgmr.msra.gmra.mxu1 %vm464_vm13, %v1529_v51 }
 0x31f   :  { %3532 = vmatmul.msk.f32.vlgmr.msrb.gmra.mxu2 %vm464_vm13, %v1529_v51  ;;  %3533 = vmatmul.msk.f32.vlgmr.msrb.gmra.mxu3 %vm464_vm13, %v1529_v51 }
 0x320   :  { %1931 = vmatpush.msrb.mxu0 %v4897_v13  ;;  %1951 = vmatpush.msrb.mxu1 %v4900_v62 }
 0x321   :  { %1971 = vmatpush.msra.mxu2 %v4903_v60  ;;  %1991 = vmatpush.msra.mxu3 %v4906_v41 }
 0x322   :  { %1932 = vmatpush.msrb.mxu0 %v4909_v19  ;;  %1952 = vmatpush.msrb.mxu1 %v4912_v42 }
 0x323   :  { %1972 = vmatpush.msra.mxu2 %v4915_v27  ;;  %1992 = vmatpush.msra.mxu3 %v4918_v30 }
 0x324   :  { %2012 = vmatpush.msra.mxu0 %v5086_v53  ;;  %2032 = vmatpush.msra.mxu1 %v5089_v18 }
 0x325   :  { %2052 = vmatpush.msrb.mxu2 %v5092_v15  ;;  %2072 = vmatpush.msrb.mxu3 %v5095_v52 }
 0x326   :  { %2013 = vmatpush.msra.mxu0 %v5098_v36  ;;  %2033 = vmatpush.msra.mxu1 %v5101_v61 }
 0x327   :  { %2053 = vmatpush.msrb.mxu2 %v5104_v26  ;;  %2073 = vmatpush.msrb.mxu3 %v5107_v21 }
 0x328   :  { %2014 = vmatpush.msra.mxu0 %v5110_v31  ;;  %2034 = vmatpush.msra.mxu1 %v5113_v25 }
 0x329   :  { %2054 = vmatpush.msrb.mxu2 %v5116_v32  ;;  %2074 = vmatpush.msrb.mxu3 %v5119_v12  ;;  %v5935_v12 = vld [vmem:[#allocation21_spill] sm:$0xff] }
 0x32a   :  { %2015 = vmatpush.msra.mxu0 %v5122_v45  ;;  %2035 = vmatpush.msra.mxu1 %v5125_v58  ;;  %v5933_v58 = vld [vmem:[#allocation22_spill] sm:$0xff]  ;;  %v5936_v32 = vld [vmem:[#allocation41_spill] sm:$0xff] }
 0x32b   :  { %2055 = vmatpush.msrb.mxu2 %v5128_v1  ;;  %2075 = vmatpush.msrb.mxu3 %v5131_v55  ;;  %v5934_v1 = vld [vmem:[#allocation26_spill] sm:$0xff]  ;;  %v210_v55 = vadd.f32 %v5936_v32, %v5935_v12 }
 0x32c   :  { %v169_v45 = vadd.f32 %v5934_v1, %v5933_v58 }
 0x38b   :  { %v1550_v34 = vpop.f32.mrf.mxu0  ;;  %v1570_v50 = vpop.f32.mrf.mxu1 }
 0x392   :  { %v1610_v38 = vpop.f32.mrf.mxu3  ;;  %v1590_v35 = vpop.f32.mrf.mxu2 }
 0x393   :  { %v1633_v51 = vpop.f32.mrf.mxu0  ;;  %v1653_v11 = vpop.f32.mrf.mxu1 }
 0x394   :  { %v1634_v8 = vadd.f32 %v1633_v51, %v1550_v34  ;;  %v1654_v33 = vadd.f32 %v1653_v11, %v1570_v50  ;;  %v5937_v11 = vld [vmem:[#allocation50_spill] sm:$0xff] }
 0x396   :  { %v1696_v16 = vadd.f32 %v1634_v8, %v5889_v2  ;;  %v1697_v46 = vadd.f32 %v1654_v33, %v5890_v5 }
 0x398   :  { %v3527_v24 = vmul.f32 -1.442695, %v1696_v16  ;;  %v3528_v40 = vmul.f32 -1.442695, %v1697_v46 }
 0x39a   :  { %3727 = vpow2.f32 %v3527_v24  ;;  %v1693_v25 = vpop.f32.mrf.mxu3  ;;  %v1673_v1 = vpop.f32.mrf.mxu2 }
 0x39b   :  { %3729 = vpow2.f32 %v3528_v40  ;;  %v1694_v31 = vadd.f32 %v1693_v25, %v1610_v38  ;;  %v1784_v21 = vpop.f32.mrf.mxu0  ;;  %v1804_v34 = vpop.f32.mrf.mxu1  ;;  %v5938_v25 = vld [vmem:[#allocation25_spill] sm:$0xff]  ;;  %v5939_v38 = vld [vmem:[#allocation40_spill] sm:$0xff] }
 0x39c   :  { %v1847_v50 = vadd.f32 %v1784_v21, %v169_v45  ;;  %v1848_v51 = vadd.f32 %v1804_v34, %v210_v55  ;;  %v292_v40 = vadd.f32 %v5939_v38, %v5938_v25  ;;  %v1674_v45 = vadd.f32 %v1673_v1, %v1590_v35  ;;  %v5942_v38 = vld [vmem:[#allocation33_spill] sm:$0xff] }
 0x39d   :  { %v1699_v8 = vadd.f32 %v1694_v31, %v5937_v11 }
 0x39e   :  { %v3534_v33 = vmul.f32 -1.442695, %v1847_v50  ;;  %v3535_v5 = vmul.f32 -1.442695, %v1848_v51 }
 0x39f   :  { %v3529_v32 = vmul.f32 -1.442695, %v1699_v8 }
 0x3a0   :  { %v3728_v16 = vpop.eup %3727  ;;  %3731 = vpow2.f32 %v3534_v33 }
 0x3a1   :  { %v3730_v46 = vpop.eup %3729  ;;  %v5141_v2 = vadd.f32 1.0, %v3728_v16  ;;  %3733 = vpow2.f32 %v3535_v5 }
 0x3a2   :  { %v5143_v58 = vadd.f32 1.0, %v3730_v46  ;;  %v1844_v24 = vpop.f32.mrf.mxu3  ;;  %v5940_v46 = vld [vmem:[#allocation51_spill] sm:$0xff]  ;;  %v1824_v1 = vpop.f32.mrf.mxu2 }
 0x3a3   :  { %3735 = vrcp.f32 %v5141_v2  ;;  %v1850_v21 = vadd.f32 %v1844_v24, %v292_v40  ;;  %v1698_v35 = vadd.f32 %v1674_v45, %v5940_v46  ;;  %v5941_v24 = vld [vmem:[#allocation30_spill] sm:$0xff]  ;;  %vm1709_vm10 = vweird.f32 %v5141_v2 }
 0x3a4   :  { %3737 = vrcp.f32 %v5143_v58  ;;  %v251_v40 = vadd.f32 %v5942_v38, %v5941_v24  ;;  %v1713_v12 = vand.u32 2147483647, %v5141_v2  ;;  %v1715_v45 = vand.u32 2147483648, %v5141_v2 }
 0x3a5   :  { %3739 = vpow2.f32 %v3529_v32  ;;  %v3536_v51 = vmul.f32 -1.442695, %v1850_v21  ;;  %vm1728_vm11 = vweird.f32 %v5143_v58  ;;  %v1732_v53 = vand.u32 2147483647, %v5143_v58 }
 0x3a6   :  { %v3732_v31 = vpop.eup %3731  ;;  %v1849_v21 = vadd.f32 %v1824_v1, %v251_v40  ;;  %vm1714_vm9 = vcmp.eq.f32.partialorder %v1713_v12, 8.507059e+37 }
 0x3a7   :  { %v5149_v55 = vadd.f32 1.0, %v3732_v31  ;;  %v3734_v34 = vpop.eup %3733 }
 0x3a8   :  { %v5154_v5 = vadd.f32 1.0, %v3734_v34 }
 0x3a9   :  { %v5151_v50 = vpop.eup %3735  ;;  %3741 = vrcp.f32 %v5149_v55  ;;  %vm1860_vm12 = vweird.f32 %v5149_v55  ;;  %v1866_v38 = vand.u32 2147483648, %v5149_v55 }
 0x3aa   :  { %v5156_v8 = vpop.eup %3737  ;;  %v1705_v33 = vmul.f32 %v5151_v50, %v5141_v2  ;;  %3743 = vrcp.f32 %v5154_v5  ;;  %vm1710_vm14 = vweird.f32 %v5151_v50  ;;  %vm1879_vm5 = vweird.f32 %v5154_v5 }
 0x3ab   :  { %v1724_v16 = vmul.f32 %v5156_v8, %v5143_v58  ;;  %v3740_v32 = vpop.eup %3739  ;;  %3745 = vpow2.f32 %v3536_v51  ;;  %v1734_v51 = vand.u32 2147483648, %v5143_v58  ;;  %vm1729_vm15 = vweird.f32 %v5156_v8  ;;  %vm5188_vm1 = vmor %vm1709_vm10, %vm1710_vm14 }
 0x3ac   :  { %v1706_v31 = vsub.f32 1.0, %v1705_v33  ;;  %3747 = vtanh.f32 %v1698_v35  ;;  %v5166_v11 = vadd.f32 1.0, %v3740_v32  ;;  %v1864_v32 = vand.u32 2147483647, %v5149_v55  ;;  %vm5200_vm4 = vmor %vm1728_vm11, %vm1729_vm15 }
 0x3ad   :  { %v1725_v34 = vsub.f32 1.0, %v1724_v16  ;;  %3749 = vtanh.f32 %v1849_v21  ;;  %v1885_v21 = vand.u32 2147483648, %v5154_v5  ;;  %v1735_v30 = vor.u32 1.1754944e-38, %v1734_v51 }
 0x3ae   :  { %v1707_v33 = vmul.f32 %v5151_v50, %v1706_v31  ;;  %3751 = vrcp.f32 %v5166_v11  ;;  %vm1865_vm6 = vcmp.eq.f32.partialorder %v1864_v32, 8.507059e+37  ;;  %vm1733_vm10 = vcmp.eq.f32.partialorder %v1732_v53, 8.507059e+37 }
 0x3af   :  { %v3742_v25 = vpop.eup %3741  ;;  %v1726_v61 = vmul.f32 %v5156_v8, %v1725_v34  ;;  %v1886_v58 = vor.u32 1.1754944e-38, %v1885_v21 }
 0x3b0   :  { %v1856_v46 = vmul.f32 %v3742_v25, %v5149_v55  ;;  %v3744_v26 = vpop.eup %3743  ;;  %vm1861_vm0 = vweird.f32 %v3742_v25  ;;  %v1708_v31 = vadd.f32 %v5151_v50, %v1707_v33 }
 0x3b1   :  { %v1875_v35 = vmul.f32 %v3744_v26, %v5154_v5  ;;  %v3746_v1 = vpop.eup %3745  ;;  %v1727_v24 = vadd.f32 %v5156_v8, %v1726_v61  ;;  %vm1880_vm2 = vweird.f32 %v3744_v26  ;;  %vm1862_vm3 = vmor %vm1860_vm12, %vm1861_vm0  ;;  %v1867_v61 = vor.u32 1.1754944e-38, %v1866_v38 }
 0x3b2   :  { %v1857_v16 = vsub.f32 1.0, %v1856_v46  ;;  %v3748_v46 = vpop.eup %3747  ;;  %v1893_v36 = vadd.f32 1.0, %v3746_v1  ;;  %v1712_v55 = vsel %vm5188_vm1, %v5151_v50, %v1708_v31  ;;  %vm1881_vm7 = vmor %vm1879_vm5, %vm1880_vm2  ;;  %vm1748_vm1 = vweird.f32 %v5166_v11 }
 0x3b3   :  { %v1876_v40 = vsub.f32 1.0, %v1875_v35  ;;  %v1716_v35 = vor.u32 1.1754944e-38, %v1715_v45  ;;  %v3750_v33 = vpop.eup %3749  ;;  %v1731_v38 = vsel %vm5200_vm4, %v5156_v8, %v1727_v24 }
 0x3b4   :  { %v1858_v34 = vmul.f32 %v3742_v25, %v1857_v16  ;;  %v1883_v16 = vand.u32 2147483647, %v5154_v5  ;;  %3753 = vrcp.f32 %v1893_v36  ;;  %v1736_v5 = vsel %vm1733_vm10, %v1735_v30, %v1731_v38 }
 0x3b5   :  { %v1877_v15 = vmul.f32 %v3744_v26, %v1876_v40  ;;  %v5205_v40 = vpop.eup %3751  ;;  %v1758_v31 = vmul.f32 %v1736_v5, %v5024_v3  ;;  %v1905_v53 = vand.u32 2147483648, %v1893_v36  ;;  %v1903_v30 = vand.u32 2147483647, %v1893_v36 }
 0x3b6   :  { %v1859_v18 = vadd.f32 %v3742_v25, %v1858_v34  ;;  %vm1884_vm8 = vcmp.eq.f32.partialorder %v1883_v16, 8.507059e+37  ;;  %v1744_v52 = vmul.f32 %v5205_v40, %v5166_v11  ;;  %vm1899_vm12 = vweird.f32 %v1893_v36 }
 0x3b7   :  { %v1878_v45 = vadd.f32 %v3744_v26, %v1877_v15  ;;  %vm1904_vm15 = vcmp.eq.f32.partialorder %v1903_v30, 8.507059e+37  ;;  %vm1749_vm0 = vweird.f32 %v5205_v40 }
 0x3b8   :  { %v1863_v1 = vsel %vm1862_vm3, %v3742_v25, %v1859_v18  ;;  %v1717_v25 = vsel %vm1714_vm9, %v1716_v35, %v1712_v55  ;;  %v1906_v35 = vor.u32 1.1754944e-38, %v1905_v53  ;;  %vm1750_vm2 = vmor %vm1748_vm1, %vm1749_vm0 }
 0x3b9   :  { %v1868_v34 = vsel %vm1865_vm6, %v1867_v61, %v1863_v1  ;;  %v1882_v27 = vsel %vm1881_vm7, %v3744_v26, %v1878_v45  ;;  %v1759_v51 = vmul.f32 %v3748_v46, %v1717_v25  ;;  %v1745_v26 = vsub.f32 1.0, %v1744_v52  ;;  %v5967_v52 = vld [vmem:[#allocation22_spill] sm:$0xff] }
 0x3ba   :  { %v1910_v18 = vmul.f32 %v3750_v33, %v1868_v34  ;;  %v1887_v15 = vsel %vm1884_vm8, %v1886_v58, %v1882_v27  ;;  %v3754_v32 = vpop.eup %3753  ;;  %v1754_v1 = vand.u32 2147483648, %v5166_v11  ;;  %v5966_v34 = vld [vmem:[#allocation48_spill] sm:$0xff] }
 0x3bb   :  { %v1909_v50 = vmul.f32 %v1887_v15, %v5020_v37  ;;  %v1895_v24 = vmul.f32 %v3754_v32, %v1893_v36  ;;  %vm1900_vm11 = vweird.f32 %v3754_v32  ;;  %v5221_v21 = vadd.f32 %v1759_v51, %v1758_v31  ;;  %v5970_v31 = vld [vmem:[#allocation43_spill] sm:$0xff] }
 0x3bc   :  { %v1746_v16 = vmul.f32 %v5205_v40, %v1745_v26  ;;  %vm1901_vm14 = vmor %vm1899_vm12, %vm1900_vm11  ;;  %v1752_v36 = vand.u32 2147483647, %v5166_v11  ;;  %v1755_v38 = vor.u32 1.1754944e-38, %v1754_v1 }
 0x3bd   :  { %v5217_v8 = vadd.f32 %v1910_v18, %v1909_v50  ;;  %v1896_v12 = vsub.f32 1.0, %v1895_v24  ;;  %v5968_v50 = vld [vmem:[#allocation27_spill] sm:$0xff]  ;;  %v5969_v24 = vld [vmem:[#allocation21_spill] sm:$0xff] }
 0x3be   :  { %v1747_v2 = vadd.f32 %v5205_v40, %v1746_v16  ;;  %vm1753_vm3 = vcmp.eq.f32.partialorder %v1752_v36, 8.507059e+37  ;;  %v213_v51 = vadd.f32 %v5970_v31, %v5969_v24 }
 0x3bf   :  { %3755 = vtanh.f32 %v5217_v8  ;;  %v1897_v27 = vmul.f32 %v3754_v32, %v1896_v12 }
 0x3c0   :  { %3757 = vtanh.f32 %v5221_v21  ;;  %v1751_v45 = vsel %vm1750_vm2, %v5205_v40, %v1747_v2 }
 0x3c1   :  { %v1898_v37 = vadd.f32 %v3754_v32, %v1897_v27  ;;  %v1756_v11 = vsel %vm1753_vm3, %v1755_v38, %v1751_v45  ;;  %v5972_v38 = vld [vmem:[#allocation25_spill] sm:$0xff] }
 0x3c3   :  { %v1902_v33 = vsel %vm1901_vm14, %v3754_v32, %v1898_v37  ;;  %v172_v32 = vadd.f32 %v5968_v50, %v5967_v52  ;;  %v5974_v50 = vld [vmem:[#allocation30_spill] sm:$0xff] }
 0x3c4   :  { %v1907_v3 = vsel %vm1904_vm15, %v1906_v35, %v1902_v33 }
 0x3c5   :  { %v3756_v61 = vpop.eup %3755 }
 0x3c6   :  { %v1913_v46 = vmul.f32 %v3756_v61, %v1907_v3  ;;  %v3758_v55 = vpop.eup %3757  ;;  %v5971_v61 = vld [vmem:[#allocation50_spill] sm:$0xff] }
 0x3c7   :  { %v1762_v40 = vmul.f32 %v3758_v55, %v1756_v11  ;;  %v5973_v11 = vld [vmem:[#allocation42_spill] sm:$0xff] }
 0x3c8   :  { %3537 = vmatmul.msk.f32.vlgmr.msrb.gmra.mxu0 %vm464_vm13, %v1913_v46  ;;  %3538 = vmatmul.msk.f32.vlgmr.msrb.gmra.mxu1 %vm464_vm13, %v1913_v46 }
 0x3c9   :  { %3539 = vmatmul.msk.f32.vlgmr.msra.gmra.mxu2 %vm464_vm13, %v1913_v46  ;;  %3540 = vmatmul.msk.f32.vlgmr.msra.gmra.mxu3 %vm464_vm13, %v1913_v46 }
 0x3ca   :  { %2163 = vmatpush.msrb.mxu0 %v4821_v29  ;;  %2183 = vmatpush.msrb.mxu1 %v4824_v7  ;;  %v5947_v29 = vld [vmem:[#allocation52_spill] sm:$0xff]  ;;  %v5948_v7 = vld [vmem:[#allocation53_spill] sm:$0xff] }
 0x3cb   :  { %2203 = vmatpush.msra.mxu2 %v4827_v44  ;;  %2223 = vmatpush.msra.mxu3 %v5041_v20  ;;  %v5949_v44 = vld [vmem:[#allocation54_spill] sm:$0xff] }
 0x3cc   :  { %2164 = vmatpush.msrb.mxu0 %v4831_v48  ;;  %2184 = vmatpush.msrb.mxu1 %v4834_v63  ;;  %v5950_v48 = vld [vmem:[#allocation55_spill] sm:$0xff]  ;;  %v5951_v63 = vld [vmem:[#allocation56_spill] sm:$0xff] }
 0x3cd   :  { %2204 = vmatpush.msra.mxu2 %v4837_v28  ;;  %2224 = vmatpush.msra.mxu3 %v5047_v57  ;;  %v5952_v28 = vld [vmem:[#allocation57_spill] sm:$0xff] }
 0x3ce   :  { %2165 = vmatpush.msrb.mxu0 %v4841_v23  ;;  %2185 = vmatpush.msrb.mxu1 %v4844_v43  ;;  %v5953_v23 = vld [vmem:[#allocation58_spill] sm:$0xff]  ;;  %v5954_v43 = vld [vmem:[#allocation59_spill] sm:$0xff] }
 0x3cf   :  { %2205 = vmatpush.msra.mxu2 %v4847_v59  ;;  %2225 = vmatpush.msra.mxu3 %v5053_v39  ;;  %v5955_v59 = vld [vmem:[#allocation60_spill] sm:$0xff] }
 0x3d0   :  { %3541 = vmatmul.msk.f32.vlgmr.msra.gmra.mxu0 %vm464_vm13, %v1762_v40  ;;  %3542 = vmatmul.msk.f32.vlgmr.msra.gmra.mxu1 %vm464_vm13, %v1762_v40 }
 0x3d1   :  { %3543 = vmatmul.msk.f32.vlgmr.msrb.gmra.mxu2 %vm464_vm13, %v1762_v40  ;;  %3544 = vmatmul.msk.f32.vlgmr.msrb.gmra.mxu3 %vm464_vm13, %v1762_v40  ;;  %v295_v40 = vadd.f32 %v5973_v11, %v5972_v38 }
 0x3d2   :  { %2166 = vmatpush.msrb.mxu0 %v4855_v56  ;;  %2186 = vmatpush.msrb.mxu1 %v4858_v54  ;;  %v5956_v56 = vld [vmem:[#allocation61_spill] sm:$0xff]  ;;  %v5957_v54 = vld [vmem:[#allocation62_spill] sm:$0xff] }
 0x3d3   :  { %2206 = vmatpush.msra.mxu2 %v4861_v0  ;;  %2226 = vmatpush.msra.mxu3 %v5063_v9  ;;  %v5958_v0 = vld [vmem:[#allocation20_spill] sm:$0xff] }
 0x3d4   :  { %2313 = vmatpush.msra.mxu0 %v4865_v17  ;;  %2333 = vmatpush.msra.mxu1 %v4868_v4  ;;  %v5959_v17 = vld [vmem:[#allocation37_spill] sm:$0xff]  ;;  %v5960_v4 = vld [vmem:[#allocation36_spill] sm:$0xff] }
 0x3d5   :  { %2353 = vmatpush.msrb.mxu2 %v4871_v6  ;;  %2373 = vmatpush.msrb.mxu3 %v4874_v22  ;;  %v5961_v6 = vld [vmem:[#allocation31_spill] sm:$0xff]  ;;  %v5962_v22 = vld [vmem:[#allocation24_spill] sm:$0xff] }
 0x3d6   :  { %2314 = vmatpush.msra.mxu0 %v4877_v14  ;;  %2334 = vmatpush.msra.mxu1 %v4880_v49  ;;  %v5963_v14 = vld [vmem:[#allocation39_spill] sm:$0xff]  ;;  %v5964_v49 = vld [vmem:[#allocation38_spill] sm:$0xff] }
 0x3d7   :  { %2354 = vmatpush.msrb.mxu2 %v4883_v47  ;;  %2374 = vmatpush.msrb.mxu3 %v4886_v10 }
 0x3d8   :  { %3548 = vmatmul.msk.f32.vlgmr.msrb.gmra.mxu0 %vm464_vm13, %v1913_v46  ;;  %3549 = vmatmul.msk.f32.vlgmr.msrb.gmra.mxu1 %vm464_vm13, %v1913_v46 }
 0x3d9   :  { %3550 = vmatmul.msk.f32.vlgmr.msra.gmra.mxu2 %vm464_vm13, %v1913_v46  ;;  %3551 = vmatmul.msk.f32.vlgmr.msra.gmra.mxu3 %vm464_vm13, %v1913_v46 }
 0x3da   :  { %2315 = vmatpush.msra.mxu0 %v4897_v13  ;;  %2335 = vmatpush.msra.mxu1 %v4900_v62 }
 0x3db   :  { %2355 = vmatpush.msrb.mxu2 %v4903_v60  ;;  %2375 = vmatpush.msrb.mxu3 %v4906_v41 }
 0x3dc   :  { %2316 = vmatpush.msra.mxu0 %v4909_v19  ;;  %2336 = vmatpush.msra.mxu1 %v4912_v42  ;;  %v5965_v42 = vld [vmem:[#allocation47_spill] sm:$0xff] }
 0x3dd   :  { %2356 = vmatpush.msrb.mxu2 %v5947_v29  ;;  %2376 = vmatpush.msrb.mxu3 %v5948_v7 }
 0x3de   :  { %2396 = vmatpush.msrb.mxu0 %v5949_v44  ;;  %2416 = vmatpush.msrb.mxu1 %v5950_v48 }
 0x3df   :  { %2436 = vmatpush.msra.mxu2 %v5951_v63  ;;  %2456 = vmatpush.msra.mxu3 %v5952_v28 }
 0x3e0   :  { %2397 = vmatpush.msrb.mxu0 %v5953_v23  ;;  %2417 = vmatpush.msrb.mxu1 %v5954_v43 }
 0x3e1   :  { %2437 = vmatpush.msra.mxu2 %v5955_v59  ;;  %2457 = vmatpush.msra.mxu3 %v5956_v56 }
 0x3e2   :  { %2398 = vmatpush.msrb.mxu0 %v5957_v54  ;;  %2418 = vmatpush.msrb.mxu1 %v5958_v0 }
 0x3e3   :  { %2438 = vmatpush.msra.mxu2 %v5959_v17  ;;  %2458 = vmatpush.msra.mxu3 %v5960_v4 }
 0x3e4   :  { %2399 = vmatpush.msrb.mxu0 %v5961_v6  ;;  %2419 = vmatpush.msrb.mxu1 %v5962_v22 }
 0x3e5   :  { %2439 = vmatpush.msra.mxu2 %v5963_v14  ;;  %2459 = vmatpush.msra.mxu3 %v5964_v49 }
 0x445   :  { %v1934_v47 = vpop.f32.mrf.mxu0  ;;  %v1954_v10 = vpop.f32.mrf.mxu1 }
 0x44c   :  { %v1994_v13 = vpop.f32.mrf.mxu3  ;;  %v1974_v15 = vpop.f32.mrf.mxu2 }
 0x44d   :  { %v2017_v62 = vpop.f32.mrf.mxu0  ;;  %v2037_v60 = vpop.f32.mrf.mxu1 }
 0x44e   :  { %v2018_v41 = vadd.f32 %v2017_v62, %v1934_v47  ;;  %v2038_v19 = vadd.f32 %v2037_v60, %v1954_v10 }
 0x450   :  { %v2080_v58 = vadd.f32 %v2018_v41, %v5965_v42  ;;  %v2081_v18 = vadd.f32 %v2038_v19, %v5966_v34 }
 0x452   :  { %v3545_v25 = vmul.f32 -1.442695, %v2080_v58  ;;  %v3546_v5 = vmul.f32 -1.442695, %v2081_v18 }
 0x454   :  { %3759 = vpow2.f32 %v3545_v25  ;;  %v2077_v26 = vpop.f32.mrf.mxu3  ;;  %v2057_v36 = vpop.f32.mrf.mxu2 }
 0x455   :  { %3761 = vpow2.f32 %v3546_v5  ;;  %v2078_v12 = vadd.f32 %v2077_v26, %v1994_v13  ;;  %v2168_v53 = vpop.f32.mrf.mxu0  ;;  %v2188_v27 = vpop.f32.mrf.mxu1  ;;  %v2058_v18 = vadd.f32 %v2057_v36, %v1974_v15 }
 0x456   :  { %v2231_v30 = vadd.f32 %v2168_v53, %v172_v32  ;;  %v2232_v16 = vadd.f32 %v2188_v27, %v213_v51  ;;  %v5975_v32 = vld [vmem:[#allocation34_spill] sm:$0xff]  ;;  %v5976_v27 = vld [vmem:[#allocation51_spill] sm:$0xff] }
 0x457   :  { %v2083_v33 = vadd.f32 %v2078_v12, %v5971_v61  ;;  %v254_v31 = vadd.f32 %v5975_v32, %v5974_v50 }
 0x458   :  { %v3552_v37 = vmul.f32 -1.442695, %v2231_v30  ;;  %v3553_v35 = vmul.f32 -1.442695, %v2232_v16  ;;  %v2082_v30 = vadd.f32 %v2058_v18, %v5976_v27 }
 0x459   :  { %v3547_v45 = vmul.f32 -1.442695, %v2083_v33 }
 0x45a   :  { %v3760_v3 = vpop.eup %3759  ;;  %3763 = vpow2.f32 %v3552_v37 }
 0x45b   :  { %v3762_v46 = vpop.eup %3761  ;;  %v5298_v2 = vadd.f32 1.0, %v3760_v3  ;;  %3765 = vpow2.f32 %v3553_v35 }
 0x45c   :  { %v5300_v1 = vadd.f32 1.0, %v3762_v46  ;;  %v2228_v55 = vpop.f32.mrf.mxu3  ;;  %v2208_v25 = vpop.f32.mrf.mxu2 }
 0x45d   :  { %3767 = vrcp.f32 %v5298_v2  ;;  %v2234_v47 = vadd.f32 %v2228_v55, %v295_v40  ;;  %v2233_v53 = vadd.f32 %v2208_v25, %v254_v31  ;;  %vm2093_vm5 = vweird.f32 %v5298_v2 }
 0x45e   :  { %3769 = vrcp.f32 %v5300_v1  ;;  %vm2112_vm4 = vweird.f32 %v5300_v1  ;;  %v2097_v15 = vand.u32 2147483647, %v5298_v2  ;;  %v2099_v35 = vand.u32 2147483648, %v5298_v2 }
 0x45f   :  { %3771 = vpow2.f32 %v3547_v45  ;;  %v3554_v58 = vmul.f32 -1.442695, %v2234_v47  ;;  %v2118_v46 = vand.u32 2147483648, %v5300_v1 }
 0x460   :  { %v3764_v29 = vpop.eup %3763  ;;  %vm2098_vm3 = vcmp.eq.f32.partialorder %v2097_v15, 8.507059e+37 }
 0x461   :  { %v2238_v7 = vadd.f32 1.0, %v3764_v29  ;;  %v3766_v10 = vpop.eup %3765 }
 0x462   :  { %v5308_v62 = vadd.f32 1.0, %v3766_v10 }
 0x463   :  { %v5306_v13 = vpop.eup %3767  ;;  %3773 = vrcp.f32 %v2238_v7  ;;  %vm2244_vm6 = vweird.f32 %v2238_v7  ;;  %v2250_v11 = vand.u32 2147483648, %v2238_v7  ;;  %v2248_v29 = vand.u32 2147483647, %v2238_v7 }
 0x464   :  { %v5310_v60 = vpop.eup %3769  ;;  %v2089_v41 = vmul.f32 %v5306_v13, %v5298_v2  ;;  %3775 = vrcp.f32 %v5308_v62  ;;  %vm2094_vm9 = vweird.f32 %v5306_v13  ;;  %v2267_v31 = vand.u32 2147483647, %v5308_v62 }
 0x465   :  { %v2108_v19 = vmul.f32 %v5310_v60, %v5300_v1  ;;  %v3772_v5 = vpop.eup %3771  ;;  %3777 = vpow2.f32 %v3554_v58  ;;  %vm2113_vm8 = vweird.f32 %v5310_v60  ;;  %v2251_v32 = vor.u32 1.1754944e-38, %v2250_v11  ;;  %vm5340_vm12 = vmor %vm2093_vm5, %vm2094_vm9 }
 0x466   :  { %v2090_v51 = vsub.f32 1.0, %v2089_v41  ;;  %v5320_v16 = vadd.f32 1.0, %v3772_v5  ;;  %3779 = vtanh.f32 %v2233_v53  ;;  %v2269_v41 = vand.u32 2147483648, %v5308_v62  ;;  %vm5349_vm15 = vmor %vm2112_vm4, %vm2113_vm8 }
 0x467   :  { %v2109_v26 = vsub.f32 1.0, %v2108_v19  ;;  %vm2249_vm14 = vcmp.eq.f32.partialorder %v2248_v29, 8.507059e+37  ;;  %vm2263_vm0 = vweird.f32 %v5308_v62  ;;  %v2119_v11 = vor.u32 1.1754944e-38, %v2118_v46 }
 0x468   :  { %v2091_v36 = vmul.f32 %v5306_v13, %v2090_v51  ;;  %3781 = vrcp.f32 %v5320_v16  ;;  %vm2268_vm2 = vcmp.eq.f32.partialorder %v2267_v31, 8.507059e+37 }
 0x469   :  { %v3774_v12 = vpop.eup %3773  ;;  %v2110_v3 = vmul.f32 %v5310_v60, %v2109_v26  ;;  %v2116_v26 = vand.u32 2147483647, %v5300_v1  ;;  %v2270_v1 = vor.u32 1.1754944e-38, %v2269_v41 }
 0x46a   :  { %v2240_v37 = vmul.f32 %v3774_v12, %v2238_v7  ;;  %v3776_v33 = vpop.eup %3775  ;;  %vm2245_vm7 = vweird.f32 %v3774_v12  ;;  %v2092_v19 = vadd.f32 %v5306_v13, %v2091_v36 }
 0x46b   :  { %v2259_v55 = vmul.f32 %v3776_v33, %v5308_v62  ;;  %v3778_v47 = vpop.eup %3777  ;;  %v2111_v58 = vadd.f32 %v5310_v60, %v2110_v3  ;;  %vm2264_vm10 = vweird.f32 %v3776_v33  ;;  %vm2246_vm11 = vmor %vm2244_vm6, %vm2245_vm7  ;;  %vm2117_vm4 = vcmp.eq.f32.partialorder %v2116_v26, 8.507059e+37 }
 0x46c   :  { %v2241_v45 = vsub.f32 1.0, %v2240_v37  ;;  %v2277_v25 = vadd.f32 1.0, %v3778_v47  ;;  %v3780_v37 = vpop.eup %3779  ;;  %vm2265_vm1 = vmor %vm2263_vm0, %vm2264_vm10  ;;  %vm2132_vm10 = vweird.f32 %v5320_v16 }
 0x46d   :  { %v2260_v10 = vsub.f32 1.0, %v2259_v55 }
 0x46e   :  { %v2242_v40 = vmul.f32 %v3774_v12, %v2241_v45  ;;  %3783 = vrcp.f32 %v2277_v25  ;;  %v5354_v36 = vpop.eup %3781  ;;  %v2115_v45 = vsel %vm5349_vm15, %v5310_v60, %v2111_v58  ;;  %vm2283_vm6 = vweird.f32 %v2277_v25 }
 0x46f   :  { %v2261_v5 = vmul.f32 %v3776_v33, %v2260_v10  ;;  %3785 = vtanh.f32 %v2082_v30  ;;  %v2100_v30 = vor.u32 1.1754944e-38, %v2099_v35  ;;  %v2120_v47 = vsel %vm2117_vm4, %v2119_v11, %v2115_v45  ;;  %v5396_v45 = vld [vmem:[#allocation5 + $0x60] sm:$0xff] }
 0x470   :  { %v2243_v18 = vadd.f32 %v3774_v12, %v2242_v40  ;;  %v2142_v46 = vmul.f32 %v2120_v47, %v5221_v21  ;;  %vm2133_vm9 = vweird.f32 %v5354_v36 }
 0x471   :  { %v2262_v3 = vadd.f32 %v3776_v33, %v2261_v5 }
 0x472   :  { %v2247_v53 = vsel %vm2246_vm11, %v3774_v12, %v2243_v18  ;;  %v2096_v12 = vsel %vm5340_vm12, %v5306_v13, %v2092_v19  ;;  %v2128_v13 = vmul.f32 %v5354_v36, %v5320_v16  ;;  %v2289_v18 = vand.u32 2147483648, %v2277_v25  ;;  %vm5385_vm11 = vmor %vm2132_vm10, %vm2133_vm9 }
 0x473   :  { %v2252_v2 = vsel %vm2249_vm14, %v2251_v32, %v2247_v53  ;;  %v2266_v40 = vsel %vm2265_vm1, %v3776_v33, %v2262_v3  ;;  %v2101_v29 = vsel %vm2098_vm3, %v2100_v30, %v2096_v12  ;;  %v2287_v32 = vand.u32 2147483647, %v2277_v25  ;;  %v5402_v30 = vld [vmem:[#allocation5 + $0x70] sm:$0xff] }
 0x474   :  { %v2294_v55 = vmul.f32 %v3780_v37, %v2252_v2  ;;  %v2271_v62 = vsel %vm2268_vm2, %v2270_v1, %v2266_v40  ;;  %v3784_v19 = vpop.eup %3783  ;;  %v2129_v33 = vsub.f32 1.0, %v2128_v13  ;;  %v2290_v26 = vor.u32 1.1754944e-38, %v2289_v18  ;;  %v5399_v1 = vld [vmem:[#allocation5 + $0x68] sm:$0xff]  ;;  %v5406_v40 = vld [vmem:[#allocation5 + $0x40] sm:$0xff]  ;;  %v5461_v18 = vld [vmem:[#allocation8 + $0x58] sm:$0xff] }
 0x475   :  { %v2293_v10 = vmul.f32 %v2271_v62, %v5217_v8  ;;  %v3786_v60 = vpop.eup %3785  ;;  %v2279_v41 = vmul.f32 %v3784_v19, %v2277_v25  ;;  %vm2284_vm5 = vweird.f32 %v3784_v19  ;;  %vm2288_vm8 = vcmp.eq.f32.partialorder %v2287_v32, 8.507059e+37  ;;  %v5416_v13 = vld [vmem:[#allocation5 + $0x20] sm:$0xff]  ;;  %v5475_v32 = vld [vmem:[#allocation8 + $0x28] sm:$0xff] }
 0x476   :  { %v2143_v35 = vmul.f32 %v3786_v60, %v2101_v29  ;;  %v2130_v8 = vmul.f32 %v5354_v36, %v2129_v33  ;;  %vm2285_vm7 = vmor %vm2283_vm6, %vm2284_vm5  ;;  %v2138_v3 = vand.u32 2147483648, %v5320_v16  ;;  %v2136_v25 = vand.u32 2147483647, %v5320_v16  ;;  %v5412_v29 = vld [vmem:[#allocation5 + $0x50] sm:$0xff]  ;;  %v5452_v33 = vld [vmem:[#allocation8 + $0x40] sm:$0xff] }
 0x477   :  { %v5366_v58 = vadd.f32 %v2294_v55, %v2293_v10  ;;  %v2280_v15 = vsub.f32 1.0, %v2279_v41  ;;  %v5422_v10 = vld [vmem:[#allocation5 + $0x30] sm:$0xff]  ;;  %v5443_v41 = vld [vmem:[#allocation8 + $0x68] sm:$0xff] }
 0x478   :  { %v5370_v31 = vadd.f32 %v2143_v35, %v2142_v46  ;;  %v2131_v7 = vadd.f32 %v5354_v36, %v2130_v8  ;;  %v2139_v11 = vor.u32 1.1754944e-38, %v2138_v3  ;;  %vm2137_vm12 = vcmp.eq.f32.partialorder %v2136_v25, 8.507059e+37  ;;  %v5436_v60 = vld [vmem:[#allocation5 + $0x10] sm:$0xff]  ;;  %v5449_v35 = vld [vmem:[#allocation8 + $0x78] sm:$0xff] }
 0x479   :  { %3787 = vtanh.f32 %v5366_v58  ;;  %v2281_v5 = vmul.f32 %v3784_v19, %v2280_v15  ;;  %v5446_v46 = vld [vmem:[#allocation8 + $0x70] sm:$0xff] }
 0x47a   :  { %3789 = vtanh.f32 %v5370_v31  ;;  %v2135_v16 = vsel %vm5385_vm11, %v5354_v36, %v2131_v7  ;;  %v5409_v36 = vld [vmem:[#allocation5 + $0x48] sm:$0xff]  ;;  %v5458_v15 = vld [vmem:[#allocation8 + $0x50] sm:$0xff] }
 0x47b   :  { %v2282_v51 = vadd.f32 %v3784_v19, %v2281_v5  ;;  %v2140_v62 = vsel %vm2137_vm12, %v2139_v11, %v2135_v16  ;;  %v5472_v5 = vld [vmem:[#allocation8 + $0x20] sm:$0xff]  ;;  %v5478_v8 = vld [vmem:[#allocation8 + $0x30] sm:$0xff] }
 0x47d   :  { %v2286_v37 = vsel %vm2285_vm7, %v3784_v19, %v2282_v51  ;;  %v5433_v19 = vld [vmem:[#allocation5 + $0x8] sm:$0xff]  ;;  %v5481_v51 = vld [vmem:[#allocation8 + $0x38] sm:$0xff] }
 0x47e   :  { %v2291_v21 = vsel %vm2288_vm8, %v2290_v26, %v2286_v37  ;;  %v5484_v26 = vld [vmem:[#allocation8] sm:$0xff]  ;;  %v5490_v37 = vld [vmem:[#allocation8 + $0x10] sm:$0xff] }
 0x47f   :  { %v3788_v53 = vpop.eup %3787 }
 0x480   :  { %v5376_v2 = vmul.f32 %v3788_v53, %v2291_v21  ;;  %v3790_v55 = vpop.eup %3789  ;;  %v5487_v53 = vld [vmem:[#allocation8 + $0x8] sm:$0xff]  ;;  %v5493_v21 = vld [vmem:[#allocation8 + $0x18] sm:$0xff] }
 0x481   :  { %v2146_v47 = vmul.f32 %v3790_v55, %v2140_v62 }
 0x482   :  { %3555 = vmatmul.msk.f32.vlgmr.msra.gmra.mxu0 %vm464_vm13, %v5376_v2  ;;  %3556 = vmatmul.msk.f32.vlgmr.msra.gmra.mxu1 %vm464_vm13, %v5376_v2 }
 0x483   :  { %3557 = vmatmul.msk.f32.vlgmr.msrb.gmra.mxu2 %vm464_vm13, %v5376_v2  ;;  %3558 = vmatmul.msk.f32.vlgmr.msrb.gmra.mxu3 %vm464_vm13, %v5376_v2 }
 0x484   :  { %2547 = vmatpush.msra.mxu0 %v5396_v45  ;;  %2567 = vmatpush.msra.mxu1 %v5399_v1 }
 0x485   :  { %2587 = vmatpush.msrb.mxu2 %v5402_v30  ;;  %2607 = vmatpush.msrb.mxu3 %v5041_v20  ;;  %v5419_v20 = vld [vmem:[#allocation5 + $0x28] sm:$0xff] }
 0x486   :  { %2548 = vmatpush.msra.mxu0 %v5406_v40  ;;  %2568 = vmatpush.msra.mxu1 %v5409_v36 }
 0x487   :  { %2588 = vmatpush.msrb.mxu2 %v5412_v29  ;;  %2608 = vmatpush.msrb.mxu3 %v5047_v57  ;;  %v5430_v57 = vld [vmem:[#allocation5] sm:$0xff] }
 0x488   :  { %2549 = vmatpush.msra.mxu0 %v5416_v13  ;;  %2569 = vmatpush.msra.mxu1 %v5419_v20 }
 0x489   :  { %2589 = vmatpush.msrb.mxu2 %v5422_v10  ;;  %2609 = vmatpush.msrb.mxu3 %v5053_v39  ;;  %v5440_v39 = vld [vmem:[#allocation8 + $0x60] sm:$0xff] }
 0x48a   :  { %3559 = vmatmul.msk.f32.vlgmr.msrb.gmra.mxu0 %vm464_vm13, %v2146_v47  ;;  %3560 = vmatmul.msk.f32.vlgmr.msrb.gmra.mxu1 %vm464_vm13, %v2146_v47 }
 0x48b   :  { %3561 = vmatmul.msk.f32.vlgmr.msra.gmra.mxu2 %vm464_vm13, %v2146_v47  ;;  %3562 = vmatmul.msk.f32.vlgmr.msra.gmra.mxu3 %vm464_vm13, %v2146_v47 }
 0x48c   :  { %2550 = vmatpush.msra.mxu0 %v5430_v57  ;;  %2570 = vmatpush.msra.mxu1 %v5433_v19 }
 0x48d   :  { %2590 = vmatpush.msrb.mxu2 %v5436_v60  ;;  %2610 = vmatpush.msrb.mxu3 %v5063_v9  ;;  %v5455_v9 = vld [vmem:[#allocation8 + $0x48] sm:$0xff] }
 0x48e   :  { %2697 = vmatpush.msrb.mxu0 %v5440_v39  ;;  %2717 = vmatpush.msrb.mxu1 %v5443_v41 }
 0x48f   :  { %2737 = vmatpush.msra.mxu2 %v5446_v46  ;;  %2757 = vmatpush.msra.mxu3 %v5449_v35 }
 0x490   :  { %2698 = vmatpush.msrb.mxu0 %v5452_v33  ;;  %2718 = vmatpush.msrb.mxu1 %v5455_v9 }
 0x491   :  { %2738 = vmatpush.msra.mxu2 %v5458_v15  ;;  %2758 = vmatpush.msra.mxu3 %v5461_v18 }
 0x492   :  { %3566 = vmatmul.msk.f32.vlgmr.msra.gmra.mxu0 %vm464_vm13, %v5376_v2  ;;  %3567 = vmatmul.msk.f32.vlgmr.msra.gmra.mxu1 %vm464_vm13, %v5376_v2 }
 0x493   :  { %3568 = vmatmul.msk.f32.vlgmr.msrb.gmra.mxu2 %vm464_vm13, %v5376_v2  ;;  %3569 = vmatmul.msk.f32.vlgmr.msrb.gmra.mxu3 %vm464_vm13, %v5376_v2 }
 0x494   :  { %2699 = vmatpush.msrb.mxu0 %v5472_v5  ;;  %2719 = vmatpush.msrb.mxu1 %v5475_v32 }
 0x495   :  { %2739 = vmatpush.msra.mxu2 %v5478_v8  ;;  %2759 = vmatpush.msra.mxu3 %v5481_v51 }
 0x496   :  { %2700 = vmatpush.msrb.mxu0 %v5484_v26  ;;  %2720 = vmatpush.msrb.mxu1 %v5487_v53 }
 0x497   :  { %2740 = vmatpush.msra.mxu2 %v5490_v37  ;;  %2760 = vmatpush.msra.mxu3 %v5493_v21 }
 0x498   :  { %2780 = vmatpush.msra.mxu0 %v5949_v44  ;;  %2800 = vmatpush.msra.mxu1 %v5950_v48 }
 0x499   :  { %2820 = vmatpush.msrb.mxu2 %v5951_v63  ;;  %2840 = vmatpush.msrb.mxu3 %v5952_v28 }
 0x49a   :  { %2781 = vmatpush.msra.mxu0 %v5953_v23  ;;  %2801 = vmatpush.msra.mxu1 %v5954_v43 }
 0x49b   :  { %2821 = vmatpush.msrb.mxu2 %v5955_v59  ;;  %2841 = vmatpush.msrb.mxu3 %v5956_v56 }
 0x49c   :  { %2782 = vmatpush.msra.mxu0 %v5957_v54  ;;  %2802 = vmatpush.msra.mxu1 %v5958_v0 }
 0x49d   :  { %2822 = vmatpush.msrb.mxu2 %v5959_v17  ;;  %2842 = vmatpush.msrb.mxu3 %v5960_v4 }
 0x49e   :  { %2783 = vmatpush.msra.mxu0 %v5961_v6  ;;  %2803 = vmatpush.msra.mxu1 %v5962_v22  ;;  %v5983_v6 = vld [vmem:[#allocation28_spill] sm:$0xff] }
 0x49f   :  { %2823 = vmatpush.msrb.mxu2 %v5963_v14  ;;  %2843 = vmatpush.msrb.mxu3 %v5964_v49  ;;  %v175_v22 = vadd.f32 %v5983_v6, %v5967_v52  ;;  %v5984_v14 = vld [vmem:[#allocation45_spill] sm:$0xff] }
 0x4a0   :  { %v216_v49 = vadd.f32 %v5984_v14, %v5969_v24 }
 0x4ff   :  { %v2318_v44 = vpop.f32.mrf.mxu0  ;;  %v2338_v48 = vpop.f32.mrf.mxu1 }
 0x506   :  { %v2378_v63 = vpop.f32.mrf.mxu3  ;;  %v2358_v0 = vpop.f32.mrf.mxu2 }
 0x507   :  { %v2401_v28 = vpop.f32.mrf.mxu0  ;;  %v2421_v23 = vpop.f32.mrf.mxu1 }
 0x508   :  { %v2402_v43 = vadd.f32 %v2401_v28, %v2318_v44  ;;  %v2422_v59 = vadd.f32 %v2421_v23, %v2338_v48 }
 0x50a   :  { %v2464_v56 = vadd.f32 %v2402_v43, %v5965_v42  ;;  %v2465_v54 = vadd.f32 %v2422_v59, %v5966_v34  ;;  %v5985_v43 = vld [vmem:[#allocation44_spill] sm:$0xff] }
 0x50b   :  { %v298_v59 = vadd.f32 %v5985_v43, %v5972_v38 }
 0x50c   :  { %v3563_v17 = vmul.f32 -1.442695, %v2464_v56  ;;  %v3564_v4 = vmul.f32 -1.442695, %v2465_v54 }
 0x50e   :  { %3791 = vpow2.f32 %v3563_v17  ;;  %v2461_v7 = vpop.f32.mrf.mxu3  ;;  %v2441_v28 = vpop.f32.mrf.mxu2 }
 0x50f   :  { %3793 = vpow2.f32 %v3564_v4  ;;  %v2462_v2 = vadd.f32 %v2461_v7, %v2378_v63  ;;  %v2552_v3 = vpop.f32.mrf.mxu0  ;;  %v2572_v25 = vpop.f32.mrf.mxu1 }
 0x510   :  { %v2615_v12 = vadd.f32 %v2552_v3, %v175_v22  ;;  %v2616_v16 = vadd.f32 %v2572_v25, %v216_v49  ;;  %v2442_v3 = vadd.f32 %v2441_v28, %v2358_v0 }
 0x511   :  { %v2467_v62 = vadd.f32 %v2462_v2, %v5971_v61 }
 0x512   :  { %v3570_v55 = vmul.f32 -1.442695, %v2615_v12  ;;  %v3571_v11 = vmul.f32 -1.442695, %v2616_v16 }
 0x513   :  { %v3565_v63 = vmul.f32 -1.442695, %v2467_v62  ;;  %v5986_v62 = vld [vmem:[#allocation35_spill] sm:$0xff] }
 0x514   :  { %v3792_v47 = vpop.eup %3791  ;;  %3795 = vpow2.f32 %v3570_v55 }
 0x515   :  { %v3794_v44 = vpop.eup %3793  ;;  %v5519_v48 = vadd.f32 1.0, %v3792_v47  ;;  %3797 = vpow2.f32 %v3571_v11 }
 0x516   :  { %v5521_v52 = vadd.f32 1.0, %v3794_v44  ;;  %v2612_v23 = vpop.f32.mrf.mxu3  ;;  %v2592_v25 = vpop.f32.mrf.mxu2  ;;  %v2466_v44 = vadd.f32 %v2442_v3, %v5976_v27 }
 0x517   :  { %3799 = vrcp.f32 %v5519_v48  ;;  %v2618_v17 = vadd.f32 %v2612_v23, %v298_v59  ;;  %v2617_v47 = vadd.f32 %v2592_v25, %v5986_v62  ;;  %vm2477_vm15 = vweird.f32 %v5519_v48 }
 0x518   :  { %3801 = vrcp.f32 %v5521_v52  ;;  %vm2496_vm14 = vweird.f32 %v5521_v52  ;;  %v2481_v0 = vand.u32 2147483647, %v5519_v48  ;;  %v2483_v28 = vand.u32 2147483648, %v5519_v48 }
 0x519   :  { %3803 = vpow2.f32 %v3565_v63  ;;  %v3572_v2 = vmul.f32 -1.442695, %v2618_v17 }
 0x51a   :  { %v3796_v56 = vpop.eup %3795  ;;  %vm2482_vm12 = vcmp.eq.f32.partialorder %v2481_v0, 8.507059e+37 }
 0x51b   :  { %v2622_v54 = vadd.f32 1.0, %v3796_v56  ;;  %v3798_v4 = vpop.eup %3797  ;;  %v2502_v56 = vand.u32 2147483648, %v5521_v52 }
 0x51c   :  { %v5529_v22 = vadd.f32 1.0, %v3798_v4 }
 0x51d   :  { %v5527_v6 = vpop.eup %3799  ;;  %3805 = vrcp.f32 %v2622_v54  ;;  %vm2628_vm0 = vweird.f32 %v2622_v54  ;;  %v2632_v3 = vand.u32 2147483647, %v2622_v54 }
 0x51e   :  { %v5531_v14 = vpop.eup %3801  ;;  %v2473_v49 = vmul.f32 %v5527_v6, %v5519_v48  ;;  %3807 = vrcp.f32 %v5529_v22  ;;  %vm2478_vm3 = vweird.f32 %v5527_v6  ;;  %v2651_v50 = vand.u32 2147483647, %v5529_v22 }
 0x51f   :  { %v2492_v7 = vmul.f32 %v5531_v14, %v5521_v52  ;;  %v3804_v12 = vpop.eup %3803  ;;  %3809 = vpow2.f32 %v3572_v2  ;;  %vm2497_vm2 = vweird.f32 %v5531_v14  ;;  %vm5560_vm6 = vmor %vm2477_vm15, %vm2478_vm3  ;;  %vm2633_vm7 = vcmp.eq.f32.partialorder %v2632_v3, 8.507059e+37 }
 0x520   :  { %v2474_v16 = vsub.f32 1.0, %v2473_v49  ;;  %v5540_v63 = vadd.f32 1.0, %v3804_v12  ;;  %3811 = vtanh.f32 %v2617_v47  ;;  %vm5569_vm8 = vmor %vm2496_vm14, %vm2497_vm2  ;;  %vm2647_vm9 = vweird.f32 %v5529_v22 }
 0x521   :  { %v2493_v55 = vsub.f32 1.0, %v2492_v7  ;;  %v2634_v7 = vand.u32 2147483648, %v2622_v54  ;;  %vm2652_vm11 = vcmp.eq.f32.partialorder %v2651_v50, 8.507059e+37 }
 0x522   :  { %v2475_v17 = vmul.f32 %v5527_v6, %v2474_v16  ;;  %3813 = vrcp.f32 %v5540_v63 }
 0x523   :  { %v3806_v11 = vpop.eup %3805  ;;  %v2494_v59 = vmul.f32 %v5531_v14, %v2493_v55  ;;  %v2653_v55 = vand.u32 2147483648, %v5529_v22 }
 0x524   :  { %v2624_v23 = vmul.f32 %v3806_v11, %v2622_v54  ;;  %v3808_v43 = vpop.eup %3807  ;;  %vm2629_vm1 = vweird.f32 %v3806_v11  ;;  %v2476_v16 = vadd.f32 %v5527_v6, %v2475_v17 }
 0x525   :  { %v2643_v49 = vmul.f32 %v3808_v43, %v5529_v22  ;;  %v3810_v25 = vpop.eup %3809  ;;  %v2495_v62 = vadd.f32 %v5531_v14, %v2494_v59  ;;  %vm2648_vm4 = vweird.f32 %v3808_v43  ;;  %vm2630_vm5 = vmor %vm2628_vm0, %vm2629_vm1 }
 0x526   :  { %v2625_v4 = vsub.f32 1.0, %v2624_v23  ;;  %v2661_v27 = vadd.f32 1.0, %v3810_v25  ;;  %v3812_v59 = vpop.eup %3811  ;;  %vm2649_vm10 = vmor %vm2647_vm9, %vm2648_vm4  ;;  %vm2516_vm4 = vweird.f32 %v5540_v63 }
 0x527   :  { %v2644_v12 = vsub.f32 1.0, %v2643_v49  ;;  %v2500_v49 = vand.u32 2147483647, %v5521_v52  ;;  %v2499_v3 = vsel %vm5569_vm8, %v5531_v14, %v2495_v62  ;;  %v2654_v52 = vor.u32 1.1754944e-38, %v2653_v55 }
 0x528   :  { %v2626_v2 = vmul.f32 %v3806_v11, %v2625_v4  ;;  %v2635_v4 = vor.u32 1.1754944e-38, %v2634_v7  ;;  %3815 = vrcp.f32 %v2661_v27  ;;  %v2673_v0 = vand.u32 2147483648, %v2661_v27 }
 0x529   :  { %v2645_v47 = vmul.f32 %v3808_v43, %v2644_v12  ;;  %3817 = vtanh.f32 %v2466_v44  ;;  %v2503_v12 = vor.u32 1.1754944e-38, %v2502_v56  ;;  %v2484_v44 = vor.u32 1.1754944e-38, %v2483_v28 }
 0x52a   :  { %v2627_v23 = vadd.f32 %v3806_v11, %v2626_v2  ;;  %v5574_v2 = vpop.eup %3813  ;;  %vm2501_vm14 = vcmp.eq.f32.partialorder %v2500_v49, 8.507059e+37  ;;  %vm2667_vm0 = vweird.f32 %v2661_v27 }
 0x52b   :  { %v2646_v7 = vadd.f32 %v3808_v43, %v2645_v47  ;;  %v2512_v38 = vmul.f32 %v5574_v2, %v5540_v63  ;;  %vm2517_vm3 = vweird.f32 %v5574_v2 }
 0x52c   :  { %v2631_v17 = vsel %vm2630_vm5, %v3806_v11, %v2627_v23  ;;  %v2480_v11 = vsel %vm5560_vm6, %v5527_v6, %v2476_v16  ;;  %vm2518_vm5 = vmor %vm2516_vm4, %vm2517_vm3 }
 0x52d   :  { %v2636_v48 = vsel %vm2633_vm7, %v2635_v4, %v2631_v17  ;;  %v2650_v23 = vsel %vm2649_vm10, %v3808_v43, %v2646_v7  ;;  %v2485_v47 = vsel %vm2482_vm12, %v2484_v44, %v2480_v11  ;;  %v2504_v4 = vsel %vm2501_vm14, %v2503_v12, %v2499_v3 }
 0x52e   :  { %v2678_v25 = vmul.f32 %v3812_v59, %v2636_v48  ;;  %v2655_v22 = vsel %vm2652_vm11, %v2654_v52, %v2650_v23  ;;  %v3816_v16 = vpop.eup %3815  ;;  %v2526_v56 = vmul.f32 %v2504_v4, %v5370_v31  ;;  %v2513_v43 = vsub.f32 1.0, %v2512_v38 }
 0x52f   :  { %v2677_v6 = vmul.f32 %v2655_v22, %v5366_v58  ;;  %v3818_v14 = vpop.eup %3817  ;;  %v2663_v55 = vmul.f32 %v3816_v16, %v2661_v27  ;;  %vm2668_vm15 = vweird.f32 %v3816_v16  ;;  %v2671_v17 = vand.u32 2147483647, %v2661_v27 }
 0x530   :  { %v2527_v28 = vmul.f32 %v3818_v14, %v2485_v47  ;;  %v2514_v58 = vmul.f32 %v5574_v2, %v2513_v43  ;;  %vm2669_vm1 = vmor %vm2667_vm0, %vm2668_vm15  ;;  %v2674_v48 = vor.u32 1.1754944e-38, %v2673_v0  ;;  %v2520_v12 = vand.u32 2147483647, %v5540_v63  ;;  %v3948_v47 = vld [vmem:[#allocation5 + $0x58] sm:$0xff]  ;;  %v5992_v43 = vld [vmem:[#allocation29_spill] sm:$0xff] }
 0x531   :  { %v5586_v62 = vadd.f32 %v2678_v25, %v2677_v6  ;;  %v2664_v50 = vsub.f32 1.0, %v2663_v55  ;;  %vm2672_vm2 = vcmp.eq.f32.partialorder %v2671_v17, 8.507059e+37  ;;  %v2522_v25 = vand.u32 2147483648, %v5540_v63  ;;  %v3947_v63 = vld [vmem:[#allocation5 + $0x78] sm:$0xff]  ;;  %v5991_v6 = vld [vmem:[#allocation23_spill] sm:$0xff] }
 0x532   :  { %v5590_v59 = vadd.f32 %v2527_v28, %v2526_v56  ;;  %v2515_v3 = vadd.f32 %v5574_v2, %v2514_v58  ;;  %vm2521_vm6 = vcmp.eq.f32.partialorder %v2520_v12, 8.507059e+37 }
 0x533   :  { %3819 = vtanh.f32 %v5586_v62  ;;  %v2665_v49 = vmul.f32 %v3816_v16, %v2664_v50  ;;  %v2523_v23 = vor.u32 1.1754944e-38, %v2522_v25  ;;  %v5994_v25 = vld [vmem:[#allocation46_spill] sm:$0xff] }
 0x534   :  { %3821 = vtanh.f32 %v5590_v59  ;;  %v2519_v27 = vsel %vm2518_vm5, %v5574_v2, %v2515_v3 }
 0x535   :  { %v2666_v54 = vadd.f32 %v3816_v16, %v2665_v49  ;;  %v2524_v22 = vsel %vm2521_vm6, %v2523_v23, %v2519_v27 }
 0x537   :  { %v2670_v11 = vsel %vm2669_vm1, %v3816_v16, %v2666_v54  ;;  %v219_v16 = vadd.f32 %v5991_v6, %v5969_v24 }
 0x538   :  { %v2675_v31 = vsel %vm2672_vm2, %v2674_v48, %v2670_v11 }
 0x539   :  { %v3820_v7 = vpop.eup %3819 }
 0x53a   :  { %v2681_v52 = vmul.f32 %v3820_v7, %v2675_v31  ;;  %v3822_v44 = vpop.eup %3821 }
 0x53b   :  { %v2530_v2 = vmul.f32 %v3822_v44, %v2524_v22 }
 0x53c   :  { %3573 = vmatmul.msk.f32.vlgmr.msrb.gmra.mxu0 %vm464_vm13, %v2681_v52  ;;  %3574 = vmatmul.msk.f32.vlgmr.msrb.gmra.mxu1 %vm464_vm13, %v2681_v52 }
 0x53d   :  { %3575 = vmatmul.msk.f32.vlgmr.msra.gmra.mxu2 %vm464_vm13, %v2681_v52  ;;  %3576 = vmatmul.msk.f32.vlgmr.msra.gmra.mxu3 %vm464_vm13, %v2681_v52 }
 0x53e   :  { %2927 = vmatpush.msrb.mxu0 %v5396_v45  ;;  %2947 = vmatpush.msrb.mxu1 %v5399_v1  ;;  %v3949_v45 = vld [vmem:[#allocation5 + $0x38] sm:$0xff] }
 0x53f   :  { %2967 = vmatpush.msra.mxu2 %v5402_v30  ;;  %2987 = vmatpush.msra.mxu3 %v3947_v63  ;;  %v3950_v1 = vld [vmem:[#allocation5 + $0x18] sm:$0xff]  ;;  %v3951_v30 = vld [vmem:[#allocation10 + $0x60] sm:$0xff] }
 0x540   :  { %2928 = vmatpush.msrb.mxu0 %v5406_v40  ;;  %2948 = vmatpush.msrb.mxu1 %v5409_v36  ;;  %v3952_v40 = vld [vmem:[#allocation10 + $0x68] sm:$0xff]  ;;  %v3953_v36 = vld [vmem:[#allocation10 + $0x70] sm:$0xff] }
 0x541   :  { %2968 = vmatpush.msra.mxu2 %v5412_v29  ;;  %2988 = vmatpush.msra.mxu3 %v3948_v47  ;;  %v3954_v29 = vld [vmem:[#allocation10 + $0x78] sm:$0xff] }
 0x542   :  { %2929 = vmatpush.msrb.mxu0 %v5416_v13  ;;  %2949 = vmatpush.msrb.mxu1 %v5419_v20  ;;  %v3955_v13 = vld [vmem:[#allocation10 + $0x40] sm:$0xff]  ;;  %v3956_v20 = vld [vmem:[#allocation10 + $0x48] sm:$0xff] }
 0x543   :  { %2969 = vmatpush.msra.mxu2 %v5422_v10  ;;  %2989 = vmatpush.msra.mxu3 %v3949_v45  ;;  %v3957_v10 = vld [vmem:[#allocation10 + $0x50] sm:$0xff] }
 0x544   :  { %3577 = vmatmul.msk.f32.vlgmr.msra.gmra.mxu0 %vm464_vm13, %v2530_v2  ;;  %3578 = vmatmul.msk.f32.vlgmr.msra.gmra.mxu1 %vm464_vm13, %v2530_v2 }
 0x545   :  { %3579 = vmatmul.msk.f32.vlgmr.msrb.gmra.mxu2 %vm464_vm13, %v2530_v2  ;;  %3580 = vmatmul.msk.f32.vlgmr.msrb.gmra.mxu3 %vm464_vm13, %v2530_v2 }
 0x546   :  { %2930 = vmatpush.msrb.mxu0 %v5430_v57  ;;  %2950 = vmatpush.msrb.mxu1 %v5433_v19  ;;  %v3958_v57 = vld [vmem:[#allocation10 + $0x58] sm:$0xff]  ;;  %v3959_v19 = vld [vmem:[#allocation10 + $0x20] sm:$0xff] }
 0x547   :  { %2970 = vmatpush.msra.mxu2 %v5436_v60  ;;  %2990 = vmatpush.msra.mxu3 %v3950_v1  ;;  %v3960_v60 = vld [vmem:[#allocation10 + $0x28] sm:$0xff] }
 0x548   :  { %3077 = vmatpush.msra.mxu0 %v5440_v39  ;;  %3097 = vmatpush.msra.mxu1 %v5443_v41  ;;  %v3961_v39 = vld [vmem:[#allocation10 + $0x30] sm:$0xff]  ;;  %v3962_v41 = vld [vmem:[#allocation10 + $0x38] sm:$0xff] }
 0x549   :  { %3117 = vmatpush.msrb.mxu2 %v5446_v46  ;;  %3137 = vmatpush.msrb.mxu3 %v5449_v35  ;;  %v3963_v46 = vld [vmem:[#allocation10] sm:$0xff]  ;;  %v3964_v35 = vld [vmem:[#allocation10 + $0x8] sm:$0xff] }
 0x54a   :  { %3078 = vmatpush.msra.mxu0 %v5452_v33  ;;  %3098 = vmatpush.msra.mxu1 %v5455_v9  ;;  %v3965_v33 = vld [vmem:[#allocation10 + $0x10] sm:$0xff]  ;;  %v3966_v9 = vld [vmem:[#allocation10 + $0x18] sm:$0xff] }
 0x54b   :  { %3118 = vmatpush.msrb.mxu2 %v5458_v15  ;;  %3138 = vmatpush.msrb.mxu3 %v5461_v18 }
 0x54c   :  { %3584 = vmatmul.msk.f32.vlgmr.msrb.gmra.mxu0 %vm464_vm13, %v2681_v52  ;;  %3585 = vmatmul.msk.f32.vlgmr.msrb.gmra.mxu1 %vm464_vm13, %v2681_v52 }
 0x54d   :  { %3586 = vmatmul.msk.f32.vlgmr.msra.gmra.mxu2 %vm464_vm13, %v2681_v52  ;;  %3587 = vmatmul.msk.f32.vlgmr.msra.gmra.mxu3 %vm464_vm13, %v2681_v52  ;;  %v5993_v52 = vld [vmem:[#allocation25_spill] sm:$0xff] }
 0x54e   :  { %3079 = vmatpush.msra.mxu0 %v5472_v5  ;;  %3099 = vmatpush.msra.mxu1 %v5475_v32  ;;  %v301_v12 = vadd.f32 %v5994_v25, %v5993_v52 }
 0x54f   :  { %3119 = vmatpush.msrb.mxu2 %v5478_v8  ;;  %3139 = vmatpush.msrb.mxu3 %v5481_v51 }
 0x550   :  { %3080 = vmatpush.msra.mxu0 %v5484_v26  ;;  %3100 = vmatpush.msra.mxu1 %v5487_v53 }
 0x551   :  { %3120 = vmatpush.msrb.mxu2 %v5490_v37  ;;  %3140 = vmatpush.msrb.mxu3 %v5493_v21 }
 0x552   :  { %3160 = vmatpush.msrb.mxu0 %v3951_v30  ;;  %3180 = vmatpush.msrb.mxu1 %v3952_v40 }
 0x553   :  { %3200 = vmatpush.msra.mxu2 %v3953_v36  ;;  %3220 = vmatpush.msra.mxu3 %v3954_v29 }
 0x554   :  { %3161 = vmatpush.msrb.mxu0 %v3955_v13  ;;  %3181 = vmatpush.msrb.mxu1 %v3956_v20  ;;  %v5995_v13 = vld [vmem:[#allocation30_spill] sm:$0xff]  ;;  %v5996_v20 = vld [vmem:[#allocation49_spill] sm:$0xff] }
 0x555   :  { %3201 = vmatpush.msra.mxu2 %v3957_v10  ;;  %3221 = vmatpush.msra.mxu3 %v3958_v57  ;;  %v260_v10 = vadd.f32 %v5996_v20, %v5995_v13 }
 0x556   :  { %3162 = vmatpush.msrb.mxu0 %v3959_v19  ;;  %3182 = vmatpush.msrb.mxu1 %v3960_v60 }
 0x557   :  { %3202 = vmatpush.msra.mxu2 %v3961_v39  ;;  %3222 = vmatpush.msra.mxu3 %v3962_v41  ;;  %v5997_v41 = vld [vmem:[#allocation51_spill] sm:$0xff] }
 0x558   :  { %3163 = vmatpush.msrb.mxu0 %v3963_v46  ;;  %3183 = vmatpush.msrb.mxu1 %v3964_v35 }
 0x559   :  { %3203 = vmatpush.msra.mxu2 %v3965_v33  ;;  %3223 = vmatpush.msra.mxu3 %v3966_v9 }
 0x5b9   :  { %v2702_v15 = vpop.f32.mrf.mxu0  ;;  %v2722_v18 = vpop.f32.mrf.mxu1 }
 0x5c0   :  { %v2762_v5 = vpop.f32.mrf.mxu3  ;;  %v2742_v21 = vpop.f32.mrf.mxu2 }
 0x5c1   :  { %v2785_v32 = vpop.f32.mrf.mxu0  ;;  %v2805_v8 = vpop.f32.mrf.mxu1 }
 0x5c2   :  { %v2786_v51 = vadd.f32 %v2785_v32, %v2702_v15  ;;  %v2806_v26 = vadd.f32 %v2805_v8, %v2722_v18 }
 0x5c4   :  { %v2848_v53 = vadd.f32 %v2786_v51, %v5965_v42  ;;  %v2849_v37 = vadd.f32 %v2806_v26, %v5966_v34 }
 0x5c6   :  { %v3581_v4 = vmul.f32 -1.442695, %v2848_v53  ;;  %v3582_v38 = vmul.f32 -1.442695, %v2849_v37 }
 0x5c8   :  { %3823 = vpow2.f32 %v3581_v4  ;;  %v2845_v14 = vpop.f32.mrf.mxu3  ;;  %v2825_v24 = vpop.f32.mrf.mxu2 }
 0x5c9   :  { %3825 = vpow2.f32 %v3582_v38  ;;  %v2846_v55 = vadd.f32 %v2845_v14, %v2762_v5  ;;  %v2932_v56 = vpop.f32.mrf.mxu0  ;;  %v2952_v28 = vpop.f32.mrf.mxu1  ;;  %v2826_v40 = vadd.f32 %v2825_v24, %v2742_v21 }
 0x5ca   :  { %v2995_v50 = vadd.f32 %v2932_v56, %v5992_v43  ;;  %v2996_v0 = vadd.f32 %v2952_v28, %v219_v16 }
 0x5cb   :  { %v2851_v58 = vadd.f32 %v2846_v55, %v5971_v61  ;;  %v2850_v46 = vadd.f32 %v2826_v40, %v5997_v41 }
 0x5cc   :  { %v3588_v49 = vmul.f32 -1.442695, %v2995_v50  ;;  %v3589_v17 = vmul.f32 -1.442695, %v2996_v0 }
 0x5cd   :  { %v3583_v31 = vmul.f32 -1.442695, %v2851_v58 }
 0x5ce   :  { %v3824_v54 = vpop.eup %3823  ;;  %3827 = vpow2.f32 %v3588_v49 }
 0x5cf   :  { %v3826_v48 = vpop.eup %3825  ;;  %v5646_v7 = vadd.f32 1.0, %v3824_v54  ;;  %3829 = vpow2.f32 %v3589_v17 }
 0x5d0   :  { %v5648_v11 = vadd.f32 1.0, %v3826_v48  ;;  %v2992_v3 = vpop.f32.mrf.mxu3  ;;  %v2972_v36 = vpop.f32.mrf.mxu2 }
 0x5d1   :  { %3831 = vrcp.f32 %v5646_v7  ;;  %v2998_v23 = vadd.f32 %v2992_v3, %v301_v12  ;;  %v2997_v39 = vadd.f32 %v2972_v36, %v260_v10  ;;  %vm2861_vm8 = vweird.f32 %v5646_v7 }
 0x5d2   :  { %3833 = vrcp.f32 %v5648_v11  ;;  %vm2880_vm7 = vweird.f32 %v5648_v11  ;;  %v2865_v9 = vand.u32 2147483647, %v5646_v7  ;;  %v2867_v15 = vand.u32 2147483648, %v5646_v7 }
 0x5d3   :  { %3835 = vpow2.f32 %v3583_v31  ;;  %v3590_v30 = vmul.f32 -1.442695, %v2998_v23  ;;  %v2886_v32 = vand.u32 2147483648, %v5648_v11  ;;  %v2884_v49 = vand.u32 2147483647, %v5648_v11 }
 0x5d4   :  { %v3828_v27 = vpop.eup %3827  ;;  %v2868_v12 = vor.u32 1.1754944e-38, %v2867_v15  ;;  %vm2866_vm6 = vcmp.eq.f32.partialorder %v2865_v9, 8.507059e+37 }
 0x5d5   :  { %v3002_v44 = vadd.f32 1.0, %v3828_v27  ;;  %v3830_v63 = vpop.eup %3829  ;;  %v2887_v25 = vor.u32 1.1754944e-38, %v2886_v32 }
 0x5d6   :  { %v5656_v47 = vadd.f32 1.0, %v3830_v63 }
 0x5d7   :  { %v5654_v22 = vpop.eup %3831  ;;  %3837 = vrcp.f32 %v3002_v44  ;;  %vm3008_vm9 = vweird.f32 %v3002_v44  ;;  %v3014_v53 = vand.u32 2147483648, %v3002_v44  ;;  %v3012_v21 = vand.u32 2147483647, %v3002_v44 }
 0x5d8   :  { %v5658_v2 = vpop.eup %3833  ;;  %v2857_v45 = vmul.f32 %v5654_v22, %v5646_v7  ;;  %3839 = vrcp.f32 %v5656_v47  ;;  %vm2862_vm12 = vweird.f32 %v5654_v22  ;;  %v3033_v6 = vand.u32 2147483648, %v5656_v47 }
 0x5d9   :  { %v2876_v1 = vmul.f32 %v5658_v2, %v5648_v11  ;;  %v3836_v29 = vpop.eup %3835  ;;  %3841 = vpow2.f32 %v3590_v30  ;;  %vm2881_vm11 = vweird.f32 %v5658_v2  ;;  %v3015_v43 = vor.u32 1.1754944e-38, %v3014_v53  ;;  %vm5688_vm0 = vmor %vm2861_vm8, %vm2862_vm12 }
 0x5da   :  { %v2858_v57 = vsub.f32 1.0, %v2857_v45  ;;  %v5668_v35 = vadd.f32 1.0, %v3836_v29  ;;  %3843 = vtanh.f32 %v2997_v39  ;;  %v3031_v50 = vand.u32 2147483647, %v5656_v47  ;;  %vm5697_vm2 = vmor %vm2880_vm7, %vm2881_vm11 }
 0x5db   :  { %v2877_v19 = vsub.f32 1.0, %v2876_v1  ;;  %vm3013_vm1 = vcmp.eq.f32.partialorder %v3012_v21, 8.507059e+37  ;;  %vm3027_vm3 = vweird.f32 %v5656_v47  ;;  %v3034_v11 = vor.u32 1.1754944e-38, %v3033_v6 }
 0x5dc   :  { %v2859_v8 = vmul.f32 %v5654_v22, %v2858_v57  ;;  %3845 = vrcp.f32 %v5668_v35  ;;  %vm3032_vm5 = vcmp.eq.f32.partialorder %v3031_v50, 8.507059e+37  ;;  %vm2885_vm7 = vcmp.eq.f32.partialorder %v2884_v49, 8.507059e+37 }
 0x5dd   :  { %v3838_v60 = vpop.eup %3837  ;;  %v2878_v5 = vmul.f32 %v5658_v2, %v2877_v19 }
 0x5de   :  { %v3004_v33 = vmul.f32 %v3838_v60, %v3002_v44  ;;  %v3840_v18 = vpop.eup %3839  ;;  %vm3009_vm10 = vweird.f32 %v3838_v60  ;;  %v2860_v16 = vadd.f32 %v5654_v22, %v2859_v8 }
 0x5df   :  { %v3023_v26 = vmul.f32 %v3840_v18, %v5656_v47  ;;  %v3842_v4 = vpop.eup %3841  ;;  %v2879_v14 = vadd.f32 %v5658_v2, %v2878_v5  ;;  %vm3028_vm14 = vweird.f32 %v3840_v18  ;;  %vm3010_vm15 = vmor %vm3008_vm9, %vm3009_vm10  ;;  %v2904_v5 = vand.u32 2147483647, %v5668_v35 }
 0x5e0   :  { %v3005_v51 = vsub.f32 1.0, %v3004_v33  ;;  %v3041_v56 = vadd.f32 1.0, %v3842_v4  ;;  %v3844_v58 = vpop.eup %3843  ;;  %v2864_v31 = vsel %vm5688_vm0, %v5654_v22, %v2860_v16  ;;  %vm3029_vm4 = vmor %vm3027_vm3, %vm3028_vm14  ;;  %vm2900_vm14 = vweird.f32 %v5668_v35 }
 0x5e1   :  { %v3024_v38 = vsub.f32 1.0, %v3023_v26  ;;  %v2883_v3 = vsel %vm5697_vm2, %v5658_v2, %v2879_v14  ;;  %v2869_v23 = vsel %vm2866_vm6, %v2868_v12, %v2864_v31  ;;  %vm2905_vm0 = vcmp.eq.f32.partialorder %v2904_v5, 8.507059e+37 }
 0x5e2   :  { %v3006_v37 = vmul.f32 %v3838_v60, %v3005_v51  ;;  %3847 = vrcp.f32 %v3041_v56  ;;  %v3846_v24 = vpop.eup %3845  ;;  %v2888_v63 = vsel %vm2885_vm7, %v2887_v25, %v2883_v3  ;;  %v3053_v20 = vand.u32 2147483648, %v3041_v56 }
 0x5e3   :  { %v3025_v28 = vmul.f32 %v3840_v18, %v3024_v38  ;;  %3849 = vtanh.f32 %v2850_v46  ;;  %v2896_v47 = vmul.f32 %v3846_v24, %v5668_v35  ;;  %v2910_v40 = vmul.f32 %v2888_v63, %v5590_v59 }
 0x5e4   :  { %v3007_v55 = vadd.f32 %v3838_v60, %v3006_v37  ;;  %v3051_v57 = vand.u32 2147483647, %v3041_v56  ;;  %vm3047_vm9 = vweird.f32 %v3041_v56  ;;  %vm2901_vm12 = vweird.f32 %v3846_v24 }
 0x5e5   :  { %v3026_v7 = vadd.f32 %v3840_v18, %v3025_v28  ;;  %v2897_v29 = vsub.f32 1.0, %v2896_v47 }
 0x5e6   :  { %v3011_v17 = vsel %vm3010_vm15, %v3838_v60, %v3007_v55  ;;  %vm3052_vm11 = vcmp.eq.f32.partialorder %v3051_v57, 8.507059e+37  ;;  %vm2902_vm15 = vmor %vm2900_vm14, %vm2901_vm12 }
 0x5e7   :  { %v3016_v48 = vsel %vm3013_vm1, %v3015_v43, %v3011_v17  ;;  %v3030_v27 = vsel %vm3029_vm4, %v3840_v18, %v3026_v7  ;;  %v2898_v60 = vmul.f32 %v3846_v24, %v2897_v29  ;;  %v2906_v18 = vand.u32 2147483648, %v5668_v35 }
 0x5e8   :  { %v3058_v52 = vmul.f32 %v3844_v58, %v3016_v48  ;;  %v3035_v44 = vsel %vm3032_vm5, %v3034_v11, %v3030_v27  ;;  %v3848_v45 = vpop.eup %3847 }
 0x5e9   :  { %v3057_v22 = vmul.f32 %v3035_v44, %v5586_v62  ;;  %v3850_v1 = vpop.eup %3849  ;;  %v3043_v30 = vmul.f32 %v3848_v45, %v3041_v56  ;;  %vm3048_vm8 = vweird.f32 %v3848_v45  ;;  %v3054_v62 = vor.u32 1.1754944e-38, %v3053_v20 }
 0x5ea   :  { %v2911_v36 = vmul.f32 %v3850_v1, %v2869_v23  ;;  %vm3049_vm10 = vmor %vm3047_vm9, %vm3048_vm8  ;;  %v2899_v9 = vadd.f32 %v3846_v24, %v2898_v60  ;;  %v2907_v51 = vor.u32 1.1754944e-38, %v2906_v18 }
 0x5eb   :  { %v3059_v2 = vadd.f32 %v3058_v52, %v3057_v22  ;;  %v3044_v13 = vsub.f32 1.0, %v3043_v30 }
 0x5ec   :  { %v5712_v19 = vadd.f32 %v2911_v36, %v2910_v40  ;;  %v2903_v32 = vsel %vm2902_vm15, %v3846_v24, %v2899_v9 }
 0x5ed   :  { %3851 = vtanh.f32 %v3059_v2  ;;  %v3045_v10 = vmul.f32 %v3848_v45, %v3044_v13  ;;  %v2908_v26 = vsel %vm2905_vm0, %v2907_v51, %v2903_v32 }
 0x5ee   :  { %3853 = vtanh.f32 %v5712_v19 }
 0x5ef   :  { %v3046_v39 = vadd.f32 %v3848_v45, %v3045_v10 }
 0x5f1   :  { %v3050_v33 = vsel %vm3049_vm10, %v3848_v45, %v3046_v39 }
 0x5f2   :  { %v3055_v59 = vsel %vm3052_vm11, %v3054_v62, %v3050_v33 }
 0x5f3   :  { %v3852_v46 = vpop.eup %3851 }
 0x5f4   :  { %v3061_v15 = vmul.f32 %v3852_v46, %v3055_v59  ;;  %v3854_v8 = vpop.eup %3853 }
 0x5f5   :  { %v2914_v53 = vmul.f32 %v3854_v8, %v2908_v26 }
 0x5f6   :  { %3591 = vmatmul.msk.f32.vlgmr.msra.gmra.mxu0 %vm464_vm13, %v3061_v15  ;;  %3592 = vmatmul.msk.f32.vlgmr.msra.gmra.mxu1 %vm464_vm13, %v3061_v15 }
 0x5f7   :  { %3593 = vmatmul.msk.f32.vlgmr.msrb.gmra.mxu2 %vm464_vm13, %v3061_v15  ;;  %3594 = vmatmul.msk.f32.vlgmr.msrb.gmra.mxu3 %vm464_vm13, %v3061_v15 }
 0x5fe   :  { %3595 = vmatmul.msk.f32.vlgmr.msrb.gmra.mxu0 %vm464_vm13, %v2914_v53  ;;  %3596 = vmatmul.msk.f32.vlgmr.msrb.gmra.mxu1 %vm464_vm13, %v2914_v53 }
 0x5ff   :  { %3597 = vmatmul.msk.f32.vlgmr.msra.gmra.mxu2 %vm464_vm13, %v2914_v53  ;;  %3598 = vmatmul.msk.f32.vlgmr.msra.gmra.mxu3 %vm464_vm13, %v2914_v53 }
 0x673   :  { %v3082_v35 = vpop.f32.mrf.mxu0  ;;  %v3102_v37 = vpop.f32.mrf.mxu1 }
 0x67a   :  { %v3142_v21 = vpop.f32.mrf.mxu3  ;;  %v3122_v56 = vpop.f32.mrf.mxu2 }
 0x67b   :  { %v3165_v4 = vpop.f32.mrf.mxu0  ;;  %v3185_v38 = vpop.f32.mrf.mxu1 }
 0x67c   :  { %v3166_v6 = vadd.f32 %v3165_v4, %v3082_v35  ;;  %v3186_v16 = vadd.f32 %v3185_v38, %v3102_v37 }
 0x67e   :  { %v3228_v14 = vadd.f32 %v3166_v6, %v5965_v42  ;;  %v3229_v55 = vadd.f32 %v3186_v16, %v5966_v34 }
 0x680   :  { %v3599_v28 = vmul.f32 -1.442695, %v3228_v14  ;;  %v3600_v43 = vmul.f32 -1.442695, %v3229_v55 }
 0x682   :  { %3855 = vpow2.f32 %v3599_v28  ;;  %v3225_v50 = vpop.f32.mrf.mxu3  ;;  %v3205_v24 = vpop.f32.mrf.mxu2 }
 0x683   :  { %3857 = vpow2.f32 %v3600_v43  ;;  %v3226_v0 = vadd.f32 %v3225_v50, %v3142_v21  ;;  %v3206_v42 = vadd.f32 %v3205_v24, %v3122_v56 }
 0x685   :  { %v3231_v49 = vadd.f32 %v3226_v0, %v5971_v61  ;;  %v3230_v11 = vadd.f32 %v3206_v42, %v5997_v41 }
 0x687   :  { %v3601_v17 = vmul.f32 -1.442695, %v3231_v49 }
 0x688   :  { %v3856_v58 = vpop.eup %3855 }
 0x689   :  { %v3858_v54 = vpop.eup %3857  ;;  %v3235_v48 = vadd.f32 1.0, %v3856_v58  ;;  %3859 = vpow2.f32 %v3601_v17 }
 0x68a   :  { %v3254_v7 = vadd.f32 1.0, %v3858_v54 }
 0x68b   :  { %3861 = vrcp.f32 %v3235_v48  ;;  %v3247_v44 = vand.u32 2147483648, %v3235_v48  ;;  %v3245_v47 = vand.u32 2147483647, %v3235_v48  ;;  %vm3241_vm3 = vweird.f32 %v3235_v48 }
 0x68c   :  { %3863 = vrcp.f32 %v3254_v7  ;;  %v3266_v23 = vand.u32 2147483648, %v3254_v7  ;;  %v3264_v45 = vand.u32 2147483647, %v3254_v7  ;;  %vm3260_vm4 = vweird.f32 %v3254_v7 }
 0x68d   :  { %v3248_v41 = vor.u32 1.1754944e-38, %v3247_v44  ;;  %vm3246_vm7 = vcmp.eq.f32.partialorder %v3245_v47, 8.507059e+37 }
 0x68e   :  { %v3267_v36 = vor.u32 1.1754944e-38, %v3266_v23  ;;  %vm3265_vm8 = vcmp.eq.f32.partialorder %v3264_v45, 8.507059e+37 }
 0x68f   :  { %v3860_v34 = vpop.eup %3859 }
 0x690   :  { %v3274_v31 = vadd.f32 1.0, %v3860_v34 }
 0x691   :  { %v3862_v3 = vpop.eup %3861 }
 0x692   :  { %v3864_v52 = vpop.eup %3863  ;;  %v3237_v25 = vmul.f32 %v3862_v3, %v3235_v48  ;;  %3865 = vrcp.f32 %v3274_v31  ;;  %vm3242_vm1 = vweird.f32 %v3862_v3  ;;  %v3286_v9 = vand.u32 2147483648, %v3274_v31 }
 0x693   :  { %v3256_v12 = vmul.f32 %v3864_v52, %v3254_v7  ;;  %3867 = vtanh.f32 %v3230_v11  ;;  %vm3261_vm2 = vweird.f32 %v3864_v52  ;;  %vm3243_vm5 = vmor %vm3241_vm3, %vm3242_vm1  ;;  %vm3280_vm10 = vweird.f32 %v3274_v31 }
 0x694   :  { %v3238_v61 = vsub.f32 1.0, %v3237_v25  ;;  %vm3262_vm6 = vmor %vm3260_vm4, %vm3261_vm2  ;;  %v3284_v15 = vand.u32 2147483647, %v3274_v31  ;;  %v3287_v5 = vor.u32 1.1754944e-38, %v3286_v9 }
 0x695   :  { %v3257_v27 = vsub.f32 1.0, %v3256_v12 }
 0x696   :  { %v3239_v63 = vmul.f32 %v3862_v3, %v3238_v61  ;;  %vm3285_vm12 = vcmp.eq.f32.partialorder %v3284_v15, 8.507059e+37 }
 0x697   :  { %v3258_v22 = vmul.f32 %v3864_v52, %v3257_v27 }
 0x698   :  { %v3866_v1 = vpop.eup %3865  ;;  %v3240_v2 = vadd.f32 %v3862_v3, %v3239_v63 }
 0x699   :  { %v3259_v30 = vadd.f32 %v3864_v52, %v3258_v22  ;;  %v3276_v40 = vmul.f32 %v3866_v1, %v3274_v31  ;;  %v3868_v13 = vpop.eup %3867  ;;  %vm3281_vm9 = vweird.f32 %v3866_v1 }
 0x69a   :  { %v3244_v29 = vsel %vm3243_vm5, %v3862_v3, %v3240_v2  ;;  %vm3282_vm11 = vmor %vm3280_vm10, %vm3281_vm9 }
 0x69b   :  { %v3249_v20 = vsel %vm3246_vm7, %v3248_v41, %v3244_v29  ;;  %v3263_v10 = vsel %vm3262_vm6, %v3864_v52, %v3259_v30  ;;  %v3277_v57 = vsub.f32 1.0, %v3276_v40 }
 0x69c   :  { %v3268_v60 = vsel %vm3265_vm8, %v3267_v36, %v3263_v10  ;;  %v3291_v39 = vmul.f32 %v3868_v13, %v3249_v20 }
 0x69d   :  { %v3290_v62 = vmul.f32 %v3268_v60, %v5712_v19  ;;  %v3278_v46 = vmul.f32 %v3866_v1, %v3277_v57 }
 0x69f   :  { %v3292_v33 = vadd.f32 %v3291_v39, %v3290_v62  ;;  %v3279_v59 = vadd.f32 %v3866_v1, %v3278_v46 }
 0x6a1   :  { %3869 = vtanh.f32 %v3292_v33  ;;  %v3283_v18 = vsel %vm3282_vm11, %v3866_v1, %v3279_v59 }
 0x6a2   :  { %v3288_v8 = vsel %vm3285_vm12, %v3287_v5, %v3283_v18 }
 0x6a7   :  { %v3870_v32 = vpop.eup %3869 }
 0x6a8   :  { %v3294_v51 = vmul.f32 %v3870_v32, %v3288_v8 }
 0x6a9   :  { %4094 = dma.done.wait [#allocation4], 4736 }
 0x6aa   :  { %4095 = vsyncadd [#allocation4], 4294962560  ;;  %v3304_v26 = vld [vmem:[#allocation3 + $0x20] sm:$0xff]  ;;  %v3303_v53 = vld [vmem:[#allocation3 + $0x18] sm:$0xff]  ;;  %s4104_s7 = smov [#allocation11]   ;;  %s3417_s12 = sshll.u32 %s5746_s8, 4  ;;  %s3418_s12 = int_to_ptr.hbm [resolvable:$true] %s3417_s12 }
 0x6ab   :  { %3353 = vmatpush.msra.mxu0 %v3304_v26  ;;  %v3320_v19 = vld [vmem:[#allocation3 + $0xa0] sm:$0xff]  ;;  %v3319_v35 = vld [vmem:[#allocation3 + $0x98] sm:$0xff]  ;;  %v3302_v37 = vld [vmem:[#allocation3 + $0x10] sm:$0xff]  ;;  %s3415_s9 = sshll.u32 %s4104_s7, 4  ;;  %s3416_s9 = int_to_ptr.vmem [resolvable:$true] %s3415_s9 }
 0x6ac   :  { %3365 = vmatpush.msra.mxu1 %v3320_v19  ;;  %v3318_v21 = vld [vmem:[#allocation3 + $0x90] sm:$0xff]  ;;  %v3301_v4 = vld [vmem:[#allocation3 + $0x8] sm:$0xff]  ;;  %v3316_v6 = vld [vmem:[#allocation3 + $0x80] sm:$0xff] }
 0x6ad   :  { %3354 = vmatpush.msra.mxu0 %v3303_v53  ;;  %v3317_v38 = vld [vmem:[#allocation3 + $0x88] sm:$0xff]  ;;  %v3315_v16 = vld [vmem:[#allocation3 + $0x78] sm:$0xff]  ;;  %v3314_v14 = vld [vmem:[#allocation3 + $0x70] sm:$0xff] }
 0x6ae   :  { %3366 = vmatpush.msra.mxu1 %v3319_v35  ;;  %v3313_v55 = vld [vmem:[#allocation3 + $0x68] sm:$0xff]  ;;  %v3312_v56 = vld [vmem:[#allocation3 + $0x60] sm:$0xff]  ;;  %v3311_v28 = vld [vmem:[#allocation3 + $0x58] sm:$0xff] }
 0x6af   :  { %3355 = vmatpush.msra.mxu0 %v3302_v37  ;;  %v3310_v43 = vld [vmem:[#allocation3 + $0x50] sm:$0xff]  ;;  %v3309_v50 = vld [vmem:[#allocation3 + $0x48] sm:$0xff]  ;;  %v3308_v0 = vld [vmem:[#allocation3 + $0x40] sm:$0xff] }
 0x6b0   :  { %3367 = vmatpush.msra.mxu1 %v3318_v21  ;;  %v3307_v49 = vld [vmem:[#allocation3 + $0x38] sm:$0xff]  ;;  %v3306_v17 = vld [vmem:[#allocation3 + $0x30] sm:$0xff]  ;;  %v3305_v58 = vld [vmem:[#allocation3 + $0x28] sm:$0xff] }
 0x6b1   :  { %3356 = vmatpush.msra.mxu0 %v3301_v4  ;;  %v3336_v54 = vld [vmem:[#allocation3 + $0x120] sm:$0xff]  ;;  %v3335_v48 = vld [vmem:[#allocation3 + $0x118] sm:$0xff]  ;;  %v3334_v7 = vld [vmem:[#allocation3 + $0x110] sm:$0xff] }
 0x6b2   :  { %3602 = vmatmul.msk.f32.vlgmr.msra.gmra.mxu0 %vm464_vm13, %v3294_v51  ;;  %3368 = vmatpush.msra.mxu1 %v3317_v38  ;;  %v3333_v24 = vld [vmem:[#allocation3 + $0x108] sm:$0xff]  ;;  %v3332_v42 = vld [vmem:[#allocation3 + $0x100] sm:$0xff]  ;;  %v3331_v34 = vld [vmem:[#allocation3 + $0xf8] sm:$0xff] }
 0x6b3   :  { %3389 = vmatpush.msrb.mxu2 %v3336_v54  ;;  %v3330_v31 = vld [vmem:[#allocation3 + $0xf0] sm:$0xff]  ;;  %v3329_v3 = vld [vmem:[#allocation3 + $0xe8] sm:$0xff]  ;;  %v3328_v11 = vld [vmem:[#allocation3 + $0xe0] sm:$0xff] }
 0x6b4   :  { %3369 = vmatpush.msra.mxu1 %v3316_v6  ;;  %v3327_v52 = vld [vmem:[#allocation3 + $0xd8] sm:$0xff]  ;;  %v3326_v25 = vld [vmem:[#allocation3 + $0xd0] sm:$0xff]  ;;  %v3325_v12 = vld [vmem:[#allocation3 + $0xc8] sm:$0xff] }
 0x6b5   :  { %3390 = vmatpush.msrb.mxu2 %v3335_v48  ;;  %v3324_v61 = vld [vmem:[#allocation3 + $0xc0] sm:$0xff]  ;;  %v3323_v22 = vld [vmem:[#allocation3 + $0xb8] sm:$0xff]  ;;  %v3322_v45 = vld [vmem:[#allocation3 + $0xb0] sm:$0xff] }
 0x6b6   :  { %3370 = vmatpush.msra.mxu1 %v3315_v16  ;;  %v3967_v27 = vld [vmem:[#allocation3] ss:$0 sm:$0xff]  ;;  %v3321_v1 = vld [vmem:[#allocation3 + $0xa8] sm:$0xff]  ;;  %v3968_v2 = vld [vmem:[#allocation3 + $0x1] ss:$0 sm:$0xff] }
 0x6b7   :  { %3391 = vmatpush.msrb.mxu2 %v3334_v7  ;;  %v3969_v29 = vld [vmem:[#allocation3 + $0x2] ss:$0 sm:$0xff] }
 0x6b8   :  { %3371 = vmatpush.msra.mxu1 %v3314_v14 }
 0x6b9   :  { %3392 = vmatpush.msrb.mxu2 %v3333_v24 }
 0x6ba   :  { %3372 = vmatpush.msra.mxu1 %v3313_v55 }
 0x6bb   :  { %3393 = vmatpush.msrb.mxu2 %v3332_v42 }
 0x6bc   :  { %3373 = vmatpush.msra.mxu1 %v3312_v56 }
 0x6bd   :  { %3394 = vmatpush.msrb.mxu2 %v3331_v34 }
 0x6be   :  { %3374 = vmatpush.msra.mxu1 %v3311_v28 }
 0x6bf   :  { %3395 = vmatpush.msrb.mxu2 %v3330_v31 }
 0x6c0   :  { %3375 = vmatpush.msra.mxu1 %v3310_v43 }
 0x6c1   :  { %3396 = vmatpush.msrb.mxu2 %v3329_v3 }
 0x6c2   :  { %3376 = vmatpush.msra.mxu1 %v3309_v50 }
 0x6c3   :  { %3397 = vmatpush.msrb.mxu2 %v3328_v11 }
 0x6c4   :  { %3377 = vmatpush.msra.mxu1 %v3308_v0 }
 0x6c5   :  { %3398 = vmatpush.msrb.mxu2 %v3327_v52 }
 0x6c6   :  { %3378 = vmatpush.msra.mxu1 %v3307_v49 }
 0x6c7   :  { %3399 = vmatpush.msrb.mxu2 %v3326_v25 }
 0x6c8   :  { %3379 = vmatpush.msra.mxu1 %v3306_v17 }
 0x6c9   :  { %3400 = vmatpush.msrb.mxu2 %v3325_v12 }
 0x6ca   :  { %3380 = vmatpush.msra.mxu1 %v3305_v58 }
 0x6cb   :  { %3401 = vmatpush.msrb.mxu2 %v3324_v61 }
 0x6cd   :  { %3402 = vmatpush.msrb.mxu2 %v3323_v22 }
 0x6cf   :  { %3403 = vmatpush.msrb.mxu2 %v3322_v45 }
 0x6d1   :  { %3404 = vmatpush.msrb.mxu2 %v3321_v1 }
 0x72f   :  { %v3358_v44 = vpop.f32.mrf.mxu0 }
 0x730   :  { %v3359_v23 = vadd.f32 %v3967_v27, %v3358_v44 }
 0x732   :  { %vm3361_vm13 = vcmp.gt.f32.partialorder %v3359_v23, 0.0  ;;  %v3362_v63 = vmul.f32 0.1, %v3359_v23 }
 0x734   :  { %v3363_v47 = vsel %vm3361_vm13, %v3359_v23, %v3362_v63 }
 0x735   :  { %3381 = vmatmul.f32.vlgmr.msra.gmra.mxu1 %v3363_v47 }
 0x7b2   :  { %v3382_v41 = vpop.f32.mrf.mxu1 }
 0x7b3   :  { %v3383_v30 = vadd.f32 %v3968_v2, %v3382_v41 }
 0x7b5   :  { %vm3385_vm14 = vcmp.gt.f32.partialorder %v3383_v30, 0.0  ;;  %v3386_v40 = vmul.f32 0.1, %v3383_v30 }
 0x7b7   :  { %v3387_v36 = vsel %vm3385_vm14, %v3383_v30, %v3386_v40 }
 0x7b8   :  { %3405 = vmatmul.f32.vlgmr.msrb.gmra.mxu2 %v3387_v36 }
 0x83b   :  { %v3406_v13 = vpop.f32.mrf.mxu2 }
 0x83c   :  { %v3407_v20 = vadd.f32 %v3969_v29, %v3406_v13 }
 0x83e   :  { %3409 = vst [vmem:[#allocation11] sm:$0xff] %v3407_v20 }
 0x83f   :  { %3420 = dma.vmem_to_hbm [thread:$0]  %s3416_s9, 128, %s3418_s12, [#allocation7]  }
 0x840   :  { %4096 = dma.done.wait [#allocation7], 128  }
 0x841   :  { %4097 = vsyncadd [#allocation7], 4294967168 }
 0x842   :  { %3425 = vsyncpa [#allocation6], 1 }
 0x843   :  { %3426 = vsyncpa [#allocation9], 1 }
 0x844   :  { %3427 = vsyncpa [#allocation7], 1 }
 0x845   :  { %3428 = vsyncmov [#allocation4] }
 0x848   :  { %s3429_s13 = vpop.sfrf %3428 }
 0x849   :  { %p3603_p0 = scmp.ne.s32.totalorder %s3429_s13, 0 }
 0x84b   :  { %3433 = shalt.err (%p3603_p0)  }

</bundles_post_ra>
